<compile_context>
chip_gen: v5e
topology: v5e:2x2
jax: 0.10.0
libtpu: 0.0.40
codegen_flags: <defaults>
</compile_context>

<pallas_src>
import functools

import jax
import jax.numpy as jnp
from jax import lax
from jax.experimental import pallas as pl
from jax.experimental.pallas import tpu as pltpu


# --------------------------------------------------------------------------
# Single fused kernel: per-time-block input projection (from raw embeddings)
# + bidirectional LSTM recurrence + running max over time + fused decoder
# (ReLU -> Linear -> Dropout(identity) -> Linear).
# --------------------------------------------------------------------------
def bilstm_fused_kernel(embf_ref, embb_ref,
                        wxf_ref, bhf_ref, wxb_ref, bhb_ref,
                        whbd_ref,
                        w1_ref, b1_ref, w2_ref, b2_ref,
                        out_ref,
                        xf_sc, xb_sc, hcat_sc, cf_sc, cb_sc, mf_sc, mb_sc,
                        *, H, BB, t_blk, num_tb):
    tb = pl.program_id(1)
    H4 = 4 * H

    @pl.when(tb == 0)
    def _init():
        hcat_sc[...] = jnp.zeros(hcat_sc.shape, hcat_sc.dtype)
        cf_sc[...] = jnp.zeros(cf_sc.shape, cf_sc.dtype)
        cb_sc[...] = jnp.zeros(cb_sc.shape, cb_sc.dtype)
        mf_sc[...] = jnp.full(mf_sc.shape, -jnp.inf, mf_sc.dtype)
        mb_sc[...] = jnp.full(mb_sc.shape, -jnp.inf, mb_sc.dtype)

    # ---- hoisted input projection for this time block: one 2-D matmul per
    #      direction over all t_blk*BB rows; result stays in VMEM scratch ----
    xf_sc[...] = (jnp.dot(embf_ref[0, 0], wxf_ref[...],
                          preferred_element_type=jnp.float32) + bhf_ref[...])
    xb_sc[...] = (jnp.dot(embb_ref[0, 0], wxb_ref[...],
                          preferred_element_type=jnp.float32) + bhb_ref[...])

    def step(s, carry):
        # Single block-diagonal recurrent matmul for BOTH directions:
        #   [h_f | h_b] (bf16) @ [[W_hf, 0], [0, W_hb]] -> (BB, 8H) f32
        rec = jnp.dot(hcat_sc[...], whbd_ref[...],
                      preferred_element_type=jnp.float32)

        row_f = s * BB                    # forward time offset within block
        row_b = (t_blk - 1 - s) * BB      # backward (time-reversed) offset
        ifoc_f = xf_sc[pl.ds(row_f, BB), :] + rec[:, :H4]
        ifoc_b = xb_sc[pl.ds(row_b, BB), :] + rec[:, H4:]

        # ----- forward direction -----
        ifo_f = jax.nn.sigmoid(ifoc_f[:, :3 * H])       # one EUP op on 3H slab
        i_f = ifo_f[:, 0 * H:1 * H]
        f_f = ifo_f[:, 1 * H:2 * H]
        o_f = ifo_f[:, 2 * H:3 * H]
        c_tilda_f = jnp.tanh(ifoc_f[:, 3 * H:])
        c_f = f_f * cf_sc[...] + i_f * c_tilda_f
        h_f = o_f * jnp.tanh(c_f)
        cf_sc[...] = c_f
        mf_sc[...] = jnp.maximum(mf_sc[...], h_f)

        # ----- backward direction -----
        # NOTE: reference applies sigmoid twice to I/F/O gates; reproduced as a
        # single elementwise-identical double sigmoid over the whole 3H slab.
        ifo_b = jax.nn.sigmoid(jax.nn.sigmoid(ifoc_b[:, :3 * H]))
        i_b = ifo_b[:, 0 * H:1 * H]
        f_b = ifo_b[:, 1 * H:2 * H]
        o_b = ifo_b[:, 2 * H:3 * H]
        c_tilda_b = jnp.tanh(ifoc_b[:, 3 * H:])
        c_b = f_b * cb_sc[...] + i_b * c_tilda_b
        h_b = o_b * jnp.tanh(c_b)
        cb_sc[...] = c_b
        mb_sc[...] = jnp.maximum(mb_sc[...], h_b)

        # hidden state kept in bf16 so the MXU operand needs no per-step cast
        hcat_sc[...] = jnp.concatenate([h_f, h_b], axis=1).astype(hcat_sc.dtype)
        return carry

    lax.fori_loop(0, t_blk, step, 0, unroll=True)

    @pl.when(tb == num_tb - 1)
    def _finalize():
        # concat(max_t H_f, max_t H_b) == max_t concat(H_f, H_b) (per-lane max)
        pooled = jnp.concatenate([mf_sc[...], mb_sc[...]], axis=1)   # (BB, 2H)
        x = jnp.maximum(pooled, 0.0)                                 # ReLU
        h1 = (jnp.dot(x.astype(jnp.bfloat16), w1_ref[...],
                      preferred_element_type=jnp.float32) + b1_ref[...])
        # TODO(synk): nn.Dropout implemented as identity (deterministic / eval-mode).
        out_ref[...] = (jnp.dot(h1.astype(jnp.bfloat16), w2_ref[...],
                                preferred_element_type=jnp.float32) + b2_ref[...])


# --------------------------------------------------------------------------
# Tiling helpers
# --------------------------------------------------------------------------
def _tensorcores_per_chip():
    try:
        info = pltpu.get_tpu_info()
        for attr in ("num_cores", "core_count", "num_tensorcores"):
            v = getattr(info, attr, None)
            if isinstance(v, int) and v > 0:
                return v
    except Exception:
        pass
    return 1   # conservative: do not split the batch if we cannot detect cores


def _pick_batch_block(Bp, cores):
    """Largest multiple-of-8 divisor of Bp, capped so that on multi-core chips
    the 'parallel' batch axis has >= `cores` blocks, and capped at 128 rows."""
    if Bp <= 8:
        return Bp
    target = Bp if cores <= 1 else max(8, Bp // cores)
    target = min(target, 128)
    best = 8
    d = 8
    while d <= min(Bp, target):
        if Bp % d == 0:
            best = d
        d += 8
    return best


def _pick_t_block(T, BB, H, E):
    """Largest divisor of T such that the double-buffered embedding blocks plus
    the in-VMEM pre-activation scratch stay under ~24 MiB."""
    budget = 24 * 1024 * 1024
    for cand in (16, 8, 4, 2, 1):
        if T % cand:
            continue
        rows = cand * BB
        stream_bytes = 2 * 2 * rows * E * 2        # 2 dirs x double-buffer x bf16
        scratch_bytes = 2 * rows * 4 * H * 4       # xf_sc + xb_sc (f32)
        if stream_bytes + scratch_bytes <= budget:
            return cand
    return 1


def _vmem_estimate(t_blk, BB, H, E, label):
    rows = t_blk * BB
    b = 0
    b += 2 * 2 * rows * E * 2                          # emb blocks (double-buffered)
    b += 2 * rows * 4 * H * 4                          # xf/xb VMEM scratch
    b += 2 * (2 * E * 4 * H * 2 + 4 * H * 4)           # W_x* (bf16) + biases
    b += 2 * (2 * H) * (8 * H) * 2                     # block-diag W_h (bf16)
    b += 2 * ((2 * H) * (H // 2) + (H // 2) * label) * 2 + (H // 2 + label) * 4
    b += BB * 2 * H * 2 + 4 * BB * H * 4               # h (bf16) + c / max (f32)
    b += 2 * BB * label * 4                            # output block
    return b


# --------------------------------------------------------------------------
# Full forward pass (embedding lookup + layout reorg is plain-JAX glue)
# --------------------------------------------------------------------------
@jax.jit
def lstm_forward(inputs, params):
    # inputs: (batch, seq) int32 token ids
    B, T = inputs.shape
    E = params["embedding"].shape[1]
    H = params["W_hf"].shape[0]
    label_size = params["W_dec2"].shape[1]

    # Pad batch to a multiple of 8 sublanes (padded rows are independent and
    # sliced off below; token id 0 is used for the pad rows).
    B_pad = ((B + 7) // 8) * 8
    inputs_p = jnp.pad(inputs, ((0, B_pad - B), (0, 0)))

    cores = _tensorcores_per_chip()
    BB = _pick_batch_block(B_pad, cores)
    num_bb = B_pad // BB
    t_blk = _pick_t_block(T, BB, H, E)
    num_tb = T // t_blk

    # Embedding lookup (time-major), bf16 to halve HBM read of the only big
    # input stream.  Reorganize so each (time-block, batch-block) is one
    # contiguous lane-dense 2-D slab -> the in-kernel projection is a single
    # 2-D matmul and no in-kernel reshapes are needed.
    emb = params["embedding"][inputs_p.T].astype(jnp.bfloat16)     # (T, Bp, E)
    emb_r = (emb.reshape(num_tb, t_blk, num_bb, BB, E)
                .transpose(0, 2, 1, 3, 4)
                .reshape(num_tb, num_bb, t_blk * BB, E))

    # Block-diagonal recurrent weight: [h_f | h_b] @ [[W_hf, 0], [0, W_hb]]
    zeros = jnp.zeros((H, 4 * H), params["W_hf"].dtype)
    W_h_bd = jnp.concatenate(
        [jnp.concatenate([params["W_hf"], zeros], axis=1),
         jnp.concatenate([zeros, params["W_hb"]], axis=1)],
        axis=0).astype(jnp.bfloat16)

    kernel = functools.partial(bilstm_fused_kernel, H=H, BB=BB,
                               t_blk=t_blk, num_tb=num_tb)

    est = _vmem_estimate(t_blk, BB, H, E, label_size)
    vmem_limit = int(min(max(2 * est, 16 * 2**20), 40 * 2**20))

    out_p = pl.pallas_call(
        kernel,
        out_shape=jax.ShapeDtypeStruct((B_pad, label_size), jnp.float32),
        grid_spec=pltpu.PrefetchScalarGridSpec(
            num_scalar_prefetch=0,
            grid=(num_bb, num_tb),
            in_specs=[
                # embedding block for the forward direction
                pl.BlockSpec((1, 1, t_blk * BB, E),
                             lambda bb, tb: (tb, bb, 0, 0)),
                # embedding block for the backward direction (time-reversed
                # at block granularity; reversed within the block in-kernel)
                pl.BlockSpec((1, 1, t_blk * BB, E),
                             lambda bb, tb: (num_tb - 1 - tb, bb, 0, 0)),
                pl.BlockSpec((E, 4 * H), lambda bb, tb: (0, 0)),
                pl.BlockSpec((1, 4 * H), lambda bb, tb: (0, 0)),
                pl.BlockSpec((E, 4 * H), lambda bb, tb: (0, 0)),
                pl.BlockSpec((1, 4 * H), lambda bb, tb: (0, 0)),
                pl.BlockSpec((2 * H, 8 * H), lambda bb, tb: (0, 0)),
                pl.BlockSpec((2 * H, H // 2), lambda bb, tb: (0, 0)),
                pl.BlockSpec((1, H // 2), lambda bb, tb: (0, 0)),
                pl.BlockSpec((H // 2, label_size), lambda bb, tb: (0, 0)),
                pl.BlockSpec((1, label_size), lambda bb, tb: (0, 0)),
            ],
            out_specs=pl.BlockSpec((BB, label_size), lambda bb, tb: (bb, 0)),
            scratch_shapes=[
                pltpu.VMEM((t_blk * BB, 4 * H), jnp.float32),   # xf pre-acts
                pltpu.VMEM((t_blk * BB, 4 * H), jnp.float32),   # xb pre-acts
                pltpu.VMEM((BB, 2 * H), jnp.bfloat16),          # [h_f | h_b]
                pltpu.VMEM((BB, H), jnp.float32),               # c_f
                pltpu.VMEM((BB, H), jnp.float32),               # c_b
                pltpu.VMEM((BB, H), jnp.float32),               # max_t h_f
                pltpu.VMEM((BB, H), jnp.float32),               # max_t h_b
            ],
        ),
        compiler_params=pltpu.CompilerParams(
            dimension_semantics=("parallel", "arbitrary"),
            vmem_limit_bytes=vmem_limit),
    )(emb_r, emb_r,
      params["W_xf"].astype(jnp.bfloat16), params["b_hf"],
      params["W_xb"].astype(jnp.bfloat16), params["b_hb"],
      W_h_bd,
      params["W_dec1"].astype(jnp.bfloat16), params["b_dec1"],
      params["W_dec2"].astype(jnp.bfloat16), params["b_dec2"])

    return out_p[:B]


if __name__ == "__main__":
    vocab_size, E, H, label_size = 20, 32, 32, 4
    B, T = 2, 8
    scale = 0.1

    key = jax.random.PRNGKey(0)
    ks = jax.random.split(key, 12)

    params = {
        "embedding": jax.random.normal(ks[0], (vocab_size, E), jnp.float32) * scale,
        # Linear weights stored as (in_features, out_features) so y = x @ W + b
        "W_xf": jax.random.normal(ks[1], (E, 4 * H), jnp.float32) * scale,
        "W_hf": jax.random.normal(ks[2], (H, 4 * H), jnp.float32) * scale,
        "b_hf": jax.random.normal(ks[3], (1, 4 * H), jnp.float32) * scale,
        "W_xb": jax.random.normal(ks[4], (E, 4 * H), jnp.float32) * scale,
        "W_hb": jax.random.normal(ks[5], (H, 4 * H), jnp.float32) * scale,
        "b_hb": jax.random.normal(ks[6], (1, 4 * H), jnp.float32) * scale,
        "W_dec1": jax.random.normal(ks[7], (2 * H, H // 2), jnp.float32) * scale,
        "b_dec1": jax.random.normal(ks[8], (1, H // 2), jnp.float32) * scale,
        "W_dec2": jax.random.normal(ks[9], (H // 2, label_size), jnp.float32) * scale,
        "b_dec2": jax.random.normal(ks[10], (1, label_size), jnp.float32) * scale,
    }

    inputs = jax.random.randint(ks[11], (B, T), 0, vocab_size, dtype=jnp.int32)

    out = lstm_forward(inputs, params)             # (B, label_size)
    jax.block_until_ready(out)
    assert out.shape == (B, label_size)
    print("KERNEL_OK")
</pallas_src>

<mosaic_0001>
module attributes {stable_mosaic.version = 11 : i64} {
  func.func @bilstm_fused_kernel(%arg0: i32, %arg1: i32, %arg2: memref<1x1x64x32xbf16, #tpu.memory_space<vmem>>, %arg3: memref<1x1x64x32xbf16, #tpu.memory_space<vmem>>, %arg4: memref<32x128xbf16, #tpu.memory_space<vmem>>, %arg5: memref<1x128xf32, #tpu.memory_space<vmem>>, %arg6: memref<32x128xbf16, #tpu.memory_space<vmem>>, %arg7: memref<1x128xf32, #tpu.memory_space<vmem>>, %arg8: memref<64x256xbf16, #tpu.memory_space<vmem>>, %arg9: memref<64x16xbf16, #tpu.memory_space<vmem>>, %arg10: memref<1x16xf32, #tpu.memory_space<vmem>>, %arg11: memref<16x4xbf16, #tpu.memory_space<vmem>>, %arg12: memref<1x4xf32, #tpu.memory_space<vmem>>, %arg13: memref<8x4xf32, #tpu.memory_space<vmem>>, %arg14: memref<64x128xf32, #tpu.memory_space<vmem>>, %arg15: memref<64x128xf32, #tpu.memory_space<vmem>>, %arg16: memref<8x64xbf16, #tpu.memory_space<vmem>>, %arg17: memref<8x32xf32, #tpu.memory_space<vmem>>, %arg18: memref<8x32xf32, #tpu.memory_space<vmem>>, %arg19: memref<8x32xf32, #tpu.memory_space<vmem>>, %arg20: memref<8x32xf32, #tpu.memory_space<vmem>>) attributes {dimension_semantics = [#tpu.dimension_semantics<parallel>, #tpu.dimension_semantics<arbitrary>], iteration_bounds = array<i64: 1, 1>, scalar_prefetch = 0 : i64, scratch_operands = 7 : i64, tpu.core_type = #tpu.core_type<tc>, window_params = [{transform_indices = @transform_0, window_bounds = array<i64: 1, 1, 64, 32>}, {transform_indices = @transform_1, window_bounds = array<i64: 1, 1, 64, 32>}, {pipeline_mode = #tpu.pipeline_mode<synchronous>, transform_indices = @transform_2, window_bounds = array<i64: 32, 128>}, {pipeline_mode = #tpu.pipeline_mode<synchronous>, transform_indices = @transform_3, window_bounds = array<i64: 1, 128>}, {pipeline_mode = #tpu.pipeline_mode<synchronous>, transform_indices = @transform_4, window_bounds = array<i64: 32, 128>}, {pipeline_mode = #tpu.pipeline_mode<synchronous>, transform_indices = @transform_5, window_bounds = array<i64: 1, 128>}, {pipeline_mode = #tpu.pipeline_mode<synchronous>, transform_indices = @transform_6, window_bounds = array<i64: 64, 256>}, {pipeline_mode = #tpu.pipeline_mode<synchronous>, transform_indices = @transform_7, window_bounds = array<i64: 64, 16>}, {pipeline_mode = #tpu.pipeline_mode<synchronous>, transform_indices = @transform_8, window_bounds = array<i64: 1, 16>}, {pipeline_mode = #tpu.pipeline_mode<synchronous>, transform_indices = @transform_9, window_bounds = array<i64: 16, 4>}, {pipeline_mode = #tpu.pipeline_mode<synchronous>, transform_indices = @transform_10, window_bounds = array<i64: 1, 4>}, {transform_indices = @transform_11, window_bounds = array<i64: 8, 4>}]} {
    %c0_i32 = arith.constant 0 : i32
    %0 = arith.cmpi eq, %arg1, %c0_i32 : i32
    %1 = arith.extui %0 : i1 to i32
    %c0_i32_0 = arith.constant 0 : i32
    %2 = arith.cmpi ne, %1, %c0_i32_0 : i32
    scf.if %2 {
      %cst_272 = arith.constant 0.000000e+00 : bf16
      %534 = vector.broadcast %cst_272 : bf16 to vector<8x64xbf16>
      %c0_273 = arith.constant 0 : index
      %c0_274 = arith.constant 0 : index
      %535 = vector.load %arg16[%c0_273, %c0_274] : memref<8x64xbf16, #tpu.memory_space<vmem>>, vector<8x64xbf16>
      tpu.vector_store %arg16[%c0_273, %c0_274], %534 {strides = array<i32>} : memref<8x64xbf16, #tpu.memory_space<vmem>>, vector<8x64xbf16>,
      %cst_275 = arith.constant 0.000000e+00 : f32
      %536 = vector.broadcast %cst_275 : f32 to vector<8x32xf32>
      %c0_276 = arith.constant 0 : index
      %c0_277 = arith.constant 0 : index
      %537 = vector.load %arg17[%c0_276, %c0_277] : memref<8x32xf32, #tpu.memory_space<vmem>>, vector<8x32xf32>
      tpu.vector_store %arg17[%c0_276, %c0_277], %536 {strides = array<i32>} : memref<8x32xf32, #tpu.memory_space<vmem>>, vector<8x32xf32>,
      %cst_278 = arith.constant 0.000000e+00 : f32
      %538 = vector.broadcast %cst_278 : f32 to vector<8x32xf32>
      %c0_279 = arith.constant 0 : index
      %c0_280 = arith.constant 0 : index
      %539 = vector.load %arg18[%c0_279, %c0_280] : memref<8x32xf32, #tpu.memory_space<vmem>>, vector<8x32xf32>
      tpu.vector_store %arg18[%c0_279, %c0_280], %538 {strides = array<i32>} : memref<8x32xf32, #tpu.memory_space<vmem>>, vector<8x32xf32>,
      %cst_281 = arith.constant 0xFF800000 : f32
      %540 = vector.broadcast %cst_281 : f32 to vector<8x32xf32>
      %c0_282 = arith.constant 0 : index
      %c0_283 = arith.constant 0 : index
      %541 = vector.load %arg19[%c0_282, %c0_283] : memref<8x32xf32, #tpu.memory_space<vmem>>, vector<8x32xf32>
      tpu.vector_store %arg19[%c0_282, %c0_283], %540 {strides = array<i32>} : memref<8x32xf32, #tpu.memory_space<vmem>>, vector<8x32xf32>,
      %cst_284 = arith.constant 0xFF800000 : f32
      %542 = vector.broadcast %cst_284 : f32 to vector<8x32xf32>
      %c0_285 = arith.constant 0 : index
      %c0_286 = arith.constant 0 : index
      %543 = vector.load %arg20[%c0_285, %c0_286] : memref<8x32xf32, #tpu.memory_space<vmem>>, vector<8x32xf32>
      tpu.vector_store %arg20[%c0_285, %c0_286], %542 {strides = array<i32>} : memref<8x32xf32, #tpu.memory_space<vmem>>, vector<8x32xf32>,
    } else {
    }
    %c0 = arith.constant 0 : index
    %c0_1 = arith.constant 0 : index
    %c0_2 = arith.constant 0 : index
    %c0_3 = arith.constant 0 : index
    %3 = vector.load %arg2[%c0, %c0_1, %c0_2, %c0_3] : memref<1x1x64x32xbf16, #tpu.memory_space<vmem>>, vector<1x1x64x32xbf16>
    %4 = vector.shape_cast %3 : vector<1x1x64x32xbf16> to vector<64x32xbf16>
    %c0_4 = arith.constant 0 : index
    %c0_5 = arith.constant 0 : index
    %5 = vector.load %arg4[%c0_4, %c0_5] : memref<32x128xbf16, #tpu.memory_space<vmem>>, vector<32x128xbf16>
    %cst = arith.constant dense<0.000000e+00> : vector<64x128xf32>
    %6 = tpu.matmul %4, %5, %cst {dimension_numbers = #tpu.dot_dimension_numbers<[1], [0], [0], [1], [0, 0, 1, 1], [], []>} : vector<64x32xbf16>, vector<32x128xbf16>, vector<64x128xf32> -> vector<64x128xf32>
    %c0_6 = arith.constant 0 : index
    %c0_7 = arith.constant 0 : index
    %7 = vector.load %arg5[%c0_6, %c0_7] : memref<1x128xf32, #tpu.memory_space<vmem>>, vector<1x128xf32>
    %8 = vector.broadcast %7 : vector<1x128xf32> to vector<64x128xf32>
    %9 = arith.addf %6, %8 : vector<64x128xf32>
    %c0_8 = arith.constant 0 : index
    %c0_9 = arith.constant 0 : index
    %10 = vector.load %arg14[%c0_8, %c0_9] : memref<64x128xf32, #tpu.memory_space<vmem>>, vector<64x128xf32>
    tpu.vector_store %arg14[%c0_8, %c0_9], %9 {strides = array<i32>} : memref<64x128xf32, #tpu.memory_space<vmem>>, vector<64x128xf32>,
    %c0_10 = arith.constant 0 : index
    %c0_11 = arith.constant 0 : index
    %c0_12 = arith.constant 0 : index
    %c0_13 = arith.constant 0 : index
    %11 = vector.load %arg3[%c0_10, %c0_11, %c0_12, %c0_13] : memref<1x1x64x32xbf16, #tpu.memory_space<vmem>>, vector<1x1x64x32xbf16>
    %12 = vector.shape_cast %11 : vector<1x1x64x32xbf16> to vector<64x32xbf16>
    %c0_14 = arith.constant 0 : index
    %c0_15 = arith.constant 0 : index
    %13 = vector.load %arg6[%c0_14, %c0_15] : memref<32x128xbf16, #tpu.memory_space<vmem>>, vector<32x128xbf16>
    %cst_16 = arith.constant dense<0.000000e+00> : vector<64x128xf32>
    %14 = tpu.matmul %12, %13, %cst_16 {dimension_numbers = #tpu.dot_dimension_numbers<[1], [0], [0], [1], [0, 0, 1, 1], [], []>} : vector<64x32xbf16>, vector<32x128xbf16>, vector<64x128xf32> -> vector<64x128xf32>
    %c0_17 = arith.constant 0 : index
    %c0_18 = arith.constant 0 : index
    %15 = vector.load %arg7[%c0_17, %c0_18] : memref<1x128xf32, #tpu.memory_space<vmem>>, vector<1x128xf32>
    %16 = vector.broadcast %15 : vector<1x128xf32> to vector<64x128xf32>
    %17 = arith.addf %14, %16 : vector<64x128xf32>
    %c0_19 = arith.constant 0 : index
    %c0_20 = arith.constant 0 : index
    %18 = vector.load %arg15[%c0_19, %c0_20] : memref<64x128xf32, #tpu.memory_space<vmem>>, vector<64x128xf32>
    tpu.vector_store %arg15[%c0_19, %c0_20], %17 {strides = array<i32>} : memref<64x128xf32, #tpu.memory_space<vmem>>, vector<64x128xf32>,
    %c0_i32_21 = arith.constant 0 : i32
    %c0_22 = arith.constant 0 : index
    %c0_23 = arith.constant 0 : index
    %19 = vector.load %arg16[%c0_22, %c0_23] : memref<8x64xbf16, #tpu.memory_space<vmem>>, vector<8x64xbf16>
    %c0_24 = arith.constant 0 : index
    %c0_25 = arith.constant 0 : index
    %20 = vector.load %arg8[%c0_24, %c0_25] : memref<64x256xbf16, #tpu.memory_space<vmem>>, vector<64x256xbf16>
    %cst_26 = arith.constant dense<0.000000e+00> : vector<8x256xf32>
    %21 = tpu.matmul %19, %20, %cst_26 {dimension_numbers = #tpu.dot_dimension_numbers<[1], [0], [0], [1], [0, 0, 1, 1], [], []>} : vector<8x64xbf16>, vector<64x256xbf16>, vector<8x256xf32> -> vector<8x256xf32>
    %c8_i32 = arith.constant 8 : i32
    %22 = arith.muli %c0_i32_21, %c8_i32 : i32
    %c7_i32 = arith.constant 7 : i32
    %23 = arith.subi %c7_i32, %c0_i32_21 : i32
    %c8_i32_27 = arith.constant 8 : i32
    %24 = arith.muli %23, %c8_i32_27 : i32
    %25 = arith.index_cast %22 : i32 to index
    %c0_28 = arith.constant 0 : index
    %26 = vector.load %arg14[%25, %c0_28] : memref<64x128xf32, #tpu.memory_space<vmem>>, vector<8x128xf32>
    %27 = vector.extract_strided_slice %21 {offsets = [0, 0], sizes = [8, 128], strides = [1, 1]} : vector<8x256xf32> to vector<8x128xf32>
    %28 = arith.addf %26, %27 : vector<8x128xf32>
    %29 = arith.index_cast %24 : i32 to index
    %c0_29 = arith.constant 0 : index
    %30 = vector.load %arg15[%29, %c0_29] : memref<64x128xf32, #tpu.memory_space<vmem>>, vector<8x128xf32>
    %31 = vector.extract_strided_slice %21 {offsets = [0, 128], sizes = [8, 128], strides = [1, 1]} : vector<8x256xf32> to vector<8x128xf32>
    %32 = arith.addf %30, %31 : vector<8x128xf32>
    %33 = vector.extract_strided_slice %28 {offsets = [0, 0], sizes = [8, 96], strides = [1, 1]} : vector<8x128xf32> to vector<8x96xf32>
    %34 = arith.negf %33 : vector<8x96xf32>
    %35 = math.exp %34 : vector<8x96xf32>
    %cst_30 = arith.constant 1.000000e+00 : f32
    %36 = vector.broadcast %cst_30 : f32 to vector<8x96xf32>
    %37 = arith.addf %36, %35 : vector<8x96xf32>
    %38 = arith.divf %36, %37 : vector<8x96xf32>
    %39 = vector.extract_strided_slice %38 {offsets = [0, 0], sizes = [8, 32], strides = [1, 1]} : vector<8x96xf32> to vector<8x32xf32>
    %40 = vector.extract_strided_slice %38 {offsets = [0, 32], sizes = [8, 32], strides = [1, 1]} : vector<8x96xf32> to vector<8x32xf32>
    %41 = vector.extract_strided_slice %38 {offsets = [0, 64], sizes = [8, 32], strides = [1, 1]} : vector<8x96xf32> to vector<8x32xf32>
    %42 = vector.extract_strided_slice %28 {offsets = [0, 96], sizes = [8, 32], strides = [1, 1]} : vector<8x128xf32> to vector<8x32xf32>
    %43 = math.tanh %42 : vector<8x32xf32>
    %c0_31 = arith.constant 0 : index
    %c0_32 = arith.constant 0 : index
    %44 = vector.load %arg17[%c0_31, %c0_32] : memref<8x32xf32, #tpu.memory_space<vmem>>, vector<8x32xf32>
    %45 = arith.mulf %40, %44 : vector<8x32xf32>
    %46 = arith.mulf %39, %43 : vector<8x32xf32>
    %47 = arith.addf %45, %46 : vector<8x32xf32>
    %48 = math.tanh %47 : vector<8x32xf32>
    %49 = arith.mulf %41, %48 : vector<8x32xf32>
    %c0_33 = arith.constant 0 : index
    %c0_34 = arith.constant 0 : index
    %50 = vector.load %arg17[%c0_33, %c0_34] : memref<8x32xf32, #tpu.memory_space<vmem>>, vector<8x32xf32>
    tpu.vector_store %arg17[%c0_33, %c0_34], %47 {strides = array<i32>} : memref<8x32xf32, #tpu.memory_space<vmem>>, vector<8x32xf32>,
    %c0_35 = arith.constant 0 : index
    %c0_36 = arith.constant 0 : index
    %51 = vector.load %arg19[%c0_35, %c0_36] : memref<8x32xf32, #tpu.memory_space<vmem>>, vector<8x32xf32>
    %52 = arith.maximumf %51, %49 : vector<8x32xf32>
    %c0_37 = arith.constant 0 : index
    %c0_38 = arith.constant 0 : index
    %53 = vector.load %arg19[%c0_37, %c0_38] : memref<8x32xf32, #tpu.memory_space<vmem>>, vector<8x32xf32>
    tpu.vector_store %arg19[%c0_37, %c0_38], %52 {strides = array<i32>} : memref<8x32xf32, #tpu.memory_space<vmem>>, vector<8x32xf32>,
    %54 = vector.extract_strided_slice %32 {offsets = [0, 0], sizes = [8, 96], strides = [1, 1]} : vector<8x128xf32> to vector<8x96xf32>
    %55 = arith.negf %54 : vector<8x96xf32>
    %56 = math.exp %55 : vector<8x96xf32>
    %cst_39 = arith.constant 1.000000e+00 : f32
    %57 = vector.broadcast %cst_39 : f32 to vector<8x96xf32>
    %58 = arith.addf %57, %56 : vector<8x96xf32>
    %59 = arith.divf %57, %58 : vector<8x96xf32>
    %60 = arith.negf %59 : vector<8x96xf32>
    %61 = math.exp %60 : vector<8x96xf32>
    %cst_40 = arith.constant 1.000000e+00 : f32
    %62 = vector.broadcast %cst_40 : f32 to vector<8x96xf32>
    %63 = arith.addf %62, %61 : vector<8x96xf32>
    %64 = arith.divf %62, %63 : vector<8x96xf32>
    %65 = vector.extract_strided_slice %64 {offsets = [0, 0], sizes = [8, 32], strides = [1, 1]} : vector<8x96xf32> to vector<8x32xf32>
    %66 = vector.extract_strided_slice %64 {offsets = [0, 32], sizes = [8, 32], strides = [1, 1]} : vector<8x96xf32> to vector<8x32xf32>
    %67 = vector.extract_strided_slice %64 {offsets = [0, 64], sizes = [8, 32], strides = [1, 1]} : vector<8x96xf32> to vector<8x32xf32>
    %68 = vector.extract_strided_slice %32 {offsets = [0, 96], sizes = [8, 32], strides = [1, 1]} : vector<8x128xf32> to vector<8x32xf32>
    %69 = math.tanh %68 : vector<8x32xf32>
    %c0_41 = arith.constant 0 : index
    %c0_42 = arith.constant 0 : index
    %70 = vector.load %arg18[%c0_41, %c0_42] : memref<8x32xf32, #tpu.memory_space<vmem>>, vector<8x32xf32>
    %71 = arith.mulf %66, %70 : vector<8x32xf32>
    %72 = arith.mulf %65, %69 : vector<8x32xf32>
    %73 = arith.addf %71, %72 : vector<8x32xf32>
    %74 = math.tanh %73 : vector<8x32xf32>
    %75 = arith.mulf %67, %74 : vector<8x32xf32>
    %c0_43 = arith.constant 0 : index
    %c0_44 = arith.constant 0 : index
    %76 = vector.load %arg18[%c0_43, %c0_44] : memref<8x32xf32, #tpu.memory_space<vmem>>, vector<8x32xf32>
    tpu.vector_store %arg18[%c0_43, %c0_44], %73 {strides = array<i32>} : memref<8x32xf32, #tpu.memory_space<vmem>>, vector<8x32xf32>,
    %c0_45 = arith.constant 0 : index
    %c0_46 = arith.constant 0 : index
    %77 = vector.load %arg20[%c0_45, %c0_46] : memref<8x32xf32, #tpu.memory_space<vmem>>, vector<8x32xf32>
    %78 = arith.maximumf %77, %75 : vector<8x32xf32>
    %c0_47 = arith.constant 0 : index
    %c0_48 = arith.constant 0 : index
    %79 = vector.load %arg20[%c0_47, %c0_48] : memref<8x32xf32, #tpu.memory_space<vmem>>, vector<8x32xf32>
    tpu.vector_store %arg20[%c0_47, %c0_48], %78 {strides = array<i32>} : memref<8x32xf32, #tpu.memory_space<vmem>>, vector<8x32xf32>,
    %80 = tpu.concatenate %49, %75 in 1 : vector<8x32xf32>, vector<8x32xf32> -> vector<8x64xf32>
    %81 = arith.truncf %80 : vector<8x64xf32> to vector<8x64xbf16>
    %c0_49 = arith.constant 0 : index
    %c0_50 = arith.constant 0 : index
    %82 = vector.load %arg16[%c0_49, %c0_50] : memref<8x64xbf16, #tpu.memory_space<vmem>>, vector<8x64xbf16>
    tpu.vector_store %arg16[%c0_49, %c0_50], %81 {strides = array<i32>} : memref<8x64xbf16, #tpu.memory_space<vmem>>, vector<8x64xbf16>,
    %c1_i32 = arith.constant 1 : i32
    %c0_51 = arith.constant 0 : index
    %c0_52 = arith.constant 0 : index
    %83 = vector.load %arg16[%c0_51, %c0_52] : memref<8x64xbf16, #tpu.memory_space<vmem>>, vector<8x64xbf16>
    %c0_53 = arith.constant 0 : index
    %c0_54 = arith.constant 0 : index
    %84 = vector.load %arg8[%c0_53, %c0_54] : memref<64x256xbf16, #tpu.memory_space<vmem>>, vector<64x256xbf16>
    %cst_55 = arith.constant dense<0.000000e+00> : vector<8x256xf32>
    %85 = tpu.matmul %83, %84, %cst_55 {dimension_numbers = #tpu.dot_dimension_numbers<[1], [0], [0], [1], [0, 0, 1, 1], [], []>} : vector<8x64xbf16>, vector<64x256xbf16>, vector<8x256xf32> -> vector<8x256xf32>
    %c8_i32_56 = arith.constant 8 : i32
    %86 = arith.muli %c1_i32, %c8_i32_56 : i32
    %c7_i32_57 = arith.constant 7 : i32
    %87 = arith.subi %c7_i32_57, %c1_i32 : i32
    %c8_i32_58 = arith.constant 8 : i32
    %88 = arith.muli %87, %c8_i32_58 : i32
    %89 = arith.index_cast %86 : i32 to index
    %c0_59 = arith.constant 0 : index
    %90 = vector.load %arg14[%89, %c0_59] : memref<64x128xf32, #tpu.memory_space<vmem>>, vector<8x128xf32>
    %91 = vector.extract_strided_slice %85 {offsets = [0, 0], sizes = [8, 128], strides = [1, 1]} : vector<8x256xf32> to vector<8x128xf32>
    %92 = arith.addf %90, %91 : vector<8x128xf32>
    %93 = arith.index_cast %88 : i32 to index
    %c0_60 = arith.constant 0 : index
    %94 = vector.load %arg15[%93, %c0_60] : memref<64x128xf32, #tpu.memory_space<vmem>>, vector<8x128xf32>
    %95 = vector.extract_strided_slice %85 {offsets = [0, 128], sizes = [8, 128], strides = [1, 1]} : vector<8x256xf32> to vector<8x128xf32>
    %96 = arith.addf %94, %95 : vector<8x128xf32>
    %97 = vector.extract_strided_slice %92 {offsets = [0, 0], sizes = [8, 96], strides = [1, 1]} : vector<8x128xf32> to vector<8x96xf32>
    %98 = arith.negf %97 : vector<8x96xf32>
    %99 = math.exp %98 : vector<8x96xf32>
    %cst_61 = arith.constant 1.000000e+00 : f32
    %100 = vector.broadcast %cst_61 : f32 to vector<8x96xf32>
    %101 = arith.addf %100, %99 : vector<8x96xf32>
    %102 = arith.divf %100, %101 : vector<8x96xf32>
    %103 = vector.extract_strided_slice %102 {offsets = [0, 0], sizes = [8, 32], strides = [1, 1]} : vector<8x96xf32> to vector<8x32xf32>
    %104 = vector.extract_strided_slice %102 {offsets = [0, 32], sizes = [8, 32], strides = [1, 1]} : vector<8x96xf32> to vector<8x32xf32>
    %105 = vector.extract_strided_slice %102 {offsets = [0, 64], sizes = [8, 32], strides = [1, 1]} : vector<8x96xf32> to vector<8x32xf32>
    %106 = vector.extract_strided_slice %92 {offsets = [0, 96], sizes = [8, 32], strides = [1, 1]} : vector<8x128xf32> to vector<8x32xf32>
    %107 = math.tanh %106 : vector<8x32xf32>
    %c0_62 = arith.constant 0 : index
    %c0_63 = arith.constant 0 : index
    %108 = vector.load %arg17[%c0_62, %c0_63] : memref<8x32xf32, #tpu.memory_space<vmem>>, vector<8x32xf32>
    %109 = arith.mulf %104, %108 : vector<8x32xf32>
    %110 = arith.mulf %103, %107 : vector<8x32xf32>
    %111 = arith.addf %109, %110 : vector<8x32xf32>
    %112 = math.tanh %111 : vector<8x32xf32>
    %113 = arith.mulf %105, %112 : vector<8x32xf32>
    %c0_64 = arith.constant 0 : index
    %c0_65 = arith.constant 0 : index
    %114 = vector.load %arg17[%c0_64, %c0_65] : memref<8x32xf32, #tpu.memory_space<vmem>>, vector<8x32xf32>
    tpu.vector_store %arg17[%c0_64, %c0_65], %111 {strides = array<i32>} : memref<8x32xf32, #tpu.memory_space<vmem>>, vector<8x32xf32>,
    %c0_66 = arith.constant 0 : index
    %c0_67 = arith.constant 0 : index
    %115 = vector.load %arg19[%c0_66, %c0_67] : memref<8x32xf32, #tpu.memory_space<vmem>>, vector<8x32xf32>
    %116 = arith.maximumf %115, %113 : vector<8x32xf32>
    %c0_68 = arith.constant 0 : index
    %c0_69 = arith.constant 0 : index
    %117 = vector.load %arg19[%c0_68, %c0_69] : memref<8x32xf32, #tpu.memory_space<vmem>>, vector<8x32xf32>
    tpu.vector_store %arg19[%c0_68, %c0_69], %116 {strides = array<i32>} : memref<8x32xf32, #tpu.memory_space<vmem>>, vector<8x32xf32>,
    %118 = vector.extract_strided_slice %96 {offsets = [0, 0], sizes = [8, 96], strides = [1, 1]} : vector<8x128xf32> to vector<8x96xf32>
    %119 = arith.negf %118 : vector<8x96xf32>
    %120 = math.exp %119 : vector<8x96xf32>
    %cst_70 = arith.constant 1.000000e+00 : f32
    %121 = vector.broadcast %cst_70 : f32 to vector<8x96xf32>
    %122 = arith.addf %121, %120 : vector<8x96xf32>
    %123 = arith.divf %121, %122 : vector<8x96xf32>
    %124 = arith.negf %123 : vector<8x96xf32>
    %125 = math.exp %124 : vector<8x96xf32>
    %cst_71 = arith.constant 1.000000e+00 : f32
    %126 = vector.broadcast %cst_71 : f32 to vector<8x96xf32>
    %127 = arith.addf %126, %125 : vector<8x96xf32>
    %128 = arith.divf %126, %127 : vector<8x96xf32>
    %129 = vector.extract_strided_slice %128 {offsets = [0, 0], sizes = [8, 32], strides = [1, 1]} : vector<8x96xf32> to vector<8x32xf32>
    %130 = vector.extract_strided_slice %128 {offsets = [0, 32], sizes = [8, 32], strides = [1, 1]} : vector<8x96xf32> to vector<8x32xf32>
    %131 = vector.extract_strided_slice %128 {offsets = [0, 64], sizes = [8, 32], strides = [1, 1]} : vector<8x96xf32> to vector<8x32xf32>
    %132 = vector.extract_strided_slice %96 {offsets = [0, 96], sizes = [8, 32], strides = [1, 1]} : vector<8x128xf32> to vector<8x32xf32>
    %133 = math.tanh %132 : vector<8x32xf32>
    %c0_72 = arith.constant 0 : index
    %c0_73 = arith.constant 0 : index
    %134 = vector.load %arg18[%c0_72, %c0_73] : memref<8x32xf32, #tpu.memory_space<vmem>>, vector<8x32xf32>
    %135 = arith.mulf %130, %134 : vector<8x32xf32>
    %136 = arith.mulf %129, %133 : vector<8x32xf32>
    %137 = arith.addf %135, %136 : vector<8x32xf32>
    %138 = math.tanh %137 : vector<8x32xf32>
    %139 = arith.mulf %131, %138 : vector<8x32xf32>
    %c0_74 = arith.constant 0 : index
    %c0_75 = arith.constant 0 : index
    %140 = vector.load %arg18[%c0_74, %c0_75] : memref<8x32xf32, #tpu.memory_space<vmem>>, vector<8x32xf32>
    tpu.vector_store %arg18[%c0_74, %c0_75], %137 {strides = array<i32>} : memref<8x32xf32, #tpu.memory_space<vmem>>, vector<8x32xf32>,
    %c0_76 = arith.constant 0 : index
    %c0_77 = arith.constant 0 : index
    %141 = vector.load %arg20[%c0_76, %c0_77] : memref<8x32xf32, #tpu.memory_space<vmem>>, vector<8x32xf32>
    %142 = arith.maximumf %141, %139 : vector<8x32xf32>
    %c0_78 = arith.constant 0 : index
    %c0_79 = arith.constant 0 : index
    %143 = vector.load %arg20[%c0_78, %c0_79] : memref<8x32xf32, #tpu.memory_space<vmem>>, vector<8x32xf32>
    tpu.vector_store %arg20[%c0_78, %c0_79], %142 {strides = array<i32>} : memref<8x32xf32, #tpu.memory_space<vmem>>, vector<8x32xf32>,
    %144 = tpu.concatenate %113, %139 in 1 : vector<8x32xf32>, vector<8x32xf32> -> vector<8x64xf32>
    %145 = arith.truncf %144 : vector<8x64xf32> to vector<8x64xbf16>
    %c0_80 = arith.constant 0 : index
    %c0_81 = arith.constant 0 : index
    %146 = vector.load %arg16[%c0_80, %c0_81] : memref<8x64xbf16, #tpu.memory_space<vmem>>, vector<8x64xbf16>
    tpu.vector_store %arg16[%c0_80, %c0_81], %145 {strides = array<i32>} : memref<8x64xbf16, #tpu.memory_space<vmem>>, vector<8x64xbf16>,
    %c2_i32 = arith.constant 2 : i32
    %c0_82 = arith.constant 0 : index
    %c0_83 = arith.constant 0 : index
    %147 = vector.load %arg16[%c0_82, %c0_83] : memref<8x64xbf16, #tpu.memory_space<vmem>>, vector<8x64xbf16>
    %c0_84 = arith.constant 0 : index
    %c0_85 = arith.constant 0 : index
    %148 = vector.load %arg8[%c0_84, %c0_85] : memref<64x256xbf16, #tpu.memory_space<vmem>>, vector<64x256xbf16>
    %cst_86 = arith.constant dense<0.000000e+00> : vector<8x256xf32>
    %149 = tpu.matmul %147, %148, %cst_86 {dimension_numbers = #tpu.dot_dimension_numbers<[1], [0], [0], [1], [0, 0, 1, 1], [], []>} : vector<8x64xbf16>, vector<64x256xbf16>, vector<8x256xf32> -> vector<8x256xf32>
    %c8_i32_87 = arith.constant 8 : i32
    %150 = arith.muli %c2_i32, %c8_i32_87 : i32
    %c7_i32_88 = arith.constant 7 : i32
    %151 = arith.subi %c7_i32_88, %c2_i32 : i32
    %c8_i32_89 = arith.constant 8 : i32
    %152 = arith.muli %151, %c8_i32_89 : i32
    %153 = arith.index_cast %150 : i32 to index
    %c0_90 = arith.constant 0 : index
    %154 = vector.load %arg14[%153, %c0_90] : memref<64x128xf32, #tpu.memory_space<vmem>>, vector<8x128xf32>
    %155 = vector.extract_strided_slice %149 {offsets = [0, 0], sizes = [8, 128], strides = [1, 1]} : vector<8x256xf32> to vector<8x128xf32>
    %156 = arith.addf %154, %155 : vector<8x128xf32>
    %157 = arith.index_cast %152 : i32 to index
    %c0_91 = arith.constant 0 : index
    %158 = vector.load %arg15[%157, %c0_91] : memref<64x128xf32, #tpu.memory_space<vmem>>, vector<8x128xf32>
    %159 = vector.extract_strided_slice %149 {offsets = [0, 128], sizes = [8, 128], strides = [1, 1]} : vector<8x256xf32> to vector<8x128xf32>
    %160 = arith.addf %158, %159 : vector<8x128xf32>
    %161 = vector.extract_strided_slice %156 {offsets = [0, 0], sizes = [8, 96], strides = [1, 1]} : vector<8x128xf32> to vector<8x96xf32>
    %162 = arith.negf %161 : vector<8x96xf32>
    %163 = math.exp %162 : vector<8x96xf32>
    %cst_92 = arith.constant 1.000000e+00 : f32
    %164 = vector.broadcast %cst_92 : f32 to vector<8x96xf32>
    %165 = arith.addf %164, %163 : vector<8x96xf32>
    %166 = arith.divf %164, %165 : vector<8x96xf32>
    %167 = vector.extract_strided_slice %166 {offsets = [0, 0], sizes = [8, 32], strides = [1, 1]} : vector<8x96xf32> to vector<8x32xf32>
    %168 = vector.extract_strided_slice %166 {offsets = [0, 32], sizes = [8, 32], strides = [1, 1]} : vector<8x96xf32> to vector<8x32xf32>
    %169 = vector.extract_strided_slice %166 {offsets = [0, 64], sizes = [8, 32], strides = [1, 1]} : vector<8x96xf32> to vector<8x32xf32>
    %170 = vector.extract_strided_slice %156 {offsets = [0, 96], sizes = [8, 32], strides = [1, 1]} : vector<8x128xf32> to vector<8x32xf32>
    %171 = math.tanh %170 : vector<8x32xf32>
    %c0_93 = arith.constant 0 : index
    %c0_94 = arith.constant 0 : index
    %172 = vector.load %arg17[%c0_93, %c0_94] : memref<8x32xf32, #tpu.memory_space<vmem>>, vector<8x32xf32>
    %173 = arith.mulf %168, %172 : vector<8x32xf32>
    %174 = arith.mulf %167, %171 : vector<8x32xf32>
    %175 = arith.addf %173, %174 : vector<8x32xf32>
    %176 = math.tanh %175 : vector<8x32xf32>
    %177 = arith.mulf %169, %176 : vector<8x32xf32>
    %c0_95 = arith.constant 0 : index
    %c0_96 = arith.constant 0 : index
    %178 = vector.load %arg17[%c0_95, %c0_96] : memref<8x32xf32, #tpu.memory_space<vmem>>, vector<8x32xf32>
    tpu.vector_store %arg17[%c0_95, %c0_96], %175 {strides = array<i32>} : memref<8x32xf32, #tpu.memory_space<vmem>>, vector<8x32xf32>,
    %c0_97 = arith.constant 0 : index
    %c0_98 = arith.constant 0 : index
    %179 = vector.load %arg19[%c0_97, %c0_98] : memref<8x32xf32, #tpu.memory_space<vmem>>, vector<8x32xf32>
    %180 = arith.maximumf %179, %177 : vector<8x32xf32>
    %c0_99 = arith.constant 0 : index
    %c0_100 = arith.constant 0 : index
    %181 = vector.load %arg19[%c0_99, %c0_100] : memref<8x32xf32, #tpu.memory_space<vmem>>, vector<8x32xf32>
    tpu.vector_store %arg19[%c0_99, %c0_100], %180 {strides = array<i32>} : memref<8x32xf32, #tpu.memory_space<vmem>>, vector<8x32xf32>,
    %182 = vector.extract_strided_slice %160 {offsets = [0, 0], sizes = [8, 96], strides = [1, 1]} : vector<8x128xf32> to vector<8x96xf32>
    %183 = arith.negf %182 : vector<8x96xf32>
    %184 = math.exp %183 : vector<8x96xf32>
    %cst_101 = arith.constant 1.000000e+00 : f32
    %185 = vector.broadcast %cst_101 : f32 to vector<8x96xf32>
    %186 = arith.addf %185, %184 : vector<8x96xf32>
    %187 = arith.divf %185, %186 : vector<8x96xf32>
    %188 = arith.negf %187 : vector<8x96xf32>
    %189 = math.exp %188 : vector<8x96xf32>
    %cst_102 = arith.constant 1.000000e+00 : f32
    %190 = vector.broadcast %cst_102 : f32 to vector<8x96xf32>
    %191 = arith.addf %190, %189 : vector<8x96xf32>
    %192 = arith.divf %190, %191 : vector<8x96xf32>
    %193 = vector.extract_strided_slice %192 {offsets = [0, 0], sizes = [8, 32], strides = [1, 1]} : vector<8x96xf32> to vector<8x32xf32>
    %194 = vector.extract_strided_slice %192 {offsets = [0, 32], sizes = [8, 32], strides = [1, 1]} : vector<8x96xf32> to vector<8x32xf32>
    %195 = vector.extract_strided_slice %192 {offsets = [0, 64], sizes = [8, 32], strides = [1, 1]} : vector<8x96xf32> to vector<8x32xf32>
    %196 = vector.extract_strided_slice %160 {offsets = [0, 96], sizes = [8, 32], strides = [1, 1]} : vector<8x128xf32> to vector<8x32xf32>
    %197 = math.tanh %196 : vector<8x32xf32>
    %c0_103 = arith.constant 0 : index
    %c0_104 = arith.constant 0 : index
    %198 = vector.load %arg18[%c0_103, %c0_104] : memref<8x32xf32, #tpu.memory_space<vmem>>, vector<8x32xf32>
    %199 = arith.mulf %194, %198 : vector<8x32xf32>
    %200 = arith.mulf %193, %197 : vector<8x32xf32>
    %201 = arith.addf %199, %200 : vector<8x32xf32>
    %202 = math.tanh %201 : vector<8x32xf32>
    %203 = arith.mulf %195, %202 : vector<8x32xf32>
    %c0_105 = arith.constant 0 : index
    %c0_106 = arith.constant 0 : index
    %204 = vector.load %arg18[%c0_105, %c0_106] : memref<8x32xf32, #tpu.memory_space<vmem>>, vector<8x32xf32>
    tpu.vector_store %arg18[%c0_105, %c0_106], %201 {strides = array<i32>} : memref<8x32xf32, #tpu.memory_space<vmem>>, vector<8x32xf32>,
    %c0_107 = arith.constant 0 : index
    %c0_108 = arith.constant 0 : index
    %205 = vector.load %arg20[%c0_107, %c0_108] : memref<8x32xf32, #tpu.memory_space<vmem>>, vector<8x32xf32>
    %206 = arith.maximumf %205, %203 : vector<8x32xf32>
    %c0_109 = arith.constant 0 : index
    %c0_110 = arith.constant 0 : index
    %207 = vector.load %arg20[%c0_109, %c0_110] : memref<8x32xf32, #tpu.memory_space<vmem>>, vector<8x32xf32>
    tpu.vector_store %arg20[%c0_109, %c0_110], %206 {strides = array<i32>} : memref<8x32xf32, #tpu.memory_space<vmem>>, vector<8x32xf32>,
    %208 = tpu.concatenate %177, %203 in 1 : vector<8x32xf32>, vector<8x32xf32> -> vector<8x64xf32>
    %209 = arith.truncf %208 : vector<8x64xf32> to vector<8x64xbf16>
    %c0_111 = arith.constant 0 : index
    %c0_112 = arith.constant 0 : index
    %210 = vector.load %arg16[%c0_111, %c0_112] : memref<8x64xbf16, #tpu.memory_space<vmem>>, vector<8x64xbf16>
    tpu.vector_store %arg16[%c0_111, %c0_112], %209 {strides = array<i32>} : memref<8x64xbf16, #tpu.memory_space<vmem>>, vector<8x64xbf16>,
    %c3_i32 = arith.constant 3 : i32
    %c0_113 = arith.constant 0 : index
    %c0_114 = arith.constant 0 : index
    %211 = vector.load %arg16[%c0_113, %c0_114] : memref<8x64xbf16, #tpu.memory_space<vmem>>, vector<8x64xbf16>
    %c0_115 = arith.constant 0 : index
    %c0_116 = arith.constant 0 : index
    %212 = vector.load %arg8[%c0_115, %c0_116] : memref<64x256xbf16, #tpu.memory_space<vmem>>, vector<64x256xbf16>
    %cst_117 = arith.constant dense<0.000000e+00> : vector<8x256xf32>
    %213 = tpu.matmul %211, %212, %cst_117 {dimension_numbers = #tpu.dot_dimension_numbers<[1], [0], [0], [1], [0, 0, 1, 1], [], []>} : vector<8x64xbf16>, vector<64x256xbf16>, vector<8x256xf32> -> vector<8x256xf32>
    %c8_i32_118 = arith.constant 8 : i32
    %214 = arith.muli %c3_i32, %c8_i32_118 : i32
    %c7_i32_119 = arith.constant 7 : i32
    %215 = arith.subi %c7_i32_119, %c3_i32 : i32
    %c8_i32_120 = arith.constant 8 : i32
    %216 = arith.muli %215, %c8_i32_120 : i32
    %217 = arith.index_cast %214 : i32 to index
    %c0_121 = arith.constant 0 : index
    %218 = vector.load %arg14[%217, %c0_121] : memref<64x128xf32, #tpu.memory_space<vmem>>, vector<8x128xf32>
    %219 = vector.extract_strided_slice %213 {offsets = [0, 0], sizes = [8, 128], strides = [1, 1]} : vector<8x256xf32> to vector<8x128xf32>
    %220 = arith.addf %218, %219 : vector<8x128xf32>
    %221 = arith.index_cast %216 : i32 to index
    %c0_122 = arith.constant 0 : index
    %222 = vector.load %arg15[%221, %c0_122] : memref<64x128xf32, #tpu.memory_space<vmem>>, vector<8x128xf32>
    %223 = vector.extract_strided_slice %213 {offsets = [0, 128], sizes = [8, 128], strides = [1, 1]} : vector<8x256xf32> to vector<8x128xf32>
    %224 = arith.addf %222, %223 : vector<8x128xf32>
    %225 = vector.extract_strided_slice %220 {offsets = [0, 0], sizes = [8, 96], strides = [1, 1]} : vector<8x128xf32> to vector<8x96xf32>
    %226 = arith.negf %225 : vector<8x96xf32>
    %227 = math.exp %226 : vector<8x96xf32>
    %cst_123 = arith.constant 1.000000e+00 : f32
    %228 = vector.broadcast %cst_123 : f32 to vector<8x96xf32>
    %229 = arith.addf %228, %227 : vector<8x96xf32>
    %230 = arith.divf %228, %229 : vector<8x96xf32>
    %231 = vector.extract_strided_slice %230 {offsets = [0, 0], sizes = [8, 32], strides = [1, 1]} : vector<8x96xf32> to vector<8x32xf32>
    %232 = vector.extract_strided_slice %230 {offsets = [0, 32], sizes = [8, 32], strides = [1, 1]} : vector<8x96xf32> to vector<8x32xf32>
    %233 = vector.extract_strided_slice %230 {offsets = [0, 64], sizes = [8, 32], strides = [1, 1]} : vector<8x96xf32> to vector<8x32xf32>
    %234 = vector.extract_strided_slice %220 {offsets = [0, 96], sizes = [8, 32], strides = [1, 1]} : vector<8x128xf32> to vector<8x32xf32>
    %235 = math.tanh %234 : vector<8x32xf32>
    %c0_124 = arith.constant 0 : index
    %c0_125 = arith.constant 0 : index
    %236 = vector.load %arg17[%c0_124, %c0_125] : memref<8x32xf32, #tpu.memory_space<vmem>>, vector<8x32xf32>
    %237 = arith.mulf %232, %236 : vector<8x32xf32>
    %238 = arith.mulf %231, %235 : vector<8x32xf32>
    %239 = arith.addf %237, %238 : vector<8x32xf32>
    %240 = math.tanh %239 : vector<8x32xf32>
    %241 = arith.mulf %233, %240 : vector<8x32xf32>
    %c0_126 = arith.constant 0 : index
    %c0_127 = arith.constant 0 : index
    %242 = vector.load %arg17[%c0_126, %c0_127] : memref<8x32xf32, #tpu.memory_space<vmem>>, vector<8x32xf32>
    tpu.vector_store %arg17[%c0_126, %c0_127], %239 {strides = array<i32>} : memref<8x32xf32, #tpu.memory_space<vmem>>, vector<8x32xf32>,
    %c0_128 = arith.constant 0 : index
    %c0_129 = arith.constant 0 : index
    %243 = vector.load %arg19[%c0_128, %c0_129] : memref<8x32xf32, #tpu.memory_space<vmem>>, vector<8x32xf32>
    %244 = arith.maximumf %243, %241 : vector<8x32xf32>
    %c0_130 = arith.constant 0 : index
    %c0_131 = arith.constant 0 : index
    %245 = vector.load %arg19[%c0_130, %c0_131] : memref<8x32xf32, #tpu.memory_space<vmem>>, vector<8x32xf32>
    tpu.vector_store %arg19[%c0_130, %c0_131], %244 {strides = array<i32>} : memref<8x32xf32, #tpu.memory_space<vmem>>, vector<8x32xf32>,
    %246 = vector.extract_strided_slice %224 {offsets = [0, 0], sizes = [8, 96], strides = [1, 1]} : vector<8x128xf32> to vector<8x96xf32>
    %247 = arith.negf %246 : vector<8x96xf32>
    %248 = math.exp %247 : vector<8x96xf32>
    %cst_132 = arith.constant 1.000000e+00 : f32
    %249 = vector.broadcast %cst_132 : f32 to vector<8x96xf32>
    %250 = arith.addf %249, %248 : vector<8x96xf32>
    %251 = arith.divf %249, %250 : vector<8x96xf32>
    %252 = arith.negf %251 : vector<8x96xf32>
    %253 = math.exp %252 : vector<8x96xf32>
    %cst_133 = arith.constant 1.000000e+00 : f32
    %254 = vector.broadcast %cst_133 : f32 to vector<8x96xf32>
    %255 = arith.addf %254, %253 : vector<8x96xf32>
    %256 = arith.divf %254, %255 : vector<8x96xf32>
    %257 = vector.extract_strided_slice %256 {offsets = [0, 0], sizes = [8, 32], strides = [1, 1]} : vector<8x96xf32> to vector<8x32xf32>
    %258 = vector.extract_strided_slice %256 {offsets = [0, 32], sizes = [8, 32], strides = [1, 1]} : vector<8x96xf32> to vector<8x32xf32>
    %259 = vector.extract_strided_slice %256 {offsets = [0, 64], sizes = [8, 32], strides = [1, 1]} : vector<8x96xf32> to vector<8x32xf32>
    %260 = vector.extract_strided_slice %224 {offsets = [0, 96], sizes = [8, 32], strides = [1, 1]} : vector<8x128xf32> to vector<8x32xf32>
    %261 = math.tanh %260 : vector<8x32xf32>
    %c0_134 = arith.constant 0 : index
    %c0_135 = arith.constant 0 : index
    %262 = vector.load %arg18[%c0_134, %c0_135] : memref<8x32xf32, #tpu.memory_space<vmem>>, vector<8x32xf32>
    %263 = arith.mulf %258, %262 : vector<8x32xf32>
    %264 = arith.mulf %257, %261 : vector<8x32xf32>
    %265 = arith.addf %263, %264 : vector<8x32xf32>
    %266 = math.tanh %265 : vector<8x32xf32>
    %267 = arith.mulf %259, %266 : vector<8x32xf32>
    %c0_136 = arith.constant 0 : index
    %c0_137 = arith.constant 0 : index
    %268 = vector.load %arg18[%c0_136, %c0_137] : memref<8x32xf32, #tpu.memory_space<vmem>>, vector<8x32xf32>
    tpu.vector_store %arg18[%c0_136, %c0_137], %265 {strides = array<i32>} : memref<8x32xf32, #tpu.memory_space<vmem>>, vector<8x32xf32>,
    %c0_138 = arith.constant 0 : index
    %c0_139 = arith.constant 0 : index
    %269 = vector.load %arg20[%c0_138, %c0_139] : memref<8x32xf32, #tpu.memory_space<vmem>>, vector<8x32xf32>
    %270 = arith.maximumf %269, %267 : vector<8x32xf32>
    %c0_140 = arith.constant 0 : index
    %c0_141 = arith.constant 0 : index
    %271 = vector.load %arg20[%c0_140, %c0_141] : memref<8x32xf32, #tpu.memory_space<vmem>>, vector<8x32xf32>
    tpu.vector_store %arg20[%c0_140, %c0_141], %270 {strides = array<i32>} : memref<8x32xf32, #tpu.memory_space<vmem>>, vector<8x32xf32>,
    %272 = tpu.concatenate %241, %267 in 1 : vector<8x32xf32>, vector<8x32xf32> -> vector<8x64xf32>
    %273 = arith.truncf %272 : vector<8x64xf32> to vector<8x64xbf16>
    %c0_142 = arith.constant 0 : index
    %c0_143 = arith.constant 0 : index
    %274 = vector.load %arg16[%c0_142, %c0_143] : memref<8x64xbf16, #tpu.memory_space<vmem>>, vector<8x64xbf16>
    tpu.vector_store %arg16[%c0_142, %c0_143], %273 {strides = array<i32>} : memref<8x64xbf16, #tpu.memory_space<vmem>>, vector<8x64xbf16>,
    %c4_i32 = arith.constant 4 : i32
    %c0_144 = arith.constant 0 : index
    %c0_145 = arith.constant 0 : index
    %275 = vector.load %arg16[%c0_144, %c0_145] : memref<8x64xbf16, #tpu.memory_space<vmem>>, vector<8x64xbf16>
    %c0_146 = arith.constant 0 : index
    %c0_147 = arith.constant 0 : index
    %276 = vector.load %arg8[%c0_146, %c0_147] : memref<64x256xbf16, #tpu.memory_space<vmem>>, vector<64x256xbf16>
    %cst_148 = arith.constant dense<0.000000e+00> : vector<8x256xf32>
    %277 = tpu.matmul %275, %276, %cst_148 {dimension_numbers = #tpu.dot_dimension_numbers<[1], [0], [0], [1], [0, 0, 1, 1], [], []>} : vector<8x64xbf16>, vector<64x256xbf16>, vector<8x256xf32> -> vector<8x256xf32>
    %c8_i32_149 = arith.constant 8 : i32
    %278 = arith.muli %c4_i32, %c8_i32_149 : i32
    %c7_i32_150 = arith.constant 7 : i32
    %279 = arith.subi %c7_i32_150, %c4_i32 : i32
    %c8_i32_151 = arith.constant 8 : i32
    %280 = arith.muli %279, %c8_i32_151 : i32
    %281 = arith.index_cast %278 : i32 to index
    %c0_152 = arith.constant 0 : index
    %282 = vector.load %arg14[%281, %c0_152] : memref<64x128xf32, #tpu.memory_space<vmem>>, vector<8x128xf32>
    %283 = vector.extract_strided_slice %277 {offsets = [0, 0], sizes = [8, 128], strides = [1, 1]} : vector<8x256xf32> to vector<8x128xf32>
    %284 = arith.addf %282, %283 : vector<8x128xf32>
    %285 = arith.index_cast %280 : i32 to index
    %c0_153 = arith.constant 0 : index
    %286 = vector.load %arg15[%285, %c0_153] : memref<64x128xf32, #tpu.memory_space<vmem>>, vector<8x128xf32>
    %287 = vector.extract_strided_slice %277 {offsets = [0, 128], sizes = [8, 128], strides = [1, 1]} : vector<8x256xf32> to vector<8x128xf32>
    %288 = arith.addf %286, %287 : vector<8x128xf32>
    %289 = vector.extract_strided_slice %284 {offsets = [0, 0], sizes = [8, 96], strides = [1, 1]} : vector<8x128xf32> to vector<8x96xf32>
    %290 = arith.negf %289 : vector<8x96xf32>
    %291 = math.exp %290 : vector<8x96xf32>
    %cst_154 = arith.constant 1.000000e+00 : f32
    %292 = vector.broadcast %cst_154 : f32 to vector<8x96xf32>
    %293 = arith.addf %292, %291 : vector<8x96xf32>
    %294 = arith.divf %292, %293 : vector<8x96xf32>
    %295 = vector.extract_strided_slice %294 {offsets = [0, 0], sizes = [8, 32], strides = [1, 1]} : vector<8x96xf32> to vector<8x32xf32>
    %296 = vector.extract_strided_slice %294 {offsets = [0, 32], sizes = [8, 32], strides = [1, 1]} : vector<8x96xf32> to vector<8x32xf32>
    %297 = vector.extract_strided_slice %294 {offsets = [0, 64], sizes = [8, 32], strides = [1, 1]} : vector<8x96xf32> to vector<8x32xf32>
    %298 = vector.extract_strided_slice %284 {offsets = [0, 96], sizes = [8, 32], strides = [1, 1]} : vector<8x128xf32> to vector<8x32xf32>
    %299 = math.tanh %298 : vector<8x32xf32>
    %c0_155 = arith.constant 0 : index
    %c0_156 = arith.constant 0 : index
    %300 = vector.load %arg17[%c0_155, %c0_156] : memref<8x32xf32, #tpu.memory_space<vmem>>, vector<8x32xf32>
    %301 = arith.mulf %296, %300 : vector<8x32xf32>
    %302 = arith.mulf %295, %299 : vector<8x32xf32>
    %303 = arith.addf %301, %302 : vector<8x32xf32>
    %304 = math.tanh %303 : vector<8x32xf32>
    %305 = arith.mulf %297, %304 : vector<8x32xf32>
    %c0_157 = arith.constant 0 : index
    %c0_158 = arith.constant 0 : index
    %306 = vector.load %arg17[%c0_157, %c0_158] : memref<8x32xf32, #tpu.memory_space<vmem>>, vector<8x32xf32>
    tpu.vector_store %arg17[%c0_157, %c0_158], %303 {strides = array<i32>} : memref<8x32xf32, #tpu.memory_space<vmem>>, vector<8x32xf32>,
    %c0_159 = arith.constant 0 : index
    %c0_160 = arith.constant 0 : index
    %307 = vector.load %arg19[%c0_159, %c0_160] : memref<8x32xf32, #tpu.memory_space<vmem>>, vector<8x32xf32>
    %308 = arith.maximumf %307, %305 : vector<8x32xf32>
    %c0_161 = arith.constant 0 : index
    %c0_162 = arith.constant 0 : index
    %309 = vector.load %arg19[%c0_161, %c0_162] : memref<8x32xf32, #tpu.memory_space<vmem>>, vector<8x32xf32>
    tpu.vector_store %arg19[%c0_161, %c0_162], %308 {strides = array<i32>} : memref<8x32xf32, #tpu.memory_space<vmem>>, vector<8x32xf32>,
    %310 = vector.extract_strided_slice %288 {offsets = [0, 0], sizes = [8, 96], strides = [1, 1]} : vector<8x128xf32> to vector<8x96xf32>
    %311 = arith.negf %310 : vector<8x96xf32>
    %312 = math.exp %311 : vector<8x96xf32>
    %cst_163 = arith.constant 1.000000e+00 : f32
    %313 = vector.broadcast %cst_163 : f32 to vector<8x96xf32>
    %314 = arith.addf %313, %312 : vector<8x96xf32>
    %315 = arith.divf %313, %314 : vector<8x96xf32>
    %316 = arith.negf %315 : vector<8x96xf32>
    %317 = math.exp %316 : vector<8x96xf32>
    %cst_164 = arith.constant 1.000000e+00 : f32
    %318 = vector.broadcast %cst_164 : f32 to vector<8x96xf32>
    %319 = arith.addf %318, %317 : vector<8x96xf32>
    %320 = arith.divf %318, %319 : vector<8x96xf32>
    %321 = vector.extract_strided_slice %320 {offsets = [0, 0], sizes = [8, 32], strides = [1, 1]} : vector<8x96xf32> to vector<8x32xf32>
    %322 = vector.extract_strided_slice %320 {offsets = [0, 32], sizes = [8, 32], strides = [1, 1]} : vector<8x96xf32> to vector<8x32xf32>
    %323 = vector.extract_strided_slice %320 {offsets = [0, 64], sizes = [8, 32], strides = [1, 1]} : vector<8x96xf32> to vector<8x32xf32>
    %324 = vector.extract_strided_slice %288 {offsets = [0, 96], sizes = [8, 32], strides = [1, 1]} : vector<8x128xf32> to vector<8x32xf32>
    %325 = math.tanh %324 : vector<8x32xf32>
    %c0_165 = arith.constant 0 : index
    %c0_166 = arith.constant 0 : index
    %326 = vector.load %arg18[%c0_165, %c0_166] : memref<8x32xf32, #tpu.memory_space<vmem>>, vector<8x32xf32>
    %327 = arith.mulf %322, %326 : vector<8x32xf32>
    %328 = arith.mulf %321, %325 : vector<8x32xf32>
    %329 = arith.addf %327, %328 : vector<8x32xf32>
    %330 = math.tanh %329 : vector<8x32xf32>
    %331 = arith.mulf %323, %330 : vector<8x32xf32>
    %c0_167 = arith.constant 0 : index
    %c0_168 = arith.constant 0 : index
    %332 = vector.load %arg18[%c0_167, %c0_168] : memref<8x32xf32, #tpu.memory_space<vmem>>, vector<8x32xf32>
    tpu.vector_store %arg18[%c0_167, %c0_168], %329 {strides = array<i32>} : memref<8x32xf32, #tpu.memory_space<vmem>>, vector<8x32xf32>,
    %c0_169 = arith.constant 0 : index
    %c0_170 = arith.constant 0 : index
    %333 = vector.load %arg20[%c0_169, %c0_170] : memref<8x32xf32, #tpu.memory_space<vmem>>, vector<8x32xf32>
    %334 = arith.maximumf %333, %331 : vector<8x32xf32>
    %c0_171 = arith.constant 0 : index
    %c0_172 = arith.constant 0 : index
    %335 = vector.load %arg20[%c0_171, %c0_172] : memref<8x32xf32, #tpu.memory_space<vmem>>, vector<8x32xf32>
    tpu.vector_store %arg20[%c0_171, %c0_172], %334 {strides = array<i32>} : memref<8x32xf32, #tpu.memory_space<vmem>>, vector<8x32xf32>,
    %336 = tpu.concatenate %305, %331 in 1 : vector<8x32xf32>, vector<8x32xf32> -> vector<8x64xf32>
    %337 = arith.truncf %336 : vector<8x64xf32> to vector<8x64xbf16>
    %c0_173 = arith.constant 0 : index
    %c0_174 = arith.constant 0 : index
    %338 = vector.load %arg16[%c0_173, %c0_174] : memref<8x64xbf16, #tpu.memory_space<vmem>>, vector<8x64xbf16>
    tpu.vector_store %arg16[%c0_173, %c0_174], %337 {strides = array<i32>} : memref<8x64xbf16, #tpu.memory_space<vmem>>, vector<8x64xbf16>,
    %c5_i32 = arith.constant 5 : i32
    %c0_175 = arith.constant 0 : index
    %c0_176 = arith.constant 0 : index
    %339 = vector.load %arg16[%c0_175, %c0_176] : memref<8x64xbf16, #tpu.memory_space<vmem>>, vector<8x64xbf16>
    %c0_177 = arith.constant 0 : index
    %c0_178 = arith.constant 0 : index
    %340 = vector.load %arg8[%c0_177, %c0_178] : memref<64x256xbf16, #tpu.memory_space<vmem>>, vector<64x256xbf16>
    %cst_179 = arith.constant dense<0.000000e+00> : vector<8x256xf32>
    %341 = tpu.matmul %339, %340, %cst_179 {dimension_numbers = #tpu.dot_dimension_numbers<[1], [0], [0], [1], [0, 0, 1, 1], [], []>} : vector<8x64xbf16>, vector<64x256xbf16>, vector<8x256xf32> -> vector<8x256xf32>
    %c8_i32_180 = arith.constant 8 : i32
    %342 = arith.muli %c5_i32, %c8_i32_180 : i32
    %c7_i32_181 = arith.constant 7 : i32
    %343 = arith.subi %c7_i32_181, %c5_i32 : i32
    %c8_i32_182 = arith.constant 8 : i32
    %344 = arith.muli %343, %c8_i32_182 : i32
    %345 = arith.index_cast %342 : i32 to index
    %c0_183 = arith.constant 0 : index
    %346 = vector.load %arg14[%345, %c0_183] : memref<64x128xf32, #tpu.memory_space<vmem>>, vector<8x128xf32>
    %347 = vector.extract_strided_slice %341 {offsets = [0, 0], sizes = [8, 128], strides = [1, 1]} : vector<8x256xf32> to vector<8x128xf32>
    %348 = arith.addf %346, %347 : vector<8x128xf32>
    %349 = arith.index_cast %344 : i32 to index
    %c0_184 = arith.constant 0 : index
    %350 = vector.load %arg15[%349, %c0_184] : memref<64x128xf32, #tpu.memory_space<vmem>>, vector<8x128xf32>
    %351 = vector.extract_strided_slice %341 {offsets = [0, 128], sizes = [8, 128], strides = [1, 1]} : vector<8x256xf32> to vector<8x128xf32>
    %352 = arith.addf %350, %351 : vector<8x128xf32>
    %353 = vector.extract_strided_slice %348 {offsets = [0, 0], sizes = [8, 96], strides = [1, 1]} : vector<8x128xf32> to vector<8x96xf32>
    %354 = arith.negf %353 : vector<8x96xf32>
    %355 = math.exp %354 : vector<8x96xf32>
    %cst_185 = arith.constant 1.000000e+00 : f32
    %356 = vector.broadcast %cst_185 : f32 to vector<8x96xf32>
    %357 = arith.addf %356, %355 : vector<8x96xf32>
    %358 = arith.divf %356, %357 : vector<8x96xf32>
    %359 = vector.extract_strided_slice %358 {offsets = [0, 0], sizes = [8, 32], strides = [1, 1]} : vector<8x96xf32> to vector<8x32xf32>
    %360 = vector.extract_strided_slice %358 {offsets = [0, 32], sizes = [8, 32], strides = [1, 1]} : vector<8x96xf32> to vector<8x32xf32>
    %361 = vector.extract_strided_slice %358 {offsets = [0, 64], sizes = [8, 32], strides = [1, 1]} : vector<8x96xf32> to vector<8x32xf32>
    %362 = vector.extract_strided_slice %348 {offsets = [0, 96], sizes = [8, 32], strides = [1, 1]} : vector<8x128xf32> to vector<8x32xf32>
    %363 = math.tanh %362 : vector<8x32xf32>
    %c0_186 = arith.constant 0 : index
    %c0_187 = arith.constant 0 : index
    %364 = vector.load %arg17[%c0_186, %c0_187] : memref<8x32xf32, #tpu.memory_space<vmem>>, vector<8x32xf32>
    %365 = arith.mulf %360, %364 : vector<8x32xf32>
    %366 = arith.mulf %359, %363 : vector<8x32xf32>
    %367 = arith.addf %365, %366 : vector<8x32xf32>
    %368 = math.tanh %367 : vector<8x32xf32>
    %369 = arith.mulf %361, %368 : vector<8x32xf32>
    %c0_188 = arith.constant 0 : index
    %c0_189 = arith.constant 0 : index
    %370 = vector.load %arg17[%c0_188, %c0_189] : memref<8x32xf32, #tpu.memory_space<vmem>>, vector<8x32xf32>
    tpu.vector_store %arg17[%c0_188, %c0_189], %367 {strides = array<i32>} : memref<8x32xf32, #tpu.memory_space<vmem>>, vector<8x32xf32>,
    %c0_190 = arith.constant 0 : index
    %c0_191 = arith.constant 0 : index
    %371 = vector.load %arg19[%c0_190, %c0_191] : memref<8x32xf32, #tpu.memory_space<vmem>>, vector<8x32xf32>
    %372 = arith.maximumf %371, %369 : vector<8x32xf32>
    %c0_192 = arith.constant 0 : index
    %c0_193 = arith.constant 0 : index
    %373 = vector.load %arg19[%c0_192, %c0_193] : memref<8x32xf32, #tpu.memory_space<vmem>>, vector<8x32xf32>
    tpu.vector_store %arg19[%c0_192, %c0_193], %372 {strides = array<i32>} : memref<8x32xf32, #tpu.memory_space<vmem>>, vector<8x32xf32>,
    %374 = vector.extract_strided_slice %352 {offsets = [0, 0], sizes = [8, 96], strides = [1, 1]} : vector<8x128xf32> to vector<8x96xf32>
    %375 = arith.negf %374 : vector<8x96xf32>
    %376 = math.exp %375 : vector<8x96xf32>
    %cst_194 = arith.constant 1.000000e+00 : f32
    %377 = vector.broadcast %cst_194 : f32 to vector<8x96xf32>
    %378 = arith.addf %377, %376 : vector<8x96xf32>
    %379 = arith.divf %377, %378 : vector<8x96xf32>
    %380 = arith.negf %379 : vector<8x96xf32>
    %381 = math.exp %380 : vector<8x96xf32>
    %cst_195 = arith.constant 1.000000e+00 : f32
    %382 = vector.broadcast %cst_195 : f32 to vector<8x96xf32>
    %383 = arith.addf %382, %381 : vector<8x96xf32>
    %384 = arith.divf %382, %383 : vector<8x96xf32>
    %385 = vector.extract_strided_slice %384 {offsets = [0, 0], sizes = [8, 32], strides = [1, 1]} : vector<8x96xf32> to vector<8x32xf32>
    %386 = vector.extract_strided_slice %384 {offsets = [0, 32], sizes = [8, 32], strides = [1, 1]} : vector<8x96xf32> to vector<8x32xf32>
    %387 = vector.extract_strided_slice %384 {offsets = [0, 64], sizes = [8, 32], strides = [1, 1]} : vector<8x96xf32> to vector<8x32xf32>
    %388 = vector.extract_strided_slice %352 {offsets = [0, 96], sizes = [8, 32], strides = [1, 1]} : vector<8x128xf32> to vector<8x32xf32>
    %389 = math.tanh %388 : vector<8x32xf32>
    %c0_196 = arith.constant 0 : index
    %c0_197 = arith.constant 0 : index
    %390 = vector.load %arg18[%c0_196, %c0_197] : memref<8x32xf32, #tpu.memory_space<vmem>>, vector<8x32xf32>
    %391 = arith.mulf %386, %390 : vector<8x32xf32>
    %392 = arith.mulf %385, %389 : vector<8x32xf32>
    %393 = arith.addf %391, %392 : vector<8x32xf32>
    %394 = math.tanh %393 : vector<8x32xf32>
    %395 = arith.mulf %387, %394 : vector<8x32xf32>
    %c0_198 = arith.constant 0 : index
    %c0_199 = arith.constant 0 : index
    %396 = vector.load %arg18[%c0_198, %c0_199] : memref<8x32xf32, #tpu.memory_space<vmem>>, vector<8x32xf32>
    tpu.vector_store %arg18[%c0_198, %c0_199], %393 {strides = array<i32>} : memref<8x32xf32, #tpu.memory_space<vmem>>, vector<8x32xf32>,
    %c0_200 = arith.constant 0 : index
    %c0_201 = arith.constant 0 : index
    %397 = vector.load %arg20[%c0_200, %c0_201] : memref<8x32xf32, #tpu.memory_space<vmem>>, vector<8x32xf32>
    %398 = arith.maximumf %397, %395 : vector<8x32xf32>
    %c0_202 = arith.constant 0 : index
    %c0_203 = arith.constant 0 : index
    %399 = vector.load %arg20[%c0_202, %c0_203] : memref<8x32xf32, #tpu.memory_space<vmem>>, vector<8x32xf32>
    tpu.vector_store %arg20[%c0_202, %c0_203], %398 {strides = array<i32>} : memref<8x32xf32, #tpu.memory_space<vmem>>, vector<8x32xf32>,
    %400 = tpu.concatenate %369, %395 in 1 : vector<8x32xf32>, vector<8x32xf32> -> vector<8x64xf32>
    %401 = arith.truncf %400 : vector<8x64xf32> to vector<8x64xbf16>
    %c0_204 = arith.constant 0 : index
    %c0_205 = arith.constant 0 : index
    %402 = vector.load %arg16[%c0_204, %c0_205] : memref<8x64xbf16, #tpu.memory_space<vmem>>, vector<8x64xbf16>
    tpu.vector_store %arg16[%c0_204, %c0_205], %401 {strides = array<i32>} : memref<8x64xbf16, #tpu.memory_space<vmem>>, vector<8x64xbf16>,
    %c6_i32 = arith.constant 6 : i32
    %c0_206 = arith.constant 0 : index
    %c0_207 = arith.constant 0 : index
    %403 = vector.load %arg16[%c0_206, %c0_207] : memref<8x64xbf16, #tpu.memory_space<vmem>>, vector<8x64xbf16>
    %c0_208 = arith.constant 0 : index
    %c0_209 = arith.constant 0 : index
    %404 = vector.load %arg8[%c0_208, %c0_209] : memref<64x256xbf16, #tpu.memory_space<vmem>>, vector<64x256xbf16>
    %cst_210 = arith.constant dense<0.000000e+00> : vector<8x256xf32>
    %405 = tpu.matmul %403, %404, %cst_210 {dimension_numbers = #tpu.dot_dimension_numbers<[1], [0], [0], [1], [0, 0, 1, 1], [], []>} : vector<8x64xbf16>, vector<64x256xbf16>, vector<8x256xf32> -> vector<8x256xf32>
    %c8_i32_211 = arith.constant 8 : i32
    %406 = arith.muli %c6_i32, %c8_i32_211 : i32
    %c7_i32_212 = arith.constant 7 : i32
    %407 = arith.subi %c7_i32_212, %c6_i32 : i32
    %c8_i32_213 = arith.constant 8 : i32
    %408 = arith.muli %407, %c8_i32_213 : i32
    %409 = arith.index_cast %406 : i32 to index
    %c0_214 = arith.constant 0 : index
    %410 = vector.load %arg14[%409, %c0_214] : memref<64x128xf32, #tpu.memory_space<vmem>>, vector<8x128xf32>
    %411 = vector.extract_strided_slice %405 {offsets = [0, 0], sizes = [8, 128], strides = [1, 1]} : vector<8x256xf32> to vector<8x128xf32>
    %412 = arith.addf %410, %411 : vector<8x128xf32>
    %413 = arith.index_cast %408 : i32 to index
    %c0_215 = arith.constant 0 : index
    %414 = vector.load %arg15[%413, %c0_215] : memref<64x128xf32, #tpu.memory_space<vmem>>, vector<8x128xf32>
    %415 = vector.extract_strided_slice %405 {offsets = [0, 128], sizes = [8, 128], strides = [1, 1]} : vector<8x256xf32> to vector<8x128xf32>
    %416 = arith.addf %414, %415 : vector<8x128xf32>
    %417 = vector.extract_strided_slice %412 {offsets = [0, 0], sizes = [8, 96], strides = [1, 1]} : vector<8x128xf32> to vector<8x96xf32>
    %418 = arith.negf %417 : vector<8x96xf32>
    %419 = math.exp %418 : vector<8x96xf32>
    %cst_216 = arith.constant 1.000000e+00 : f32
    %420 = vector.broadcast %cst_216 : f32 to vector<8x96xf32>
    %421 = arith.addf %420, %419 : vector<8x96xf32>
    %422 = arith.divf %420, %421 : vector<8x96xf32>
    %423 = vector.extract_strided_slice %422 {offsets = [0, 0], sizes = [8, 32], strides = [1, 1]} : vector<8x96xf32> to vector<8x32xf32>
    %424 = vector.extract_strided_slice %422 {offsets = [0, 32], sizes = [8, 32], strides = [1, 1]} : vector<8x96xf32> to vector<8x32xf32>
    %425 = vector.extract_strided_slice %422 {offsets = [0, 64], sizes = [8, 32], strides = [1, 1]} : vector<8x96xf32> to vector<8x32xf32>
    %426 = vector.extract_strided_slice %412 {offsets = [0, 96], sizes = [8, 32], strides = [1, 1]} : vector<8x128xf32> to vector<8x32xf32>
    %427 = math.tanh %426 : vector<8x32xf32>
    %c0_217 = arith.constant 0 : index
    %c0_218 = arith.constant 0 : index
    %428 = vector.load %arg17[%c0_217, %c0_218] : memref<8x32xf32, #tpu.memory_space<vmem>>, vector<8x32xf32>
    %429 = arith.mulf %424, %428 : vector<8x32xf32>
    %430 = arith.mulf %423, %427 : vector<8x32xf32>
    %431 = arith.addf %429, %430 : vector<8x32xf32>
    %432 = math.tanh %431 : vector<8x32xf32>
    %433 = arith.mulf %425, %432 : vector<8x32xf32>
    %c0_219 = arith.constant 0 : index
    %c0_220 = arith.constant 0 : index
    %434 = vector.load %arg17[%c0_219, %c0_220] : memref<8x32xf32, #tpu.memory_space<vmem>>, vector<8x32xf32>
    tpu.vector_store %arg17[%c0_219, %c0_220], %431 {strides = array<i32>} : memref<8x32xf32, #tpu.memory_space<vmem>>, vector<8x32xf32>,
    %c0_221 = arith.constant 0 : index
    %c0_222 = arith.constant 0 : index
    %435 = vector.load %arg19[%c0_221, %c0_222] : memref<8x32xf32, #tpu.memory_space<vmem>>, vector<8x32xf32>
    %436 = arith.maximumf %435, %433 : vector<8x32xf32>
    %c0_223 = arith.constant 0 : index
    %c0_224 = arith.constant 0 : index
    %437 = vector.load %arg19[%c0_223, %c0_224] : memref<8x32xf32, #tpu.memory_space<vmem>>, vector<8x32xf32>
    tpu.vector_store %arg19[%c0_223, %c0_224], %436 {strides = array<i32>} : memref<8x32xf32, #tpu.memory_space<vmem>>, vector<8x32xf32>,
    %438 = vector.extract_strided_slice %416 {offsets = [0, 0], sizes = [8, 96], strides = [1, 1]} : vector<8x128xf32> to vector<8x96xf32>
    %439 = arith.negf %438 : vector<8x96xf32>
    %440 = math.exp %439 : vector<8x96xf32>
    %cst_225 = arith.constant 1.000000e+00 : f32
    %441 = vector.broadcast %cst_225 : f32 to vector<8x96xf32>
    %442 = arith.addf %441, %440 : vector<8x96xf32>
    %443 = arith.divf %441, %442 : vector<8x96xf32>
    %444 = arith.negf %443 : vector<8x96xf32>
    %445 = math.exp %444 : vector<8x96xf32>
    %cst_226 = arith.constant 1.000000e+00 : f32
    %446 = vector.broadcast %cst_226 : f32 to vector<8x96xf32>
    %447 = arith.addf %446, %445 : vector<8x96xf32>
    %448 = arith.divf %446, %447 : vector<8x96xf32>
    %449 = vector.extract_strided_slice %448 {offsets = [0, 0], sizes = [8, 32], strides = [1, 1]} : vector<8x96xf32> to vector<8x32xf32>
    %450 = vector.extract_strided_slice %448 {offsets = [0, 32], sizes = [8, 32], strides = [1, 1]} : vector<8x96xf32> to vector<8x32xf32>
    %451 = vector.extract_strided_slice %448 {offsets = [0, 64], sizes = [8, 32], strides = [1, 1]} : vector<8x96xf32> to vector<8x32xf32>
    %452 = vector.extract_strided_slice %416 {offsets = [0, 96], sizes = [8, 32], strides = [1, 1]} : vector<8x128xf32> to vector<8x32xf32>
    %453 = math.tanh %452 : vector<8x32xf32>
    %c0_227 = arith.constant 0 : index
    %c0_228 = arith.constant 0 : index
    %454 = vector.load %arg18[%c0_227, %c0_228] : memref<8x32xf32, #tpu.memory_space<vmem>>, vector<8x32xf32>
    %455 = arith.mulf %450, %454 : vector<8x32xf32>
    %456 = arith.mulf %449, %453 : vector<8x32xf32>
    %457 = arith.addf %455, %456 : vector<8x32xf32>
    %458 = math.tanh %457 : vector<8x32xf32>
    %459 = arith.mulf %451, %458 : vector<8x32xf32>
    %c0_229 = arith.constant 0 : index
    %c0_230 = arith.constant 0 : index
    %460 = vector.load %arg18[%c0_229, %c0_230] : memref<8x32xf32, #tpu.memory_space<vmem>>, vector<8x32xf32>
    tpu.vector_store %arg18[%c0_229, %c0_230], %457 {strides = array<i32>} : memref<8x32xf32, #tpu.memory_space<vmem>>, vector<8x32xf32>,
    %c0_231 = arith.constant 0 : index
    %c0_232 = arith.constant 0 : index
    %461 = vector.load %arg20[%c0_231, %c0_232] : memref<8x32xf32, #tpu.memory_space<vmem>>, vector<8x32xf32>
    %462 = arith.maximumf %461, %459 : vector<8x32xf32>
    %c0_233 = arith.constant 0 : index
    %c0_234 = arith.constant 0 : index
    %463 = vector.load %arg20[%c0_233, %c0_234] : memref<8x32xf32, #tpu.memory_space<vmem>>, vector<8x32xf32>
    tpu.vector_store %arg20[%c0_233, %c0_234], %462 {strides = array<i32>} : memref<8x32xf32, #tpu.memory_space<vmem>>, vector<8x32xf32>,
    %464 = tpu.concatenate %433, %459 in 1 : vector<8x32xf32>, vector<8x32xf32> -> vector<8x64xf32>
    %465 = arith.truncf %464 : vector<8x64xf32> to vector<8x64xbf16>
    %c0_235 = arith.constant 0 : index
    %c0_236 = arith.constant 0 : index
    %466 = vector.load %arg16[%c0_235, %c0_236] : memref<8x64xbf16, #tpu.memory_space<vmem>>, vector<8x64xbf16>
    tpu.vector_store %arg16[%c0_235, %c0_236], %465 {strides = array<i32>} : memref<8x64xbf16, #tpu.memory_space<vmem>>, vector<8x64xbf16>,
    %c7_i32_237 = arith.constant 7 : i32
    %c0_238 = arith.constant 0 : index
    %c0_239 = arith.constant 0 : index
    %467 = vector.load %arg16[%c0_238, %c0_239] : memref<8x64xbf16, #tpu.memory_space<vmem>>, vector<8x64xbf16>
    %c0_240 = arith.constant 0 : index
    %c0_241 = arith.constant 0 : index
    %468 = vector.load %arg8[%c0_240, %c0_241] : memref<64x256xbf16, #tpu.memory_space<vmem>>, vector<64x256xbf16>
    %cst_242 = arith.constant dense<0.000000e+00> : vector<8x256xf32>
    %469 = tpu.matmul %467, %468, %cst_242 {dimension_numbers = #tpu.dot_dimension_numbers<[1], [0], [0], [1], [0, 0, 1, 1], [], []>} : vector<8x64xbf16>, vector<64x256xbf16>, vector<8x256xf32> -> vector<8x256xf32>
    %c8_i32_243 = arith.constant 8 : i32
    %470 = arith.muli %c7_i32_237, %c8_i32_243 : i32
    %c7_i32_244 = arith.constant 7 : i32
    %471 = arith.subi %c7_i32_244, %c7_i32_237 : i32
    %c8_i32_245 = arith.constant 8 : i32
    %472 = arith.muli %471, %c8_i32_245 : i32
    %473 = arith.index_cast %470 : i32 to index
    %c0_246 = arith.constant 0 : index
    %474 = vector.load %arg14[%473, %c0_246] : memref<64x128xf32, #tpu.memory_space<vmem>>, vector<8x128xf32>
    %475 = vector.extract_strided_slice %469 {offsets = [0, 0], sizes = [8, 128], strides = [1, 1]} : vector<8x256xf32> to vector<8x128xf32>
    %476 = arith.addf %474, %475 : vector<8x128xf32>
    %477 = arith.index_cast %472 : i32 to index
    %c0_247 = arith.constant 0 : index
    %478 = vector.load %arg15[%477, %c0_247] : memref<64x128xf32, #tpu.memory_space<vmem>>, vector<8x128xf32>
    %479 = vector.extract_strided_slice %469 {offsets = [0, 128], sizes = [8, 128], strides = [1, 1]} : vector<8x256xf32> to vector<8x128xf32>
    %480 = arith.addf %478, %479 : vector<8x128xf32>
    %481 = vector.extract_strided_slice %476 {offsets = [0, 0], sizes = [8, 96], strides = [1, 1]} : vector<8x128xf32> to vector<8x96xf32>
    %482 = arith.negf %481 : vector<8x96xf32>
    %483 = math.exp %482 : vector<8x96xf32>
    %cst_248 = arith.constant 1.000000e+00 : f32
    %484 = vector.broadcast %cst_248 : f32 to vector<8x96xf32>
    %485 = arith.addf %484, %483 : vector<8x96xf32>
    %486 = arith.divf %484, %485 : vector<8x96xf32>
    %487 = vector.extract_strided_slice %486 {offsets = [0, 0], sizes = [8, 32], strides = [1, 1]} : vector<8x96xf32> to vector<8x32xf32>
    %488 = vector.extract_strided_slice %486 {offsets = [0, 32], sizes = [8, 32], strides = [1, 1]} : vector<8x96xf32> to vector<8x32xf32>
    %489 = vector.extract_strided_slice %486 {offsets = [0, 64], sizes = [8, 32], strides = [1, 1]} : vector<8x96xf32> to vector<8x32xf32>
    %490 = vector.extract_strided_slice %476 {offsets = [0, 96], sizes = [8, 32], strides = [1, 1]} : vector<8x128xf32> to vector<8x32xf32>
    %491 = math.tanh %490 : vector<8x32xf32>
    %c0_249 = arith.constant 0 : index
    %c0_250 = arith.constant 0 : index
    %492 = vector.load %arg17[%c0_249, %c0_250] : memref<8x32xf32, #tpu.memory_space<vmem>>, vector<8x32xf32>
    %493 = arith.mulf %488, %492 : vector<8x32xf32>
    %494 = arith.mulf %487, %491 : vector<8x32xf32>
    %495 = arith.addf %493, %494 : vector<8x32xf32>
    %496 = math.tanh %495 : vector<8x32xf32>
    %497 = arith.mulf %489, %496 : vector<8x32xf32>
    %c0_251 = arith.constant 0 : index
    %c0_252 = arith.constant 0 : index
    %498 = vector.load %arg17[%c0_251, %c0_252] : memref<8x32xf32, #tpu.memory_space<vmem>>, vector<8x32xf32>
    tpu.vector_store %arg17[%c0_251, %c0_252], %495 {strides = array<i32>} : memref<8x32xf32, #tpu.memory_space<vmem>>, vector<8x32xf32>,
    %c0_253 = arith.constant 0 : index
    %c0_254 = arith.constant 0 : index
    %499 = vector.load %arg19[%c0_253, %c0_254] : memref<8x32xf32, #tpu.memory_space<vmem>>, vector<8x32xf32>
    %500 = arith.maximumf %499, %497 : vector<8x32xf32>
    %c0_255 = arith.constant 0 : index
    %c0_256 = arith.constant 0 : index
    %501 = vector.load %arg19[%c0_255, %c0_256] : memref<8x32xf32, #tpu.memory_space<vmem>>, vector<8x32xf32>
    tpu.vector_store %arg19[%c0_255, %c0_256], %500 {strides = array<i32>} : memref<8x32xf32, #tpu.memory_space<vmem>>, vector<8x32xf32>,
    %502 = vector.extract_strided_slice %480 {offsets = [0, 0], sizes = [8, 96], strides = [1, 1]} : vector<8x128xf32> to vector<8x96xf32>
    %503 = arith.negf %502 : vector<8x96xf32>
    %504 = math.exp %503 : vector<8x96xf32>
    %cst_257 = arith.constant 1.000000e+00 : f32
    %505 = vector.broadcast %cst_257 : f32 to vector<8x96xf32>
    %506 = arith.addf %505, %504 : vector<8x96xf32>
    %507 = arith.divf %505, %506 : vector<8x96xf32>
    %508 = arith.negf %507 : vector<8x96xf32>
    %509 = math.exp %508 : vector<8x96xf32>
    %cst_258 = arith.constant 1.000000e+00 : f32
    %510 = vector.broadcast %cst_258 : f32 to vector<8x96xf32>
    %511 = arith.addf %510, %509 : vector<8x96xf32>
    %512 = arith.divf %510, %511 : vector<8x96xf32>
    %513 = vector.extract_strided_slice %512 {offsets = [0, 0], sizes = [8, 32], strides = [1, 1]} : vector<8x96xf32> to vector<8x32xf32>
    %514 = vector.extract_strided_slice %512 {offsets = [0, 32], sizes = [8, 32], strides = [1, 1]} : vector<8x96xf32> to vector<8x32xf32>
    %515 = vector.extract_strided_slice %512 {offsets = [0, 64], sizes = [8, 32], strides = [1, 1]} : vector<8x96xf32> to vector<8x32xf32>
    %516 = vector.extract_strided_slice %480 {offsets = [0, 96], sizes = [8, 32], strides = [1, 1]} : vector<8x128xf32> to vector<8x32xf32>
    %517 = math.tanh %516 : vector<8x32xf32>
    %c0_259 = arith.constant 0 : index
    %c0_260 = arith.constant 0 : index
    %518 = vector.load %arg18[%c0_259, %c0_260] : memref<8x32xf32, #tpu.memory_space<vmem>>, vector<8x32xf32>
    %519 = arith.mulf %514, %518 : vector<8x32xf32>
    %520 = arith.mulf %513, %517 : vector<8x32xf32>
    %521 = arith.addf %519, %520 : vector<8x32xf32>
    %522 = math.tanh %521 : vector<8x32xf32>
    %523 = arith.mulf %515, %522 : vector<8x32xf32>
    %c0_261 = arith.constant 0 : index
    %c0_262 = arith.constant 0 : index
    %524 = vector.load %arg18[%c0_261, %c0_262] : memref<8x32xf32, #tpu.memory_space<vmem>>, vector<8x32xf32>
    tpu.vector_store %arg18[%c0_261, %c0_262], %521 {strides = array<i32>} : memref<8x32xf32, #tpu.memory_space<vmem>>, vector<8x32xf32>,
    %c0_263 = arith.constant 0 : index
    %c0_264 = arith.constant 0 : index
    %525 = vector.load %arg20[%c0_263, %c0_264] : memref<8x32xf32, #tpu.memory_space<vmem>>, vector<8x32xf32>
    %526 = arith.maximumf %525, %523 : vector<8x32xf32>
    %c0_265 = arith.constant 0 : index
    %c0_266 = arith.constant 0 : index
    %527 = vector.load %arg20[%c0_265, %c0_266] : memref<8x32xf32, #tpu.memory_space<vmem>>, vector<8x32xf32>
    tpu.vector_store %arg20[%c0_265, %c0_266], %526 {strides = array<i32>} : memref<8x32xf32, #tpu.memory_space<vmem>>, vector<8x32xf32>,
    %528 = tpu.concatenate %497, %523 in 1 : vector<8x32xf32>, vector<8x32xf32> -> vector<8x64xf32>
    %529 = arith.truncf %528 : vector<8x64xf32> to vector<8x64xbf16>
    %c0_267 = arith.constant 0 : index
    %c0_268 = arith.constant 0 : index
    %530 = vector.load %arg16[%c0_267, %c0_268] : memref<8x64xbf16, #tpu.memory_space<vmem>>, vector<8x64xbf16>
    tpu.vector_store %arg16[%c0_267, %c0_268], %529 {strides = array<i32>} : memref<8x64xbf16, #tpu.memory_space<vmem>>, vector<8x64xbf16>,
    %c8_i32_269 = arith.constant 8 : i32
    %c0_i32_270 = arith.constant 0 : i32
    %531 = arith.cmpi eq, %arg1, %c0_i32_270 : i32
    %532 = arith.extui %531 : i1 to i32
    %c0_i32_271 = arith.constant 0 : i32
    %533 = arith.cmpi ne, %532, %c0_i32_271 : i32
    scf.if %533 {
      %c0_272 = arith.constant 0 : index
      %c0_273 = arith.constant 0 : index
      %534 = vector.load %arg19[%c0_272, %c0_273] : memref<8x32xf32, #tpu.memory_space<vmem>>, vector<8x32xf32>
      %c0_274 = arith.constant 0 : index
      %c0_275 = arith.constant 0 : index
      %535 = vector.load %arg20[%c0_274, %c0_275] : memref<8x32xf32, #tpu.memory_space<vmem>>, vector<8x32xf32>
      %536 = tpu.concatenate %534, %535 in 1 : vector<8x32xf32>, vector<8x32xf32> -> vector<8x64xf32>
      %cst_276 = arith.constant 0.000000e+00 : f32
      %537 = vector.broadcast %cst_276 : f32 to vector<8x64xf32>
      %538 = arith.maximumf %536, %537 : vector<8x64xf32>
      %539 = arith.truncf %538 : vector<8x64xf32> to vector<8x64xbf16>
      %c0_277 = arith.constant 0 : index
      %c0_278 = arith.constant 0 : index
      %540 = vector.load %arg9[%c0_277, %c0_278] : memref<64x16xbf16, #tpu.memory_space<vmem>>, vector<64x16xbf16>
      %cst_279 = arith.constant dense<0.000000e+00> : vector<8x16xf32>
      %541 = tpu.matmul %539, %540, %cst_279 {dimension_numbers = #tpu.dot_dimension_numbers<[1], [0], [0], [1], [0, 0, 1, 1], [], []>} : vector<8x64xbf16>, vector<64x16xbf16>, vector<8x16xf32> -> vector<8x16xf32>
      %c0_280 = arith.constant 0 : index
      %c0_281 = arith.constant 0 : index
      %542 = vector.load %arg10[%c0_280, %c0_281] : memref<1x16xf32, #tpu.memory_space<vmem>>, vector<1x16xf32>
      %543 = vector.broadcast %542 : vector<1x16xf32> to vector<8x16xf32>
      %544 = arith.addf %541, %543 : vector<8x16xf32>
      %545 = arith.truncf %544 : vector<8x16xf32> to vector<8x16xbf16>
      %c0_282 = arith.constant 0 : index
      %c0_283 = arith.constant 0 : index
      %546 = vector.load %arg11[%c0_282, %c0_283] : memref<16x4xbf16, #tpu.memory_space<vmem>>, vector<16x4xbf16>
      %cst_284 = arith.constant dense<0.000000e+00> : vector<8x4xf32>
      %547 = tpu.matmul %545, %546, %cst_284 {dimension_numbers = #tpu.dot_dimension_numbers<[1], [0], [0], [1], [0, 0, 1, 1], [], []>} : vector<8x16xbf16>, vector<16x4xbf16>, vector<8x4xf32> -> vector<8x4xf32>
      %c0_285 = arith.constant 0 : index
      %c0_286 = arith.constant 0 : index
      %548 = vector.load %arg12[%c0_285, %c0_286] : memref<1x4xf32, #tpu.memory_space<vmem>>, vector<1x4xf32>
      %549 = vector.broadcast %548 : vector<1x4xf32> to vector<8x4xf32>
      %550 = arith.addf %547, %549 : vector<8x4xf32>
      %c0_287 = arith.constant 0 : index
      %c0_288 = arith.constant 0 : index
      %551 = vector.load %arg13[%c0_287, %c0_288] : memref<8x4xf32, #tpu.memory_space<vmem>>, vector<8x4xf32>
      tpu.vector_store %arg13[%c0_287, %c0_288], %550 {strides = array<i32>} : memref<8x4xf32, #tpu.memory_space<vmem>>, vector<8x4xf32>,
    } else {
    }
    return
  }
  func.func @transform_0(%arg0: i32, %arg1: i32) -> (i32, i32, i32, i32) {
    %c0_i32 = arith.constant 0 : i32
    %c0_i32_0 = arith.constant 0 : i32
    %c0_i32_1 = arith.constant 0 : i32
    return %arg1, %arg0, %c0_i32, %c0_i32_0 : i32, i32, i32, i32
  }
  func.func @transform_1(%arg0: i32, %arg1: i32) -> (i32, i32, i32, i32) {
    %c0_i32 = arith.constant 0 : i32
    %0 = arith.subi %c0_i32, %arg1 : i32
    %c0_i32_0 = arith.constant 0 : i32
    %c0_i32_1 = arith.constant 0 : i32
    %c0_i32_2 = arith.constant 0 : i32
    return %0, %arg0, %c0_i32_0, %c0_i32_1 : i32, i32, i32, i32
  }
  func.func @transform_2(%arg0: i32, %arg1: i32) -> (i32, i32) {
    %c0_i32 = arith.constant 0 : i32
    %c0_i32_0 = arith.constant 0 : i32
    %c0_i32_1 = arith.constant 0 : i32
    return %c0_i32, %c0_i32_0 : i32, i32
  }
  func.func @transform_3(%arg0: i32, %arg1: i32) -> (i32, i32) {
    %c0_i32 = arith.constant 0 : i32
    %c0_i32_0 = arith.constant 0 : i32
    %c0_i32_1 = arith.constant 0 : i32
    return %c0_i32, %c0_i32_0 : i32, i32
  }
  func.func @transform_4(%arg0: i32, %arg1: i32) -> (i32, i32) {
    %c0_i32 = arith.constant 0 : i32
    %c0_i32_0 = arith.constant 0 : i32
    %c0_i32_1 = arith.constant 0 : i32
    return %c0_i32, %c0_i32_0 : i32, i32
  }
  func.func @transform_5(%arg0: i32, %arg1: i32) -> (i32, i32) {
    %c0_i32 = arith.constant 0 : i32
    %c0_i32_0 = arith.constant 0 : i32
    %c0_i32_1 = arith.constant 0 : i32
    return %c0_i32, %c0_i32_0 : i32, i32
  }
  func.func @transform_6(%arg0: i32, %arg1: i32) -> (i32, i32) {
    %c0_i32 = arith.constant 0 : i32
    %c0_i32_0 = arith.constant 0 : i32
    %c0_i32_1 = arith.constant 0 : i32
    return %c0_i32, %c0_i32_0 : i32, i32
  }
  func.func @transform_7(%arg0: i32, %arg1: i32) -> (i32, i32) {
    %c0_i32 = arith.constant 0 : i32
    %c0_i32_0 = arith.constant 0 : i32
    %c0_i32_1 = arith.constant 0 : i32
    return %c0_i32, %c0_i32_0 : i32, i32
  }
  func.func @transform_8(%arg0: i32, %arg1: i32) -> (i32, i32) {
    %c0_i32 = arith.constant 0 : i32
    %c0_i32_0 = arith.constant 0 : i32
    %c0_i32_1 = arith.constant 0 : i32
    return %c0_i32, %c0_i32_0 : i32, i32
  }
  func.func @transform_9(%arg0: i32, %arg1: i32) -> (i32, i32) {
    %c0_i32 = arith.constant 0 : i32
    %c0_i32_0 = arith.constant 0 : i32
    %c0_i32_1 = arith.constant 0 : i32
    return %c0_i32, %c0_i32_0 : i32, i32
  }
  func.func @transform_10(%arg0: i32, %arg1: i32) -> (i32, i32) {
    %c0_i32 = arith.constant 0 : i32
    %c0_i32_0 = arith.constant 0 : i32
    %c0_i32_1 = arith.constant 0 : i32
    return %c0_i32, %c0_i32_0 : i32, i32
  }
  func.func @transform_11(%arg0: i32, %arg1: i32) -> (i32, i32) {
    %c0_i32 = arith.constant 0 : i32
    %c0_i32_0 = arith.constant 0 : i32
    return %arg0, %c0_i32 : i32, i32
  }
}

</mosaic_0001>

<bundles_post_ra>
// kernel: lstm_forward.1
= control target key start
LH: loop header
LB: loop body
LE: loop exit
PB: predicated region body
PF: predicated region fallthrough
CT: control target
= control target key end

     0   :  { %vm63_vm0 = vcmask 519168   ;;  %v2719_v12 = vmov 0   ;;  %vm65_vm1 = vcmask 261120   ;;  %vm314_vm2 = vcmask 523264   ;;  %s2721_s22 = smov 32   ;;  %s3497_s4 = inlined_call_operand.vmem [shape: bf16[32,128], index: 4, kind: input, shape index: {}]   ;;  %s3498_s6 = inlined_call_operand.vmem [shape: bf16[64,256], index: 6, kind: input, shape index: {}]   ;;  %s3499_s1 = inlined_call_operand.vmem [shape: bf16[1,1,64,32], index: 1, kind: input, shape index: {}, may-alias: {0,1}]   ;;  %s3500_s2 = inlined_call_operand.vmem [shape: bf16[32,128], index: 2, kind: input, shape index: {}]   ;;  %s3501_s0 = inlined_call_operand.vmem [shape: bf16[1,1,64,32], index: 0, kind: input, shape index: {}, may-alias: {0,1}]   ;;  %s3502_s5 = inlined_call_operand.vmem [shape: f32[1,128], index: 5, kind: input, shape index: {}]   ;;  %s3503_s3 = inlined_call_operand.vmem [shape: f32[1,128], index: 3, kind: input, shape index: {}]   ;;  %s3504_s8 = inlined_call_operand.vmem [shape: f32[1,16], index: 8, kind: input, shape index: {}]   ;;  %s3505_s7 = inlined_call_operand.vmem [shape: bf16[64,16], index: 7, kind: input, shape index: {}]   ;;  %s3506_s9 = inlined_call_operand.vmem [shape: bf16[16,4], index: 9, kind: input, shape index: {}]   ;;  %s3507_s10 = inlined_call_operand.vmem [shape: f32[1,4], index: 10, kind: input, shape index: {}]   ;;  %s3508_s11 = inlined_call_operand.vmem [shape: f32[8,4], index: 11, kind: output, shape index: {}]  }
   0x1   :  { %v2478_v0 = vld [vmem:[%s3497_s4 + $0x8] sm:$0xff]  ;;  %v2175_v1 = vld [vmem:[%s3498_s6 + $0x30] sm:$0xf]  ;;  %v2486_v2 = vld [vmem:[%s3498_s6 + $0x34] sm:$0xf0]  ;;  %v2720_v33 = vmov 0.0  }
   0x2   :  { %v2176_v3 = vor.u32 %v2486_v2, %v2175_v1  ;;  %v2167_v4 = vld [vmem:[%s3498_s6 + $0x20] sm:$0xf]  ;;  %v2484_v5 = vld [vmem:[%s3498_s6 + $0x24] sm:$0xf0]  ;;  %234 = vmatpush.bf16.msra.mxu1 %v2478_v0  ;;  %v2159_v10 = vld [vmem:[%s3498_s6 + $0x10] sm:$0xf] }
   0x3   :  { %v2477_v6 = vld [vmem:[%s3497_s4] sm:$0xff]  ;;  %v2168_v7 = vor.u32 %v2484_v5, %v2167_v4  ;;  %v2472_v9 = vld [vmem:[%s3500_s2 + $0x8] sm:$0xff]  ;;  %v2482_v11 = vld [vmem:[%s3498_s6 + $0x14] sm:$0xf0]  ;;  %64 = vst.msk [vmem:[#allocation4] sm:$0xf] %vm63_vm0, %v2719_v12 }
   0x4   :  { %322 = vmatpush.bf16.msra.mxu2 %v2176_v3  ;;  %v2473_v8 = vld [vmem:[%s3499_s1] sm:$0xff]  ;;  %137 = vmatpush.bf16.msra.mxu0 %v2472_v9  ;;  %v2485_v14 = vld [vmem:[%s3498_s6 + $0x34] sm:$0xf]  ;;  %v2177_v15 = vld [vmem:[%s3498_s6 + $0x38] sm:$0xf0]  ;;  %v2160_v17 = vor.u32 %v2482_v11, %v2159_v10  ;;  %66 = vst.msk [vmem:[#allocation5] sm:$0xff] %vm65_vm1, %v2720_v33 }
   0x5   :  { %v2471_v13 = vld [vmem:[%s3500_s2] sm:$0xff]  ;;  %v2180_v16 = vor.u32 %v2485_v14, %v2177_v15  ;;  %v2169_v19 = vld [vmem:[%s3498_s6 + $0x28] sm:$0xf0]  ;;  %v2480_v21 = vld [vmem:[%s3498_s6 + $0x4] sm:$0xf0]  ;;  %67 = vst.msk [vmem:[#allocation6] sm:$0xff] %vm65_vm1, %v2720_v33 }
   0x6   :  { %235 = vmatpush.bf16.msra.mxu1 %v2477_v6  ;;  %v2483_v18 = vld [vmem:[%s3498_s6 + $0x24] sm:$0xf]  ;;  %v2151_v20 = vld [vmem:[%s3498_s6] sm:$0xf]  ;;  %v2481_v24 = vld [vmem:[%s3498_s6 + $0x14] sm:$0xf] }
   0x7   :  { %v2467_v22 = vld [vmem:[%s3501_s0] sm:$0xff]  ;;  %335 = vmatpush.bf16.msra.mxu3 %v2180_v16  ;;  %v2172_v23 = vor.u32 %v2483_v18, %v2169_v19  ;;  %v2161_v25 = vld [vmem:[%s3498_s6 + $0x18] sm:$0xf0]  ;;  %v2152_v26 = vor.u32 %v2480_v21, %v2151_v20  ;;  %v2153_v29 = vld [vmem:[%s3498_s6 + $0x8] sm:$0xf0] }
   0x8   :  { %323 = vmatpush.bf16.msra.mxu2 %v2168_v7  ;;  %138 = vmatpush.bf16.msra.mxu0 %v2471_v13  ;;  %v2164_v27 = vor.u32 %v2481_v24, %v2161_v25  ;;  %v2479_v28 = vld [vmem:[%s3498_s6 + $0x4] sm:$0xf]  ;;  %v2474_v32 = vld [vmem:[%s3499_s1 + $0x8] sm:$0xff]  ;;  %v2475_v35 = vld [vmem:[%s3499_s1 + $0x10] sm:$0xff] }
   0x9   :  { %2145 = vmatmul.msk.bf16.vlgmr.msra.gmra.mxu1 %vm65_vm1, %v2473_v8  ;;  %v2156_v31 = vor.u32 %v2479_v28, %v2153_v29  ;;  %v2476_v36 = vld [vmem:[%s3499_s1 + $0x18] sm:$0xff]  ;;  %v2554_v38 = vld [vmem:[%s3502_s5] ss:$0 sm:$0xff]  ;;  %s2722_s1 = smov 96   ;;  %s2723_s5 = smov 64  }
   0xa   :  { %v265_v30 = vld [vmem:[#allocation4] sm:$0xf] }
   0xb   :  { %2117 = vmatmul.msk.bf16.vlgmr.msra.gmra.mxu0 %vm65_vm1, %v2467_v22  ;;  %336 = vmatpush.bf16.msra.mxu3 %v2172_v23  ;;  %v368_v34 = vld [vmem:[#allocation5] sm:$0xff]  ;;  %v2880_v42 = vld [vmem:[%s3503_s3] ss:$0 sm:$0xff] }
   0xc   :  { %324 = vmatpush.bf16.msra.mxu2 %v2160_v17  ;;  %370 = vrot.lane.b32.xlu1 %v368_v34, %s2721_s22  ;;  %v441_v37 = vld [vmem:[#allocation6] sm:$0xff] }
   0xf   :  { %337 = vmatpush.bf16.msra.mxu3 %v2164_v27 }
  0x10   :  { %325 = vmatpush.bf16.msra.mxu2 %v2152_v26 }
  0x13   :  { %2181 = vmatmul.msk.bf16.vlgmr.msra.gmra.mxu2 %vm314_vm2, %v265_v30  ;;  %338 = vmatpush.bf16.msra.mxu3 %v2156_v31 }
  0x14   :  { %443 = vrot.lane.b32.xlu1 %v441_v37, %s2721_s22 }
  0x16   :  { %2182 = vmatmul.msk.bf16.vlgmr.msra.gmra.mxu3 %vm314_vm2, %v265_v30 }
  0x19   :  { %2146 = vmatmul.msk.bf16.gmra.mxu1 %vm65_vm1, %v2474_v32 }
  0x29   :  { %2147 = vmatmul.msk.bf16.gmra.mxu1 %vm65_vm1, %v2475_v35 }
  0x39   :  { %2148 = vmatmul.msk.bf16.gmra.mxu1 %vm65_vm1, %v2476_v36 }
  0x86   :  { %v237_v39 = vpop.f32.mrf.mxu1 }
  0x87   :  { %v2875_v40 = vadd.f32 %v2554_v38, %v237_v39 }
  0x88   :  { %v140_v44 = vpop.f32.mrf.mxu0 }
  0x89   :  { %v141_v45 = vadd.f32 %v2880_v42, %v140_v44 }
  0x8e   :  { %v239_v41 = vpop.f32.mrf.mxu1 }
  0x8f   :  { %v2882_v43 = vadd.f32 %v2554_v38, %v239_v41 }
  0x96   :  { %v327_v46 = vpop.f32.mrf.mxu2  ;;  %v242_v48 = vpop.f32.mrf.mxu1 }
  0x97   :  { %v345_v47 = vadd.f32 %v327_v46, %v141_v45  ;;  %v2885_v49 = vadd.f32 %v2554_v38, %v242_v48  ;;  %v371_v48 = vpop.permute.xlu1 %370 }
  0x99   :  { %2558 = vtanh.f32 %v345_v47  ;;  %v340_v50 = vpop.f32.mrf.mxu3  ;;  %v2183_v3 = vmul.f32 -1.442695, %v345_v47 }
  0x9e   :  { %v329_v51 = vpop.f32.mrf.mxu2  ;;  %v244_v53 = vpop.f32.mrf.mxu1 }
  0x9f   :  { %v2559_v52 = vpop.eup %2558  ;;  %v2887_v54 = vadd.f32 %v2554_v38, %v244_v53 }
  0xa0   :  { %375 = vrot.lane.b32.xlu0 %v2559_v52, %s2721_s22 }
  0xa1   :  { %v342_v55 = vpop.f32.mrf.mxu3 }
  0xa2   :  { %v444_v55 = vpop.permute.xlu1 %443 }
  0xa6   :  { %v247_v56 = vpop.f32.mrf.mxu1 }
  0xa7   :  { %v2890_v57 = vadd.f32 %v2554_v38, %v247_v56 }
  0xae   :  { %v249_v58 = vpop.f32.mrf.mxu1 }
  0xaf   :  { %v2892_v59 = vadd.f32 %v2554_v38, %v249_v58 }
  0xb6   :  { %v252_v60 = vpop.f32.mrf.mxu1 }
  0xb7   :  { %v2894_v61 = vadd.f32 %v2554_v38, %v252_v60 }
  0xbe   :  { %v254_v62 = vpop.f32.mrf.mxu1 }
  0xbf   :  { %v255_v63 = vadd.f32 %v2554_v38, %v254_v62 }
  0xc1   :  { %v347_v0 = vadd.f32 %v340_v50, %v255_v63 }
  0xc3   :  { %2560 = vtanh.f32 %v347_v0  ;;  %v2184_v2 = vmul.f32 -1.442695, %v347_v0 }
  0xc5   :  { %2562 = vpow2.f32 %v2184_v2 }
  0xc6   :  { %2564 = vpow2.f32 %v2183_v3 }
  0xc9   :  { %v2561_v1 = vpop.eup %2560 }
  0xca   :  { %448 = vrot.lane.b32.xlu0 %v2561_v1, %s2721_s22  ;;  %v2724_v1 = vmov -inf  }
  0xcb   :  { %v2563_v4 = vpop.eup %2562  ;;  %68 = vst.msk [vmem:[#allocation7] sm:$0xff] %vm65_vm1, %v2724_v1 }
  0xcc   :  { %v405_v5 = vadd.f32 1.0, %v2563_v4  ;;  %v2565_v6 = vpop.eup %2564  ;;  %69 = vst.msk [vmem:[#allocation8] sm:$0xff] %vm65_vm1, %v2724_v1 }
  0xcd   :  { %v351_v7 = vadd.f32 1.0, %v2565_v6 }
  0xce   :  { %2566 = vrcp.f32 %v405_v5  ;;  %v417_v16 = vand.u32 2147483648, %v405_v5  ;;  %vm411_vm4 = vweird.f32 %v405_v5  ;;  %v415_v18 = vand.u32 2147483647, %v405_v5 }
  0xcf   :  { %2568 = vrcp.f32 %v351_v7  ;;  %vm357_vm6 = vweird.f32 %v351_v7  ;;  %v363_v20 = vand.u32 2147483648, %v351_v7  ;;  %v361_v23 = vand.u32 2147483647, %v351_v7 }
  0xd0   :  { %v418_v21 = vor.u32 1.1754944e-38, %v417_v16  ;;  %vm416_vm8 = vcmp.eq.f32.partialorder %v415_v18, 8.507059e+37  ;;  %v2492_v16 = vld [vmem:[%s3498_s6 + $0x24] sm:$0xf0]  ;;  %v2491_v18 = vld [vmem:[%s3498_s6 + $0x24] sm:$0xf] }
  0xd1   :  { %v364_v25 = vor.u32 1.1754944e-38, %v363_v20  ;;  %vm362_vm10 = vcmp.eq.f32.partialorder %v361_v23, 8.507059e+37  ;;  %v2490_v23 = vld [vmem:[%s3498_s6 + $0x14] sm:$0xf0] }
  0xd2   :  { %v395_v6 = vld [vmem:[#allocation7] sm:$0xff] }
  0xd4   :  { %v2567_v8 = vpop.eup %2566 }
  0xd5   :  { %v407_v9 = vmul.f32 %v2567_v8, %v405_v5  ;;  %v2569_v10 = vpop.eup %2568  ;;  %vm412_vm3 = vweird.f32 %v2567_v8 }
  0xd6   :  { %v353_v12 = vmul.f32 %v2569_v10, %v351_v7  ;;  %vm413_vm5 = vmor %vm411_vm4, %vm412_vm3  ;;  %vm358_vm7 = vweird.f32 %v2569_v10 }
  0xd7   :  { %v408_v11 = vsub.f32 1.0, %v407_v9  ;;  %vm359_vm9 = vmor %vm357_vm6, %vm358_vm7 }
  0xd8   :  { %v354_v14 = vsub.f32 1.0, %v353_v12  ;;  %v2493_v12 = vld [vmem:[%s3498_s6 + $0x34] sm:$0xf] }
  0xd9   :  { %v409_v13 = vmul.f32 %v2567_v8, %v408_v11  ;;  %v2494_v11 = vld [vmem:[%s3498_s6 + $0x34] sm:$0xf0] }
  0xda   :  { %v355_v17 = vmul.f32 %v2569_v10, %v354_v14  ;;  %v2214_v14 = vld [vmem:[%s3498_s6 + $0x38] sm:$0xf0] }
  0xdb   :  { %v410_v15 = vadd.f32 %v2567_v8, %v409_v13 }
  0xdc   :  { %v356_v22 = vadd.f32 %v2569_v10, %v355_v17  ;;  %v2217_v17 = vor.u32 %v2493_v12, %v2214_v14 }
  0xdd   :  { %v414_v19 = vsel %vm413_vm5, %v2567_v8, %v410_v15  ;;  %v2204_v15 = vld [vmem:[%s3498_s6 + $0x20] sm:$0xf] }
  0xde   :  { %v419_v24 = vsel %vm416_vm8, %v418_v21, %v414_v19  ;;  %v360_v26 = vsel %vm359_vm9, %v2569_v10, %v356_v22  ;;  %v2212_v10 = vld [vmem:[%s3498_s6 + $0x30] sm:$0xf]  ;;  %v2206_v19 = vld [vmem:[%s3498_s6 + $0x28] sm:$0xf0]  ;;  %v2205_v20 = vor.u32 %v2492_v16, %v2204_v15  ;;  %551 = vmatpush.bf16.msrb.mxu3 %v2217_v17 }
  0xdf   :  { %v2185_v27 = vmul.f32 -1.442695, %v419_v24  ;;  %v365_v28 = vsel %vm362_vm10, %v364_v25, %v360_v26  ;;  %v2213_v13 = vor.u32 %v2494_v11, %v2212_v10  ;;  %v2209_v21 = vor.u32 %v2491_v18, %v2206_v19  ;;  %v2196_v22 = vld [vmem:[%s3498_s6 + $0x10] sm:$0xf]  ;;  %v2489_v24 = vld [vmem:[%s3498_s6 + $0x14] sm:$0xf] }
  0xe0   :  { %v373_v50 = vmul.f32 %v371_v48, %v365_v28  ;;  %v2197_v25 = vor.u32 %v2490_v23, %v2196_v22  ;;  %v2198_v26 = vld [vmem:[%s3498_s6 + $0x18] sm:$0xf0] }
  0xe1   :  { %2570 = vpow2.f32 %v2185_v27  ;;  %538 = vmatpush.bf16.msrb.mxu2 %v2213_v13  ;;  %v2201_v27 = vor.u32 %v2489_v24, %v2198_v26 }
  0xe2   :  { %552 = vmatpush.bf16.msrb.mxu3 %v2209_v21 }
  0xe5   :  { %539 = vmatpush.bf16.msrb.mxu2 %v2205_v20 }
  0xe6   :  { %553 = vmatpush.bf16.msrb.mxu3 %v2201_v27 }
  0xe7   :  { %v2571_v31 = vpop.eup %2570 }
  0xe8   :  { %v424_v32 = vadd.f32 1.0, %v2571_v31 }
  0xe9   :  { %540 = vmatpush.bf16.msrb.mxu2 %v2197_v25 }
  0xea   :  { %2572 = vrcp.f32 %v424_v32  ;;  %v436_v38 = vand.u32 2147483648, %v424_v32  ;;  %vm430_vm12 = vweird.f32 %v424_v32  ;;  %v434_v39 = vand.u32 2147483647, %v424_v32 }
  0xec   :  { %v437_v44 = vor.u32 1.1754944e-38, %v436_v38  ;;  %vm435_vm14 = vcmp.eq.f32.partialorder %v434_v39, 8.507059e+37  ;;  %v142_v38 = vpop.f32.mrf.mxu0 }
  0xed   :  { %v143_v39 = vadd.f32 %v2880_v42, %v142_v38 }
  0xf0   :  { %v2573_v33 = vpop.eup %2572 }
  0xf1   :  { %v426_v34 = vmul.f32 %v2573_v33, %v424_v32  ;;  %vm431_vm11 = vweird.f32 %v2573_v33  ;;  %v2190_v32 = vld [vmem:[%s3498_s6 + $0x8] sm:$0xf0] }
  0xf2   :  { %vm432_vm13 = vmor %vm430_vm12, %vm431_vm11 }
  0xf3   :  { %v427_v35 = vsub.f32 1.0, %v426_v34 }
  0xf5   :  { %v428_v36 = vmul.f32 %v2573_v33, %v427_v35 }
  0xf7   :  { %v429_v37 = vadd.f32 %v2573_v33, %v428_v36 }
  0xf9   :  { %v433_v41 = vsel %vm432_vm13, %v2573_v33, %v429_v37 }
  0xfa   :  { %v438_v45 = vsel %vm435_vm14, %v437_v44, %v433_v41 }
  0xfb   :  { %v446_v56 = vmul.f32 %v444_v55, %v438_v45 }
 0x112   :  { %v376_v29 = vpop.permute.xlu0 %375 }
 0x113   :  { %v378_v30 = vmul.f32 %v376_v29, %v365_v28  ;;  %v2488_v29 = vld [vmem:[%s3498_s6 + $0x4] sm:$0xf0] }
 0x115   :  { %380 = vrot.lane.b32.xlu2 %v378_v30, %s2721_s22  ;;  %v2487_v30 = vld [vmem:[%s3498_s6 + $0x4] sm:$0xf] }
 0x116   :  { %v2193_v33 = vor.u32 %v2487_v30, %v2190_v32 }
 0x118   :  { %554 = vmatpush.bf16.msrb.mxu3 %v2193_v33 }
 0x13c   :  { %v449_v46 = vpop.permute.xlu0 %448 }
 0x13d   :  { %v451_v47 = vmul.f32 %v449_v46, %v438_v45 }
 0x13f   :  { %453 = vrot.lane.b32.xlu2 %v451_v47, %s2721_s22 }
 0x16f   :  { %v381_v51 = vpop.permute.xlu2 %380 }
 0x170   :  { %v383_v52 = vadd.f32 %v381_v51, %v373_v50 }
 0x172   :  { %2574 = vtanh.f32 %v383_v52 }
 0x178   :  { %v2575_v53 = vpop.eup %2574 }
 0x179   :  { %386 = vrot.lane.b32.xlu0 %v2575_v53, %s2721_s22 }
 0x199   :  { %v454_v58 = vpop.permute.xlu2 %453 }
 0x19a   :  { %v456_v60 = vadd.f32 %v454_v58, %v446_v56 }
 0x19c   :  { %2576 = vtanh.f32 %v456_v60 }
 0x1a2   :  { %v2577_v62 = vpop.eup %2576 }
 0x1a3   :  { %459 = vrot.lane.b32.xlu1 %v2577_v62, %s2721_s22 }
 0x1ab   :  { %391 = vrot.lane.b32.xlu1 %v383_v52, %s2722_s1 }
 0x1eb   :  { %v387_v63 = vpop.permute.xlu0 %386 }
 0x1ec   :  { %v389_v0 = vmul.f32 %v387_v63, %v365_v28  ;;  %v2188_v28 = vld [vmem:[%s3498_s6] sm:$0xf] }
 0x1ed   :  { %v2189_v31 = vor.u32 %v2488_v29, %v2188_v28 }
 0x1ee   :  { %397 = vrot.lane.b32.xlu2 %v389_v0, %s2723_s5 }
 0x1ef   :  { %541 = vmatpush.bf16.msrb.mxu2 %v2189_v31 }
 0x1f6   :  { %464 = vrot.lane.b32.xlu2 %v456_v60, %s2722_s1 }
 0x215   :  { %v460_v2 = vpop.permute.xlu1 %459 }
 0x216   :  { %v2906_v3 = vmul.f32 %v460_v2, %v438_v45 }
 0x218   :  { %475 = vrot.lane.b32.xlu0 %v2906_v3, %s2722_s1 }
 0x21d   :  { %v392_v4 = vpop.permute.xlu1 %391 }
 0x21e   :  { %394 = vst.msk [vmem:[#allocation5] sm:$0xff] %vm65_vm1, %v392_v4 }
 0x225   :  { %v584_v5 = vld [vmem:[#allocation5] sm:$0xff] }
 0x226   :  { %586 = vrot.lane.b32.xlu2 %v584_v5, %s2721_s22 }
 0x248   :  { %v398_v7 = vpop.permute.xlu2 %397 }
 0x249   :  { %v400_v8 = vmax.f32 %v395_v6, %v398_v7 }
 0x24b   :  { %401 = vst.msk [vmem:[#allocation7] sm:$0xff] %vm65_vm1, %v400_v8 }
 0x250   :  { %v465_v9 = vpop.permute.xlu2 %464 }
 0x251   :  { %467 = vst.msk [vmem:[#allocation6] sm:$0xff] %vm65_vm1, %v465_v9 }
 0x258   :  { %v657_v52 = vld [vmem:[#allocation6] sm:$0xff] }
 0x28a   :  { %v476_v34 = vpop.permute.xlu0 %475 }
 0x28b   :  { %v478_v35 = vsel %vm65_vm1, %v398_v7, %v476_v34 }
 0x28c   :  { %v479_v36 = vpack.c.bf16 %v478_v35, %v478_v35 }
 0x28e   :  { %481 = vst.msk [vmem:[#allocation4] sm:$0xf] %vm63_vm0, %v479_v36  ;;  %v587_v36 = vpop.permute.xlu2 %586 }
 0x295   :  { %v482_v37 = vld [vmem:[#allocation4] sm:$0xf] }
 0x296   :  { %2218 = vmatmul.msk.bf16.vlgmr.msrb.gmra.mxu2 %vm314_vm2, %v482_v37  ;;  %2219 = vmatmul.msk.bf16.vlgmr.msrb.gmra.mxu3 %vm314_vm2, %v482_v37 }
 0x319   :  { %v543_v41 = vpop.f32.mrf.mxu2  ;;  %v556_v44 = vpop.f32.mrf.mxu3 }
 0x31a   :  { %v561_v45 = vadd.f32 %v543_v41, %v143_v39  ;;  %v563_v46 = vadd.f32 %v556_v44, %v2894_v61 }
 0x31c   :  { %2578 = vtanh.f32 %v561_v45  ;;  %v2221_v53 = vmul.f32 -1.442695, %v563_v46  ;;  %v2220_v6 = vmul.f32 -1.442695, %v561_v45 }
 0x31d   :  { %2580 = vtanh.f32 %v563_v46 }
 0x31e   :  { %2582 = vpow2.f32 %v2221_v53  ;;  %v2502_v53 = vld [vmem:[%s3498_s6 + $0x34] sm:$0xf0] }
 0x321   :  { %v545_v47 = vpop.f32.mrf.mxu2  ;;  %v558_v48 = vpop.f32.mrf.mxu3 }
 0x322   :  { %v2579_v50 = vpop.eup %2578 }
 0x323   :  { %v2581_v51 = vpop.eup %2580  ;;  %591 = vrot.lane.b32.xlu0 %v2579_v50, %s2721_s22 }
 0x324   :  { %664 = vrot.lane.b32.xlu1 %v2581_v51, %s2721_s22  ;;  %v2583_v55 = vpop.eup %2582 }
 0x325   :  { %v621_v56 = vadd.f32 1.0, %v2583_v55  ;;  %v2501_v55 = vld [vmem:[%s3498_s6 + $0x34] sm:$0xf] }
 0x327   :  { %2584 = vrcp.f32 %v621_v56  ;;  %v633_v0 = vand.u32 2147483648, %v621_v56  ;;  %vm627_vm3 = vweird.f32 %v621_v56  ;;  %v631_v1 = vand.u32 2147483647, %v621_v56 }
 0x328   :  { %2586 = vpow2.f32 %v2220_v6 }
 0x329   :  { %v634_v4 = vor.u32 1.1754944e-38, %v633_v0  ;;  %vm632_vm5 = vcmp.eq.f32.partialorder %v631_v1, 8.507059e+37  ;;  %v2243_v0 = vld [vmem:[%s3498_s6 + $0x28] sm:$0xf0] }
 0x32b   :  { %659 = vrot.lane.b32.xlu0 %v657_v52, %s2721_s22  ;;  %v2249_v52 = vld [vmem:[%s3498_s6 + $0x30] sm:$0xf] }
 0x32d   :  { %v2585_v58 = vpop.eup %2584 }
 0x32e   :  { %v623_v61 = vmul.f32 %v2585_v58, %v621_v56  ;;  %vm628_vm15 = vweird.f32 %v2585_v58  ;;  %v2587_v8 = vpop.eup %2586  ;;  %v2250_v56 = vor.u32 %v2502_v53, %v2249_v52 }
 0x32f   :  { %vm629_vm4 = vmor %vm627_vm3, %vm628_vm15  ;;  %v567_v10 = vadd.f32 1.0, %v2587_v8  ;;  %v2233_v8 = vld [vmem:[%s3498_s6 + $0x10] sm:$0xf] }
 0x330   :  { %v624_v60 = vsub.f32 1.0, %v623_v61  ;;  %v2241_v61 = vld [vmem:[%s3498_s6 + $0x20] sm:$0xf]  ;;  %753 = vmatpush.bf16.msra.mxu2 %v2250_v56 }
 0x331   :  { %v579_v22 = vand.u32 2147483648, %v567_v10  ;;  %vm573_vm8 = vweird.f32 %v567_v10  ;;  %v577_v24 = vand.u32 2147483647, %v567_v10 }
 0x332   :  { %v625_v62 = vmul.f32 %v2585_v58, %v624_v60  ;;  %v2500_v60 = vld [vmem:[%s3498_s6 + $0x24] sm:$0xf0] }
 0x333   :  { %v580_v28 = vor.u32 1.1754944e-38, %v579_v22  ;;  %vm578_vm12 = vcmp.eq.f32.partialorder %v577_v24, 8.507059e+37  ;;  %v2242_v1 = vor.u32 %v2500_v60, %v2241_v61 }
 0x334   :  { %v626_v63 = vadd.f32 %v2585_v58, %v625_v62 }
 0x335   :  { %754 = vmatpush.bf16.msra.mxu2 %v2242_v1 }
 0x336   :  { %v630_v2 = vsel %vm629_vm4, %v2585_v58, %v626_v63  ;;  %v2251_v58 = vld [vmem:[%s3498_s6 + $0x38] sm:$0xf0]  ;;  %v2499_v63 = vld [vmem:[%s3498_s6 + $0x24] sm:$0xf] }
 0x337   :  { %v635_v5 = vsel %vm632_vm5, %v634_v4, %v630_v2  ;;  %v2254_v62 = vor.u32 %v2501_v55, %v2251_v58  ;;  %v2246_v2 = vor.u32 %v2499_v63, %v2243_v0 }
 0x338   :  { %v2222_v7 = vmul.f32 -1.442695, %v635_v5 }
 0x339   :  { %766 = vmatpush.bf16.msra.mxu3 %v2254_v62 }
 0x33a   :  { %2588 = vpow2.f32 %v2222_v7 }
 0x33b   :  { %2590 = vrcp.f32 %v567_v10 }
 0x33d   :  { %767 = vmatpush.bf16.msra.mxu3 %v2246_v2 }
 0x340   :  { %v2589_v9 = vpop.eup %2588 }
 0x341   :  { %v640_v11 = vadd.f32 1.0, %v2589_v9  ;;  %v2591_v12 = vpop.eup %2590  ;;  %v2498_v9 = vld [vmem:[%s3498_s6 + $0x14] sm:$0xf0] }
 0x342   :  { %v569_v14 = vmul.f32 %v2591_v12, %v567_v10  ;;  %vm574_vm6 = vweird.f32 %v2591_v12  ;;  %v2497_v10 = vld [vmem:[%s3498_s6 + $0x14] sm:$0xf] }
 0x343   :  { %2592 = vrcp.f32 %v640_v11  ;;  %v652_v23 = vand.u32 2147483648, %v640_v11  ;;  %vm646_vm9 = vweird.f32 %v640_v11  ;;  %v650_v25 = vand.u32 2147483647, %v640_v11  ;;  %vm575_vm10 = vmor %vm573_vm8, %vm574_vm6 }
 0x344   :  { %v570_v16 = vsub.f32 1.0, %v569_v14  ;;  %v2468_v14 = vld [vmem:[%s3501_s0 + $0x8] sm:$0xff] }
 0x345   :  { %v653_v29 = vor.u32 1.1754944e-38, %v652_v23  ;;  %vm651_vm13 = vcmp.eq.f32.partialorder %v650_v25, 8.507059e+37  ;;  %2118 = vmatmul.msk.bf16.gmra.mxu0 %vm65_vm1, %v2468_v14 }
 0x346   :  { %v571_v18 = vmul.f32 %v2591_v12, %v570_v16  ;;  %v2496_v16 = vld [vmem:[%s3498_s6 + $0x4] sm:$0xf0] }
 0x348   :  { %v572_v20 = vadd.f32 %v2591_v12, %v571_v18  ;;  %v2495_v18 = vld [vmem:[%s3498_s6 + $0x4] sm:$0xf] }
 0x349   :  { %v2593_v13 = vpop.eup %2592 }
 0x34a   :  { %v642_v15 = vmul.f32 %v2593_v13, %v640_v11  ;;  %vm647_vm7 = vweird.f32 %v2593_v13  ;;  %v576_v26 = vsel %vm575_vm10, %v2591_v12, %v572_v20  ;;  %v2234_v11 = vor.u32 %v2498_v9, %v2233_v8  ;;  %v2235_v12 = vld [vmem:[%s3498_s6 + $0x18] sm:$0xf0] }
 0x34b   :  { %vm648_vm11 = vmor %vm646_vm9, %vm647_vm7  ;;  %v581_v31 = vsel %vm578_vm12, %v580_v28, %v576_v26 }
 0x34c   :  { %v643_v17 = vsub.f32 1.0, %v642_v15  ;;  %v589_v45 = vmul.f32 %v587_v36, %v581_v31  ;;  %v2225_v15 = vld [vmem:[%s3498_s6] sm:$0xf]  ;;  %755 = vmatpush.bf16.msra.mxu2 %v2234_v11 }
 0x34e   :  { %v644_v19 = vmul.f32 %v2593_v13, %v643_v17  ;;  %v2226_v17 = vor.u32 %v2496_v16, %v2225_v15 }
 0x350   :  { %v645_v21 = vadd.f32 %v2593_v13, %v644_v19  ;;  %v2227_v19 = vld [vmem:[%s3498_s6 + $0x8] sm:$0xf0]  ;;  %756 = vmatpush.bf16.msra.mxu2 %v2226_v17 }
 0x351   :  { %v2230_v20 = vor.u32 %v2495_v18, %v2227_v19 }
 0x352   :  { %v649_v27 = vsel %vm648_vm11, %v2593_v13, %v645_v21  ;;  %v2238_v13 = vor.u32 %v2497_v10, %v2235_v12  ;;  %v611_v21 = vld [vmem:[#allocation7] sm:$0xff] }
 0x353   :  { %v654_v33 = vsel %vm651_vm13, %v653_v29, %v649_v27 }
 0x354   :  { %768 = vmatpush.bf16.msra.mxu3 %v2238_v13 }
 0x358   :  { %769 = vmatpush.bf16.msra.mxu3 %v2230_v20 }
 0x395   :  { %v592_v30 = vpop.permute.xlu0 %591 }
 0x396   :  { %v665_v32 = vpop.permute.xlu1 %664  ;;  %v594_v34 = vmul.f32 %v592_v30, %v581_v31 }
 0x397   :  { %v667_v35 = vmul.f32 %v665_v32, %v654_v33 }
 0x398   :  { %596 = vrot.lane.b32.xlu1 %v594_v34, %s2721_s22 }
 0x399   :  { %669 = vrot.lane.b32.xlu2 %v667_v35, %s2721_s22 }
 0x39d   :  { %v660_v37 = vpop.permute.xlu0 %659 }
 0x39e   :  { %v662_v38 = vmul.f32 %v660_v37, %v654_v33 }
 0x3c2   :  { %v145_v29 = vpop.f32.mrf.mxu0 }
 0x3c3   :  { %v146_v30 = vadd.f32 %v2880_v42, %v145_v29 }
 0x3f3   :  { %v670_v39 = vpop.permute.xlu2 %669 }
 0x3f4   :  { %v672_v41 = vadd.f32 %v670_v39, %v662_v38 }
 0x3f6   :  { %2594 = vtanh.f32 %v672_v41 }
 0x3fc   :  { %v2595_v44 = vpop.eup %2594 }
 0x3fd   :  { %675 = vrot.lane.b32.xlu1 %v2595_v44, %s2721_s22 }
 0x40a   :  { %v597_v46 = vpop.permute.xlu1 %596 }
 0x40b   :  { %v599_v47 = vadd.f32 %v597_v46, %v589_v45 }
 0x40d   :  { %2596 = vtanh.f32 %v599_v47  ;;  %607 = vrot.lane.b32.xlu1 %v599_v47, %s2722_s1 }
 0x413   :  { %v2597_v48 = vpop.eup %2596 }
 0x414   :  { %602 = vrot.lane.b32.xlu0 %v2597_v48, %s2721_s22 }
 0x46f   :  { %v676_v50 = vpop.permute.xlu1 %675 }
 0x470   :  { %v2976_v51 = vmul.f32 %v676_v50, %v654_v33 }
 0x472   :  { %691 = vrot.lane.b32.xlu0 %v2976_v51, %s2722_s1 }
 0x47f   :  { %v608_v4 = vpop.permute.xlu1 %607 }
 0x480   :  { %610 = vst.msk [vmem:[#allocation5] sm:$0xff] %vm65_vm1, %v608_v4 }
 0x486   :  { %v603_v5 = vpop.permute.xlu0 %602 }
 0x487   :  { %v605_v6 = vmul.f32 %v603_v5, %v581_v31  ;;  %v799_v7 = vld [vmem:[#allocation5] sm:$0xff] }
 0x489   :  { %613 = vrot.lane.b32.xlu2 %v605_v6, %s2723_s5 }
 0x491   :  { %680 = vrot.lane.b32.xlu2 %v672_v41, %s2722_s1 }
 0x499   :  { %801 = vrot.lane.b32.xlu2 %v799_v7, %s2721_s22 }
 0x4e3   :  { %v614_v22 = vpop.permute.xlu2 %613 }
 0x4e4   :  { %v616_v23 = vmax.f32 %v611_v21, %v614_v22  ;;  %v692_v24 = vpop.permute.xlu0 %691 }
 0x4e5   :  { %v694_v25 = vsel %vm65_vm1, %v614_v22, %v692_v24 }
 0x4e6   :  { %617 = vst.msk [vmem:[#allocation7] sm:$0xff] %vm65_vm1, %v616_v23  ;;  %v695_v26 = vpack.c.bf16 %v694_v25, %v694_v25 }
 0x4e8   :  { %696 = vst.msk [vmem:[#allocation4] sm:$0xf] %vm63_vm0, %v695_v26 }
 0x4eb   :  { %v681_v27 = vpop.permute.xlu2 %680 }
 0x4ec   :  { %683 = vst.msk [vmem:[#allocation6] sm:$0xff] %vm65_vm1, %v681_v27 }
 0x4ef   :  { %v697_v28 = vld [vmem:[#allocation4] sm:$0xf] }
 0x4f0   :  { %2255 = vmatmul.msk.bf16.vlgmr.msra.gmra.mxu2 %vm314_vm2, %v697_v28  ;;  %2256 = vmatmul.msk.bf16.vlgmr.msra.gmra.mxu3 %vm314_vm2, %v697_v28 }
 0x4f3   :  { %v872_v39 = vld [vmem:[#allocation6] sm:$0xff]  ;;  %v802_v27 = vpop.permute.xlu2 %801 }
 0x573   :  { %v758_v31 = vpop.f32.mrf.mxu2  ;;  %v771_v32 = vpop.f32.mrf.mxu3 }
 0x574   :  { %v776_v33 = vadd.f32 %v758_v31, %v146_v30  ;;  %v778_v34 = vadd.f32 %v771_v32, %v2892_v59 }
 0x576   :  { %2598 = vtanh.f32 %v776_v33  ;;  %v2258_v41 = vmul.f32 -1.442695, %v778_v34  ;;  %v2257_v61 = vmul.f32 -1.442695, %v776_v33 }
 0x577   :  { %2600 = vtanh.f32 %v778_v34 }
 0x578   :  { %2602 = vpow2.f32 %v2258_v41  ;;  %v2510_v41 = vld [vmem:[%s3498_s6 + $0x34] sm:$0xf0] }
 0x57b   :  { %v760_v35 = vpop.f32.mrf.mxu2  ;;  %v773_v36 = vpop.f32.mrf.mxu3 }
 0x57c   :  { %v2599_v37 = vpop.eup %2598 }
 0x57d   :  { %v2601_v38 = vpop.eup %2600  ;;  %806 = vrot.lane.b32.xlu0 %v2599_v37, %s2721_s22 }
 0x57e   :  { %879 = vrot.lane.b32.xlu1 %v2601_v38, %s2721_s22  ;;  %v2603_v44 = vpop.eup %2602 }
 0x57f   :  { %v836_v45 = vadd.f32 1.0, %v2603_v44  ;;  %v2509_v44 = vld [vmem:[%s3498_s6 + $0x34] sm:$0xf] }
 0x581   :  { %2604 = vrcp.f32 %v836_v45  ;;  %v848_v52 = vand.u32 2147483648, %v836_v45  ;;  %vm842_vm15 = vweird.f32 %v836_v45  ;;  %v846_v53 = vand.u32 2147483647, %v836_v45 }
 0x582   :  { %2606 = vpow2.f32 %v2257_v61 }
 0x583   :  { %v849_v56 = vor.u32 1.1754944e-38, %v848_v52  ;;  %vm847_vm4 = vcmp.eq.f32.partialorder %v846_v53, 8.507059e+37  ;;  %v2280_v52 = vld [vmem:[%s3498_s6 + $0x28] sm:$0xf0] }
 0x585   :  { %874 = vrot.lane.b32.xlu0 %v872_v39, %s2721_s22  ;;  %v2286_v39 = vld [vmem:[%s3498_s6 + $0x30] sm:$0xf] }
 0x587   :  { %v2605_v46 = vpop.eup %2604 }
 0x588   :  { %v838_v59 = vmul.f32 %v2605_v46, %v836_v45  ;;  %vm843_vm14 = vweird.f32 %v2605_v46  ;;  %v2607_v62 = vpop.eup %2606  ;;  %v2287_v45 = vor.u32 %v2510_v41, %v2286_v39 }
 0x589   :  { %vm844_vm3 = vmor %vm842_vm15, %vm843_vm14  ;;  %v782_v0 = vadd.f32 1.0, %v2607_v62  ;;  %v2270_v62 = vld [vmem:[%s3498_s6 + $0x10] sm:$0xf] }
 0x58a   :  { %v839_v47 = vsub.f32 1.0, %v838_v59  ;;  %v2278_v59 = vld [vmem:[%s3498_s6 + $0x20] sm:$0xf]  ;;  %968 = vmatpush.bf16.msrb.mxu2 %v2287_v45 }
 0x58b   :  { %v794_v13 = vand.u32 2147483648, %v782_v0  ;;  %vm788_vm7 = vweird.f32 %v782_v0  ;;  %v792_v15 = vand.u32 2147483647, %v782_v0 }
 0x58c   :  { %v840_v48 = vmul.f32 %v2605_v46, %v839_v47  ;;  %v2508_v47 = vld [vmem:[%s3498_s6 + $0x24] sm:$0xf0] }
 0x58d   :  { %v795_v19 = vor.u32 1.1754944e-38, %v794_v13  ;;  %vm793_vm11 = vcmp.eq.f32.partialorder %v792_v15, 8.507059e+37  ;;  %v2279_v53 = vor.u32 %v2508_v47, %v2278_v59 }
 0x58e   :  { %v841_v50 = vadd.f32 %v2605_v46, %v840_v48 }
 0x58f   :  { %969 = vmatpush.bf16.msrb.mxu2 %v2279_v53 }
 0x590   :  { %v845_v55 = vsel %vm844_vm3, %v2605_v46, %v841_v50  ;;  %v2288_v46 = vld [vmem:[%s3498_s6 + $0x38] sm:$0xf0]  ;;  %v2507_v50 = vld [vmem:[%s3498_s6 + $0x24] sm:$0xf] }
 0x591   :  { %v850_v58 = vsel %vm847_vm4, %v849_v56, %v845_v55  ;;  %v2291_v48 = vor.u32 %v2509_v44, %v2288_v46  ;;  %v2283_v55 = vor.u32 %v2507_v50, %v2280_v52 }
 0x592   :  { %v2259_v60 = vmul.f32 -1.442695, %v850_v58 }
 0x593   :  { %981 = vmatpush.bf16.msrb.mxu3 %v2291_v48 }
 0x594   :  { %2608 = vpow2.f32 %v2259_v60 }
 0x595   :  { %2610 = vrcp.f32 %v782_v0 }
 0x597   :  { %982 = vmatpush.bf16.msrb.mxu3 %v2283_v55 }
 0x59a   :  { %v2609_v63 = vpop.eup %2608 }
 0x59b   :  { %v855_v1 = vadd.f32 1.0, %v2609_v63  ;;  %v2611_v2 = vpop.eup %2610  ;;  %v2506_v63 = vld [vmem:[%s3498_s6 + $0x14] sm:$0xf0] }
 0x59c   :  { %v784_v5 = vmul.f32 %v2611_v2, %v782_v0  ;;  %vm789_vm5 = vweird.f32 %v2611_v2  ;;  %v2505_v0 = vld [vmem:[%s3498_s6 + $0x14] sm:$0xf] }
 0x59d   :  { %2612 = vrcp.f32 %v855_v1  ;;  %v867_v14 = vand.u32 2147483648, %v855_v1  ;;  %vm861_vm8 = vweird.f32 %v855_v1  ;;  %v865_v16 = vand.u32 2147483647, %v855_v1  ;;  %vm790_vm9 = vmor %vm788_vm7, %vm789_vm5 }
 0x59e   :  { %v785_v7 = vsub.f32 1.0, %v784_v5  ;;  %v2262_v5 = vld [vmem:[%s3498_s6] sm:$0xf] }
 0x59f   :  { %v868_v20 = vor.u32 1.1754944e-38, %v867_v14  ;;  %vm866_vm12 = vcmp.eq.f32.partialorder %v865_v16, 8.507059e+37 }
 0x5a0   :  { %v786_v9 = vmul.f32 %v2611_v2, %v785_v7  ;;  %v2503_v7 = vld [vmem:[%s3498_s6 + $0x4] sm:$0xf] }
 0x5a2   :  { %v787_v11 = vadd.f32 %v2611_v2, %v786_v9  ;;  %v2264_v9 = vld [vmem:[%s3498_s6 + $0x8] sm:$0xf0] }
 0x5a3   :  { %v2613_v4 = vpop.eup %2612 }
 0x5a4   :  { %v857_v6 = vmul.f32 %v2613_v4, %v855_v1  ;;  %vm862_vm6 = vweird.f32 %v2613_v4  ;;  %v791_v17 = vsel %vm790_vm9, %v2611_v2, %v787_v11  ;;  %v2271_v1 = vor.u32 %v2506_v63, %v2270_v62  ;;  %v2272_v2 = vld [vmem:[%s3498_s6 + $0x18] sm:$0xf0]  ;;  %v826_v11 = vld [vmem:[#allocation7] sm:$0xff] }
 0x5a5   :  { %vm863_vm10 = vmor %vm861_vm8, %vm862_vm6  ;;  %v796_v22 = vsel %vm793_vm11, %v795_v19, %v791_v17  ;;  %v147_v19 = vpop.f32.mrf.mxu0 }
 0x5a6   :  { %v858_v8 = vsub.f32 1.0, %v857_v6  ;;  %v804_v33 = vmul.f32 %v802_v27, %v796_v22  ;;  %v2504_v6 = vld [vmem:[%s3498_s6 + $0x4] sm:$0xf0]  ;;  %970 = vmatpush.bf16.msrb.mxu2 %v2271_v1 }
 0x5a8   :  { %v859_v10 = vmul.f32 %v2613_v4, %v858_v8  ;;  %v2263_v8 = vor.u32 %v2504_v6, %v2262_v5 }
 0x5aa   :  { %v860_v12 = vadd.f32 %v2613_v4, %v859_v10  ;;  %v2267_v10 = vor.u32 %v2503_v7, %v2264_v9  ;;  %971 = vmatpush.bf16.msrb.mxu2 %v2263_v8 }
 0x5ac   :  { %v864_v18 = vsel %vm863_vm10, %v2613_v4, %v860_v12  ;;  %v2275_v4 = vor.u32 %v2505_v0, %v2272_v2 }
 0x5ad   :  { %v869_v24 = vsel %vm866_vm12, %v868_v20, %v864_v18  ;;  %v148_v20 = vadd.f32 %v2880_v42, %v147_v19 }
 0x5ae   :  { %983 = vmatpush.bf16.msrb.mxu3 %v2275_v4 }
 0x5b2   :  { %984 = vmatpush.bf16.msrb.mxu3 %v2267_v10 }
 0x5ef   :  { %v807_v21 = vpop.permute.xlu0 %806 }
 0x5f0   :  { %v880_v23 = vpop.permute.xlu1 %879  ;;  %v809_v25 = vmul.f32 %v807_v21, %v796_v22 }
 0x5f1   :  { %v882_v26 = vmul.f32 %v880_v23, %v869_v24 }
 0x5f2   :  { %811 = vrot.lane.b32.xlu1 %v809_v25, %s2721_s22 }
 0x5f3   :  { %884 = vrot.lane.b32.xlu2 %v882_v26, %s2721_s22 }
 0x5f7   :  { %v875_v28 = vpop.permute.xlu0 %874 }
 0x5f8   :  { %v877_v29 = vmul.f32 %v875_v28, %v869_v24 }
 0x64d   :  { %v885_v30 = vpop.permute.xlu2 %884 }
 0x64e   :  { %v887_v31 = vadd.f32 %v885_v30, %v877_v29 }
 0x650   :  { %2614 = vtanh.f32 %v887_v31 }
 0x656   :  { %v2615_v32 = vpop.eup %2614 }
 0x657   :  { %890 = vrot.lane.b32.xlu1 %v2615_v32, %s2721_s22 }
 0x664   :  { %v812_v34 = vpop.permute.xlu1 %811 }
 0x665   :  { %v814_v35 = vadd.f32 %v812_v34, %v804_v33 }
 0x667   :  { %2616 = vtanh.f32 %v814_v35  ;;  %822 = vrot.lane.b32.xlu1 %v814_v35, %s2722_s1 }
 0x66d   :  { %v2617_v36 = vpop.eup %2616 }
 0x66e   :  { %817 = vrot.lane.b32.xlu0 %v2617_v36, %s2721_s22 }
 0x6c9   :  { %v891_v37 = vpop.permute.xlu1 %890 }
 0x6ca   :  { %v3052_v38 = vmul.f32 %v891_v37, %v869_v24 }
 0x6cc   :  { %906 = vrot.lane.b32.xlu0 %v3052_v38, %s2722_s1 }
 0x6d9   :  { %v823_v56 = vpop.permute.xlu1 %822 }
 0x6da   :  { %825 = vst.msk [vmem:[#allocation5] sm:$0xff] %vm65_vm1, %v823_v56 }
 0x6e0   :  { %v818_v58 = vpop.permute.xlu0 %817 }
 0x6e1   :  { %v820_v61 = vmul.f32 %v818_v58, %v796_v22  ;;  %v1014_v60 = vld [vmem:[#allocation5] sm:$0xff] }
 0x6e3   :  { %828 = vrot.lane.b32.xlu2 %v820_v61, %s2723_s5 }
 0x6eb   :  { %895 = vrot.lane.b32.xlu2 %v887_v31, %s2722_s1 }
 0x6f3   :  { %1016 = vrot.lane.b32.xlu2 %v1014_v60, %s2721_s22 }
 0x73d   :  { %v829_v12 = vpop.permute.xlu2 %828 }
 0x73e   :  { %v831_v13 = vmax.f32 %v826_v11, %v829_v12  ;;  %v907_v14 = vpop.permute.xlu0 %906 }
 0x73f   :  { %v909_v15 = vsel %vm65_vm1, %v829_v12, %v907_v14 }
 0x740   :  { %832 = vst.msk [vmem:[#allocation7] sm:$0xff] %vm65_vm1, %v831_v13  ;;  %v910_v16 = vpack.c.bf16 %v909_v15, %v909_v15 }
 0x742   :  { %911 = vst.msk [vmem:[#allocation4] sm:$0xf] %vm63_vm0, %v910_v16 }
 0x745   :  { %v896_v17 = vpop.permute.xlu2 %895 }
 0x746   :  { %898 = vst.msk [vmem:[#allocation6] sm:$0xff] %vm65_vm1, %v896_v17 }
 0x749   :  { %v912_v18 = vld [vmem:[#allocation4] sm:$0xf] }
 0x74a   :  { %2292 = vmatmul.msk.bf16.vlgmr.msrb.gmra.mxu2 %vm314_vm2, %v912_v18  ;;  %2293 = vmatmul.msk.bf16.vlgmr.msrb.gmra.mxu3 %vm314_vm2, %v912_v18 }
 0x74d   :  { %v1087_v29 = vld [vmem:[#allocation6] sm:$0xff]  ;;  %v1017_v16 = vpop.permute.xlu2 %1016 }
 0x7cd   :  { %v973_v21 = vpop.f32.mrf.mxu2  ;;  %v986_v22 = vpop.f32.mrf.mxu3 }
 0x7ce   :  { %v991_v23 = vadd.f32 %v973_v21, %v148_v20  ;;  %v993_v24 = vadd.f32 %v986_v22, %v2890_v57 }
 0x7d0   :  { %2618 = vtanh.f32 %v991_v23  ;;  %v2295_v30 = vmul.f32 -1.442695, %v993_v24  ;;  %v2294_v45 = vmul.f32 -1.442695, %v991_v23 }
 0x7d1   :  { %2620 = vtanh.f32 %v993_v24 }
 0x7d2   :  { %2622 = vpow2.f32 %v2295_v30  ;;  %v2517_v30 = vld [vmem:[%s3498_s6 + $0x34] sm:$0xf] }
 0x7d5   :  { %v975_v25 = vpop.f32.mrf.mxu2  ;;  %v988_v26 = vpop.f32.mrf.mxu3 }
 0x7d6   :  { %v2619_v27 = vpop.eup %2618 }
 0x7d7   :  { %v2621_v28 = vpop.eup %2620  ;;  %1021 = vrot.lane.b32.xlu0 %v2619_v27, %s2721_s22 }
 0x7d8   :  { %1094 = vrot.lane.b32.xlu1 %v2621_v28, %s2721_s22  ;;  %v2623_v42 = vpop.eup %2622  ;;  %v2323_v28 = vld [vmem:[%s3498_s6 + $0x30] sm:$0xf] }
 0x7d9   :  { %v1051_v31 = vadd.f32 1.0, %v2623_v42 }
 0x7db   :  { %2624 = vrcp.f32 %v1051_v31  ;;  %v1063_v36 = vand.u32 2147483648, %v1051_v31  ;;  %vm1057_vm14 = vweird.f32 %v1051_v31  ;;  %v1061_v37 = vand.u32 2147483647, %v1051_v31 }
 0x7dc   :  { %2626 = vpow2.f32 %v2294_v45  ;;  %v2513_v45 = vld [vmem:[%s3498_s6 + $0x14] sm:$0xf] }
 0x7dd   :  { %v1064_v41 = vor.u32 1.1754944e-38, %v1063_v36  ;;  %vm1062_vm3 = vcmp.eq.f32.partialorder %v1061_v37, 8.507059e+37  ;;  %v2469_v36 = vld [vmem:[%s3501_s0 + $0x10] sm:$0xff] }
 0x7de   :  { %2119 = vmatmul.msk.bf16.gmra.mxu0 %vm65_vm1, %v2469_v36 }
 0x7df   :  { %1089 = vrot.lane.b32.xlu0 %v1087_v29, %s2721_s22  ;;  %v2518_v29 = vld [vmem:[%s3498_s6 + $0x34] sm:$0xf0] }
 0x7e0   :  { %v2324_v42 = vor.u32 %v2518_v29, %v2323_v28 }
 0x7e1   :  { %v2625_v32 = vpop.eup %2624 }
 0x7e2   :  { %v1053_v57 = vmul.f32 %v2625_v32, %v1051_v31  ;;  %vm1058_vm13 = vweird.f32 %v2625_v32  ;;  %v2627_v59 = vpop.eup %2626  ;;  %v2325_v31 = vld [vmem:[%s3498_s6 + $0x38] sm:$0xf0]  ;;  %1183 = vmatpush.bf16.msrb.mxu0 %v2324_v42 }
 0x7e3   :  { %vm1059_vm15 = vmor %vm1057_vm14, %vm1058_vm13  ;;  %v997_v48 = vadd.f32 1.0, %v2627_v59 }
 0x7e4   :  { %v1054_v33 = vsub.f32 1.0, %v1053_v57  ;;  %v2516_v57 = vld [vmem:[%s3498_s6 + $0x24] sm:$0xf0] }
 0x7e5   :  { %v1009_v1 = vand.u32 2147483648, %v997_v48  ;;  %vm1003_vm6 = vweird.f32 %v997_v48  ;;  %v1007_v4 = vand.u32 2147483647, %v997_v48 }
 0x7e6   :  { %v1055_v34 = vmul.f32 %v2625_v32, %v1054_v33  ;;  %v2328_v33 = vor.u32 %v2517_v30, %v2325_v31 }
 0x7e7   :  { %v1010_v8 = vor.u32 1.1754944e-38, %v1009_v1  ;;  %vm1008_vm10 = vcmp.eq.f32.partialorder %v1007_v4, 8.507059e+37 }
 0x7e8   :  { %v1056_v35 = vadd.f32 %v2625_v32, %v1055_v34  ;;  %v2515_v34 = vld [vmem:[%s3498_s6 + $0x24] sm:$0xf]  ;;  %1196 = vmatpush.bf16.msrb.mxu1 %v2328_v33 }
 0x7ea   :  { %v1060_v39 = vsel %vm1059_vm15, %v2625_v32, %v1056_v35  ;;  %v2315_v32 = vld [vmem:[%s3498_s6 + $0x20] sm:$0xf]  ;;  %v2317_v35 = vld [vmem:[%s3498_s6 + $0x28] sm:$0xf0] }
 0x7eb   :  { %v1065_v44 = vsel %vm1062_vm3, %v1064_v41, %v1060_v39  ;;  %v2316_v37 = vor.u32 %v2516_v57, %v2315_v32  ;;  %v2320_v39 = vor.u32 %v2515_v34, %v2317_v35  ;;  %v2307_v41 = vld [vmem:[%s3498_s6 + $0x10] sm:$0xf] }
 0x7ec   :  { %v2296_v46 = vmul.f32 -1.442695, %v1065_v44  ;;  %v2514_v44 = vld [vmem:[%s3498_s6 + $0x14] sm:$0xf0] }
 0x7ed   :  { %1184 = vmatpush.bf16.msrb.mxu0 %v2316_v37  ;;  %1197 = vmatpush.bf16.msrb.mxu1 %v2320_v39 }
 0x7ee   :  { %2628 = vpow2.f32 %v2296_v46  ;;  %v2309_v46 = vld [vmem:[%s3498_s6 + $0x18] sm:$0xf0] }
 0x7ef   :  { %2630 = vrcp.f32 %v997_v48 }
 0x7f4   :  { %v2629_v47 = vpop.eup %2628 }
 0x7f5   :  { %v1070_v50 = vadd.f32 1.0, %v2629_v47  ;;  %v2631_v52 = vpop.eup %2630  ;;  %v2308_v47 = vor.u32 %v2514_v44, %v2307_v41 }
 0x7f6   :  { %v999_v55 = vmul.f32 %v2631_v52, %v997_v48  ;;  %vm1004_vm4 = vweird.f32 %v2631_v52  ;;  %v2312_v48 = vor.u32 %v2513_v45, %v2309_v46 }
 0x7f7   :  { %2632 = vrcp.f32 %v1070_v50  ;;  %v1082_v2 = vand.u32 2147483648, %v1070_v50  ;;  %vm1076_vm7 = vweird.f32 %v1070_v50  ;;  %v1080_v5 = vand.u32 2147483647, %v1070_v50  ;;  %vm1005_vm8 = vmor %vm1003_vm6, %vm1004_vm4  ;;  %1185 = vmatpush.bf16.msrb.mxu0 %v2308_v47 }
 0x7f8   :  { %v1000_v58 = vsub.f32 1.0, %v999_v55  ;;  %v2301_v55 = vld [vmem:[%s3498_s6 + $0x8] sm:$0xf0]  ;;  %1198 = vmatpush.bf16.msrb.mxu1 %v2312_v48 }
 0x7f9   :  { %v1083_v9 = vor.u32 1.1754944e-38, %v1082_v2  ;;  %vm1081_vm11 = vcmp.eq.f32.partialorder %v1080_v5, 8.507059e+37 }
 0x7fa   :  { %v1001_v60 = vmul.f32 %v2631_v52, %v1000_v58 }
 0x7fc   :  { %v1002_v63 = vadd.f32 %v2631_v52, %v1001_v60 }
 0x7fd   :  { %v2633_v53 = vpop.eup %2632 }
 0x7fe   :  { %v1072_v56 = vmul.f32 %v2633_v53, %v1070_v50  ;;  %vm1077_vm5 = vweird.f32 %v2633_v53  ;;  %v1006_v6 = vsel %vm1005_vm8, %v2631_v52, %v1002_v63  ;;  %v2299_v50 = vld [vmem:[%s3498_s6] sm:$0xf]  ;;  %v2512_v52 = vld [vmem:[%s3498_s6 + $0x4] sm:$0xf0] }
 0x7ff   :  { %vm1078_vm9 = vmor %vm1076_vm7, %vm1077_vm5  ;;  %v1011_v11 = vsel %vm1008_vm10, %v1010_v8, %v1006_v6 }
 0x800   :  { %v1073_v61 = vsub.f32 1.0, %v1072_v56  ;;  %v1019_v22 = vmul.f32 %v1017_v16, %v1011_v11  ;;  %v2300_v56 = vor.u32 %v2512_v52, %v2299_v50 }
 0x802   :  { %v1074_v62 = vmul.f32 %v2633_v53, %v1073_v61  ;;  %1186 = vmatpush.bf16.msrb.mxu0 %v2300_v56 }
 0x804   :  { %v1075_v0 = vadd.f32 %v2633_v53, %v1074_v62  ;;  %v2470_v62 = vld [vmem:[%s3501_s0 + $0x18] sm:$0xff] }
 0x805   :  { %2120 = vmatmul.msk.bf16.gmra.mxu0 %vm65_vm1, %v2470_v62 }
 0x806   :  { %v1079_v7 = vsel %vm1078_vm9, %v2633_v53, %v1075_v0  ;;  %v2511_v53 = vld [vmem:[%s3498_s6 + $0x4] sm:$0xf]  ;;  %v1041_v0 = vld [vmem:[#allocation7] sm:$0xff] }
 0x807   :  { %v1084_v13 = vsel %vm1081_vm11, %v1083_v9, %v1079_v7  ;;  %v2304_v58 = vor.u32 %v2511_v53, %v2301_v55 }
 0x809   :  { %1199 = vmatpush.bf16.msrb.mxu1 %v2304_v58 }
 0x849   :  { %v1022_v10 = vpop.permute.xlu0 %1021 }
 0x84a   :  { %v1095_v12 = vpop.permute.xlu1 %1094  ;;  %v1024_v14 = vmul.f32 %v1022_v10, %v1011_v11 }
 0x84b   :  { %v1097_v15 = vmul.f32 %v1095_v12, %v1084_v13 }
 0x84c   :  { %1026 = vrot.lane.b32.xlu1 %v1024_v14, %s2721_s22 }
 0x84d   :  { %1099 = vrot.lane.b32.xlu2 %v1097_v15, %s2721_s22 }
 0x851   :  { %v1090_v17 = vpop.permute.xlu0 %1089 }
 0x852   :  { %v1092_v18 = vmul.f32 %v1090_v17, %v1084_v13 }
 0x85b   :  { %v150_v9 = vpop.f32.mrf.mxu0 }
 0x863   :  { %v3194_v10 = vpop.f32.mrf.mxu0 }
 0x8a7   :  { %v1100_v19 = vpop.permute.xlu2 %1099 }
 0x8a8   :  { %v1102_v20 = vadd.f32 %v1100_v19, %v1092_v18 }
 0x8aa   :  { %2634 = vtanh.f32 %v1102_v20 }
 0x8b0   :  { %v2635_v21 = vpop.eup %2634 }
 0x8b1   :  { %1105 = vrot.lane.b32.xlu1 %v2635_v21, %s2721_s22 }
 0x8be   :  { %v1027_v23 = vpop.permute.xlu1 %1026 }
 0x8bf   :  { %v1029_v24 = vadd.f32 %v1027_v23, %v1019_v22 }
 0x8c1   :  { %2636 = vtanh.f32 %v1029_v24  ;;  %1037 = vrot.lane.b32.xlu1 %v1029_v24, %s2722_s1 }
 0x8c7   :  { %v2637_v25 = vpop.eup %2636 }
 0x8c8   :  { %1032 = vrot.lane.b32.xlu0 %v2637_v25, %s2721_s22 }
 0x923   :  { %v1106_v26 = vpop.permute.xlu1 %1105 }
 0x924   :  { %v3124_v27 = vmul.f32 %v1106_v26, %v1084_v13  ;;  %v3203_v13 = vld [vmem:[%s3503_s3] ss:$0 sm:$0xff] }
 0x925   :  { %v151_v14 = vadd.f32 %v3203_v13, %v150_v9 }
 0x926   :  { %1121 = vrot.lane.b32.xlu0 %v3124_v27, %s2722_s1 }
 0x933   :  { %v1038_v59 = vpop.permute.xlu1 %1037 }
 0x934   :  { %1040 = vst.msk [vmem:[#allocation5] sm:$0xff] %vm65_vm1, %v1038_v59 }
 0x93a   :  { %v1033_v61 = vpop.permute.xlu0 %1032 }
 0x93b   :  { %v1035_v60 = vmul.f32 %v1033_v61, %v1011_v11  ;;  %v1229_v63 = vld [vmem:[#allocation5] sm:$0xff]  ;;  %v3196_v11 = vpop.f32.mrf.mxu0 }
 0x93d   :  { %1043 = vrot.lane.b32.xlu2 %v1035_v60, %s2723_s5 }
 0x943   :  { %v3198_v12 = vpop.f32.mrf.mxu0 }
 0x945   :  { %1110 = vrot.lane.b32.xlu2 %v1102_v20, %s2722_s1 }
 0x94d   :  { %1231 = vrot.lane.b32.xlu2 %v1229_v63, %s2721_s22 }
 0x997   :  { %v1044_v1 = vpop.permute.xlu2 %1043 }
 0x998   :  { %v1046_v2 = vmax.f32 %v1041_v0, %v1044_v1  ;;  %v1122_v4 = vpop.permute.xlu0 %1121 }
 0x999   :  { %v1124_v5 = vsel %vm65_vm1, %v1044_v1, %v1122_v4 }
 0x99a   :  { %1047 = vst.msk [vmem:[#allocation7] sm:$0xff] %vm65_vm1, %v1046_v2  ;;  %v1125_v6 = vpack.c.bf16 %v1124_v5, %v1124_v5 }
 0x99c   :  { %1126 = vst.msk [vmem:[#allocation4] sm:$0xf] %vm63_vm0, %v1125_v6 }
 0x99f   :  { %v1111_v7 = vpop.permute.xlu2 %1110 }
 0x9a0   :  { %1113 = vst.msk [vmem:[#allocation6] sm:$0xff] %vm65_vm1, %v1111_v7 }
 0x9a3   :  { %v1127_v8 = vld [vmem:[#allocation4] sm:$0xf] }
 0x9a4   :  { %2329 = vmatmul.msk.bf16.vlgmr.msrb.gmra.mxu0 %vm314_vm2, %v1127_v8  ;;  %2330 = vmatmul.msk.bf16.vlgmr.msrb.gmra.mxu1 %vm314_vm2, %v1127_v8 }
 0x9a7   :  { %v1302_v23 = vld [vmem:[#allocation6] sm:$0xff] }
 0xa21   :  { %v1188_v15 = vpop.f32.mrf.mxu0  ;;  %v1201_v16 = vpop.f32.mrf.mxu1 }
 0xa22   :  { %v1206_v17 = vadd.f32 %v1188_v15, %v151_v14  ;;  %v1208_v18 = vadd.f32 %v1201_v16, %v2887_v54  ;;  %v1232_v14 = vpop.permute.xlu2 %1231 }
 0xa24   :  { %2638 = vtanh.f32 %v1206_v17  ;;  %v2332_v24 = vmul.f32 -1.442695, %v1208_v18  ;;  %v2331_v35 = vmul.f32 -1.442695, %v1206_v17 }
 0xa25   :  { %2640 = vtanh.f32 %v1208_v18 }
 0xa26   :  { %2642 = vpow2.f32 %v2332_v24 }
 0xa29   :  { %v1190_v19 = vpop.f32.mrf.mxu0  ;;  %v1203_v20 = vpop.f32.mrf.mxu1 }
 0xa2a   :  { %v2639_v21 = vpop.eup %2638 }
 0xa2b   :  { %v2641_v22 = vpop.eup %2640  ;;  %1236 = vrot.lane.b32.xlu0 %v2639_v21, %s2721_s22 }
 0xa2c   :  { %1309 = vrot.lane.b32.xlu1 %v2641_v22, %s2721_s22  ;;  %v2643_v25 = vpop.eup %2642 }
 0xa2d   :  { %v1266_v26 = vadd.f32 1.0, %v2643_v25 }
 0xa2f   :  { %2644 = vrcp.f32 %v1266_v26  ;;  %v1278_v31 = vand.u32 2147483648, %v1266_v26  ;;  %vm1272_vm13 = vweird.f32 %v1266_v26  ;;  %v1276_v32 = vand.u32 2147483647, %v1266_v26 }
 0xa30   :  { %2646 = vpow2.f32 %v2331_v35 }
 0xa31   :  { %v1279_v33 = vor.u32 1.1754944e-38, %v1278_v31  ;;  %vm1277_vm15 = vcmp.eq.f32.partialorder %v1276_v32, 8.507059e+37  ;;  %v2524_v31 = vld [vmem:[%s3498_s6 + $0x24] sm:$0xf0] }
 0xa33   :  { %1304 = vrot.lane.b32.xlu0 %v1302_v23, %s2721_s22 }
 0xa35   :  { %v2645_v28 = vpop.eup %2644 }
 0xa36   :  { %v1268_v54 = vmul.f32 %v2645_v28, %v1266_v26  ;;  %vm1273_vm12 = vweird.f32 %v2645_v28  ;;  %v2647_v37 = vpop.eup %2646  ;;  %v2360_v26 = vld [vmem:[%s3498_s6 + $0x30] sm:$0xf] }
 0xa37   :  { %vm1274_vm14 = vmor %vm1272_vm13, %vm1273_vm12  ;;  %v1212_v41 = vadd.f32 1.0, %v2647_v37 }
 0xa38   :  { %v1269_v29 = vsub.f32 1.0, %v1268_v54  ;;  %v2525_v54 = vld [vmem:[%s3498_s6 + $0x34] sm:$0xf] }
 0xa39   :  { %v1224_v58 = vand.u32 2147483648, %v1212_v41  ;;  %vm1218_vm5 = vweird.f32 %v1212_v41  ;;  %v1222_v60 = vand.u32 2147483647, %v1212_v41 }
 0xa3a   :  { %v1270_v30 = vmul.f32 %v2645_v28, %v1269_v29 }
 0xa3b   :  { %v1225_v1 = vor.u32 1.1754944e-38, %v1224_v58  ;;  %vm1223_vm9 = vcmp.eq.f32.partialorder %v1222_v60, 8.507059e+37 }
 0xa3c   :  { %v1271_v42 = vadd.f32 %v2645_v28, %v1270_v30  ;;  %v2362_v30 = vld [vmem:[%s3498_s6 + $0x38] sm:$0xf0] }
 0xa3d   :  { %v2365_v32 = vor.u32 %v2525_v54, %v2362_v30 }
 0xa3e   :  { %v1275_v57 = vsel %vm1274_vm14, %v2645_v28, %v1271_v42  ;;  %v2526_v28 = vld [vmem:[%s3498_s6 + $0x34] sm:$0xf0]  ;;  %v2352_v42 = vld [vmem:[%s3498_s6 + $0x20] sm:$0xf] }
 0xa3f   :  { %v1280_v34 = vsel %vm1277_vm15, %v1279_v33, %v1275_v57  ;;  %v2361_v29 = vor.u32 %v2526_v28, %v2360_v26  ;;  %v2523_v57 = vld [vmem:[%s3498_s6 + $0x24] sm:$0xf]  ;;  %v2354_v33 = vld [vmem:[%s3498_s6 + $0x28] sm:$0xf0]  ;;  %1411 = vmatpush.bf16.msra.mxu3 %v2365_v32 }
 0xa40   :  { %v2333_v36 = vmul.f32 -1.442695, %v1280_v34  ;;  %v2353_v34 = vor.u32 %v2524_v31, %v2352_v42  ;;  %v2357_v35 = vor.u32 %v2523_v57, %v2354_v33 }
 0xa41   :  { %1398 = vmatpush.bf16.msra.mxu2 %v2361_v29 }
 0xa42   :  { %2648 = vpow2.f32 %v2333_v36 }
 0xa43   :  { %2650 = vrcp.f32 %v1212_v41  ;;  %1412 = vmatpush.bf16.msra.mxu3 %v2357_v35 }
 0xa45   :  { %1399 = vmatpush.bf16.msra.mxu2 %v2353_v34 }
 0xa48   :  { %v2649_v39 = vpop.eup %2648 }
 0xa49   :  { %v1285_v44 = vadd.f32 1.0, %v2649_v39  ;;  %v2651_v45 = vpop.eup %2650 }
 0xa4a   :  { %v1214_v59 = vmul.f32 %v2651_v45, %v1212_v41  ;;  %vm1219_vm3 = vweird.f32 %v2651_v45 }
 0xa4b   :  { %2652 = vrcp.f32 %v1285_v44  ;;  %v1297_v61 = vand.u32 2147483648, %v1285_v44  ;;  %vm1291_vm6 = vweird.f32 %v1285_v44  ;;  %v1295_v62 = vand.u32 2147483647, %v1285_v44  ;;  %vm1220_vm7 = vmor %vm1218_vm5, %vm1219_vm3 }
 0xa4c   :  { %v1215_v48 = vsub.f32 1.0, %v1214_v59 }
 0xa4d   :  { %v1298_v2 = vor.u32 1.1754944e-38, %v1297_v61  ;;  %vm1296_vm10 = vcmp.eq.f32.partialorder %v1295_v62, 8.507059e+37  ;;  %v1256_v61 = vld [vmem:[#allocation7] sm:$0xff] }
 0xa4e   :  { %v1216_v52 = vmul.f32 %v2651_v45, %v1215_v48 }
 0xa50   :  { %v1217_v55 = vadd.f32 %v2651_v45, %v1216_v52  ;;  %v2520_v52 = vld [vmem:[%s3498_s6 + $0x4] sm:$0xf0] }
 0xa51   :  { %v2653_v46 = vpop.eup %2652 }
 0xa52   :  { %v1287_v47 = vmul.f32 %v2653_v46, %v1285_v44  ;;  %vm1292_vm4 = vweird.f32 %v2653_v46  ;;  %v1221_v63 = vsel %vm1220_vm7, %v2651_v45, %v1217_v55  ;;  %v2344_v44 = vld [vmem:[%s3498_s6 + $0x10] sm:$0xf]  ;;  %v2522_v45 = vld [vmem:[%s3498_s6 + $0x14] sm:$0xf0] }
 0xa53   :  { %vm1293_vm8 = vmor %vm1291_vm6, %vm1292_vm4  ;;  %v1226_v5 = vsel %vm1223_vm9, %v1225_v1, %v1221_v63  ;;  %v2345_v59 = vor.u32 %v2522_v45, %v2344_v44 }
 0xa54   :  { %v1288_v50 = vsub.f32 1.0, %v1287_v47  ;;  %v1234_v20 = vmul.f32 %v1232_v14, %v1226_v5  ;;  %v2346_v47 = vld [vmem:[%s3498_s6 + $0x18] sm:$0xf0] }
 0xa55   :  { %1400 = vmatpush.bf16.msra.mxu2 %v2345_v59 }
 0xa56   :  { %v1289_v53 = vmul.f32 %v2653_v46, %v1288_v50  ;;  %v2336_v50 = vld [vmem:[%s3498_s6] sm:$0xf] }
 0xa57   :  { %v2337_v55 = vor.u32 %v2520_v52, %v2336_v50 }
 0xa58   :  { %v1290_v56 = vadd.f32 %v2653_v46, %v1289_v53  ;;  %v2519_v53 = vld [vmem:[%s3498_s6 + $0x4] sm:$0xf] }
 0xa59   :  { %1401 = vmatpush.bf16.msra.mxu2 %v2337_v55 }
 0xa5a   :  { %v1294_v0 = vsel %vm1293_vm8, %v2653_v46, %v1290_v56  ;;  %v2521_v46 = vld [vmem:[%s3498_s6 + $0x14] sm:$0xf]  ;;  %v2338_v56 = vld [vmem:[%s3498_s6 + $0x8] sm:$0xf0] }
 0xa5b   :  { %v1299_v7 = vsel %vm1296_vm10, %v1298_v2, %v1294_v0  ;;  %v2349_v48 = vor.u32 %v2521_v46, %v2346_v47  ;;  %v2341_v58 = vor.u32 %v2519_v53, %v2338_v56 }
 0xa5d   :  { %1413 = vmatpush.bf16.msra.mxu3 %v2349_v48 }
 0xa61   :  { %1414 = vmatpush.bf16.msra.mxu3 %v2341_v58 }
 0xa9d   :  { %v1237_v4 = vpop.permute.xlu0 %1236 }
 0xa9e   :  { %v1310_v6 = vpop.permute.xlu1 %1309  ;;  %v1239_v8 = vmul.f32 %v1237_v4, %v1226_v5 }
 0xa9f   :  { %v1312_v9 = vmul.f32 %v1310_v6, %v1299_v7 }
 0xaa0   :  { %1241 = vrot.lane.b32.xlu1 %v1239_v8, %s2721_s22 }
 0xaa1   :  { %1314 = vrot.lane.b32.xlu2 %v1312_v9, %s2721_s22 }
 0xaa5   :  { %v1305_v15 = vpop.permute.xlu0 %1304 }
 0xaa6   :  { %v1307_v16 = vmul.f32 %v1305_v15, %v1299_v7 }
 0xafb   :  { %v1315_v17 = vpop.permute.xlu2 %1314 }
 0xafc   :  { %v1317_v18 = vadd.f32 %v1315_v17, %v1307_v16 }
 0xafe   :  { %2654 = vtanh.f32 %v1317_v18 }
 0xb04   :  { %v2655_v19 = vpop.eup %2654 }
 0xb05   :  { %1320 = vrot.lane.b32.xlu1 %v2655_v19, %s2721_s22 }
 0xb12   :  { %v1242_v21 = vpop.permute.xlu1 %1241 }
 0xb13   :  { %v1244_v22 = vadd.f32 %v1242_v21, %v1234_v20 }
 0xb15   :  { %2656 = vtanh.f32 %v1244_v22  ;;  %1252 = vrot.lane.b32.xlu1 %v1244_v22, %s2722_s1 }
 0xb1b   :  { %v2657_v23 = vpop.eup %2656 }
 0xb1c   :  { %1247 = vrot.lane.b32.xlu0 %v2657_v23, %s2721_s22 }
 0xb77   :  { %v1321_v24 = vpop.permute.xlu1 %1320 }
 0xb78   :  { %v3215_v25 = vmul.f32 %v1321_v24, %v1299_v7 }
 0xb7a   :  { %1336 = vrot.lane.b32.xlu0 %v3215_v25, %s2722_s1 }
 0xb87   :  { %v1253_v36 = vpop.permute.xlu1 %1252 }
 0xb88   :  { %1255 = vst.msk [vmem:[#allocation5] sm:$0xff] %vm65_vm1, %v1253_v36 }
 0xb8e   :  { %v1248_v37 = vpop.permute.xlu0 %1247 }
 0xb8f   :  { %v1250_v39 = vmul.f32 %v1248_v37, %v1226_v5  ;;  %v1444_v41 = vld [vmem:[#allocation5] sm:$0xff]  ;;  %v153_v5 = vadd.f32 %v3203_v13, %v3194_v10 }
 0xb91   :  { %1258 = vrot.lane.b32.xlu2 %v1250_v39, %s2723_s5 }
 0xb99   :  { %1325 = vrot.lane.b32.xlu2 %v1317_v18, %s2722_s1 }
 0xba1   :  { %1446 = vrot.lane.b32.xlu2 %v1444_v41, %s2721_s22 }
 0xbeb   :  { %v1259_v60 = vpop.permute.xlu2 %1258 }
 0xbec   :  { %v1261_v62 = vmax.f32 %v1256_v61, %v1259_v60  ;;  %v1337_v63 = vpop.permute.xlu0 %1336 }
 0xbed   :  { %v1339_v0 = vsel %vm65_vm1, %v1259_v60, %v1337_v63 }
 0xbee   :  { %1262 = vst.msk [vmem:[#allocation7] sm:$0xff] %vm65_vm1, %v1261_v62  ;;  %v1340_v1 = vpack.c.bf16 %v1339_v0, %v1339_v0 }
 0xbf0   :  { %1341 = vst.msk [vmem:[#allocation4] sm:$0xf] %vm63_vm0, %v1340_v1 }
 0xbf3   :  { %v1326_v2 = vpop.permute.xlu2 %1325 }
 0xbf4   :  { %1328 = vst.msk [vmem:[#allocation6] sm:$0xff] %vm65_vm1, %v1326_v2 }
 0xbf7   :  { %v1342_v4 = vld [vmem:[#allocation4] sm:$0xf] }
 0xbf8   :  { %2366 = vmatmul.msk.bf16.vlgmr.msra.gmra.mxu2 %vm314_vm2, %v1342_v4  ;;  %2367 = vmatmul.msk.bf16.vlgmr.msra.gmra.mxu3 %vm314_vm2, %v1342_v4 }
 0xbfb   :  { %v1517_v18 = vld [vmem:[#allocation6] sm:$0xff]  ;;  %v1447_v4 = vpop.permute.xlu2 %1446 }
 0xc7b   :  { %v1403_v6 = vpop.f32.mrf.mxu2  ;;  %v1416_v7 = vpop.f32.mrf.mxu3 }
 0xc7c   :  { %v1421_v8 = vadd.f32 %v1403_v6, %v153_v5  ;;  %v1423_v9 = vadd.f32 %v1416_v7, %v2885_v49 }
 0xc7e   :  { %2658 = vtanh.f32 %v1421_v8  ;;  %v2369_v19 = vmul.f32 -1.442695, %v1423_v9  ;;  %v2368_v42 = vmul.f32 -1.442695, %v1421_v8 }
 0xc7f   :  { %2660 = vtanh.f32 %v1423_v9 }
 0xc80   :  { %2662 = vpow2.f32 %v2369_v19 }
 0xc83   :  { %v1405_v14 = vpop.f32.mrf.mxu2  ;;  %v1418_v15 = vpop.f32.mrf.mxu3 }
 0xc84   :  { %v2659_v16 = vpop.eup %2658 }
 0xc85   :  { %v2661_v17 = vpop.eup %2660  ;;  %1451 = vrot.lane.b32.xlu0 %v2659_v16, %s2721_s22 }
 0xc86   :  { %1524 = vrot.lane.b32.xlu1 %v2661_v17, %s2721_s22  ;;  %v2663_v10 = vpop.eup %2662 }
 0xc87   :  { %v1481_v20 = vadd.f32 1.0, %v2663_v10  ;;  %v2397_v10 = vld [vmem:[%s3498_s6 + $0x30] sm:$0xf] }
 0xc89   :  { %2664 = vrcp.f32 %v1481_v20  ;;  %v1493_v26 = vand.u32 2147483648, %v1481_v20  ;;  %vm1487_vm12 = vweird.f32 %v1481_v20  ;;  %v1491_v28 = vand.u32 2147483647, %v1481_v20 }
 0xc8a   :  { %2666 = vpow2.f32 %v2368_v42 }
 0xc8b   :  { %v1494_v29 = vor.u32 1.1754944e-38, %v1493_v26  ;;  %vm1492_vm14 = vcmp.eq.f32.partialorder %v1491_v28, 8.507059e+37  ;;  %v2531_v28 = vld [vmem:[%s3498_s6 + $0x24] sm:$0xf] }
 0xc8d   :  { %1519 = vrot.lane.b32.xlu0 %v1517_v18, %s2721_s22 }
 0xc8f   :  { %v2665_v21 = vpop.eup %2664 }
 0xc90   :  { %v1483_v49 = vmul.f32 %v2665_v21, %v1481_v20  ;;  %vm1488_vm11 = vweird.f32 %v2665_v21  ;;  %v2667_v32 = vpop.eup %2666  ;;  %v2534_v20 = vld [vmem:[%s3498_s6 + $0x34] sm:$0xf0] }
 0xc91   :  { %vm1489_vm13 = vmor %vm1487_vm12, %vm1488_vm11  ;;  %v1427_v33 = vadd.f32 1.0, %v2667_v32 }
 0xc92   :  { %v1484_v22 = vsub.f32 1.0, %v1483_v49  ;;  %v2398_v49 = vor.u32 %v2534_v20, %v2397_v10 }
 0xc93   :  { %v1439_v48 = vand.u32 2147483648, %v1427_v33  ;;  %vm1433_vm4 = vweird.f32 %v1427_v33  ;;  %v1437_v52 = vand.u32 2147483647, %v1427_v33 }
 0xc94   :  { %v1485_v23 = vmul.f32 %v2665_v21, %v1484_v22  ;;  %v2399_v22 = vld [vmem:[%s3498_s6 + $0x38] sm:$0xf0]  ;;  %1613 = vmatpush.bf16.msra.mxu0 %v2398_v49 }
 0xc95   :  { %v1440_v58 = vor.u32 1.1754944e-38, %v1439_v48  ;;  %vm1438_vm8 = vcmp.eq.f32.partialorder %v1437_v52, 8.507059e+37  ;;  %v1471_v48 = vld [vmem:[#allocation7] sm:$0xff] }
 0xc96   :  { %v1486_v24 = vadd.f32 %v2665_v21, %v1485_v23  ;;  %v2389_v23 = vld [vmem:[%s3498_s6 + $0x20] sm:$0xf] }
 0xc98   :  { %v1490_v54 = vsel %vm1489_vm13, %v2665_v21, %v1486_v24  ;;  %v2533_v21 = vld [vmem:[%s3498_s6 + $0x34] sm:$0xf]  ;;  %v2532_v24 = vld [vmem:[%s3498_s6 + $0x24] sm:$0xf0] }
 0xc99   :  { %v1495_v30 = vsel %vm1492_vm14, %v1494_v29, %v1490_v54  ;;  %v2402_v26 = vor.u32 %v2533_v21, %v2399_v22  ;;  %v2391_v54 = vld [vmem:[%s3498_s6 + $0x28] sm:$0xf0]  ;;  %v2390_v29 = vor.u32 %v2532_v24, %v2389_v23 }
 0xc9a   :  { %v2370_v31 = vmul.f32 -1.442695, %v1495_v30  ;;  %v2394_v30 = vor.u32 %v2531_v28, %v2391_v54 }
 0xc9b   :  { %1626 = vmatpush.bf16.msra.mxu1 %v2402_v26  ;;  %1614 = vmatpush.bf16.msra.mxu0 %v2390_v29 }
 0xc9c   :  { %2668 = vpow2.f32 %v2370_v31 }
 0xc9d   :  { %2670 = vrcp.f32 %v1427_v33 }
 0xc9f   :  { %1627 = vmatpush.bf16.msra.mxu1 %v2394_v30 }
 0xca2   :  { %v2669_v57 = vpop.eup %2668 }
 0xca3   :  { %v1500_v34 = vadd.f32 1.0, %v2669_v57  ;;  %v2671_v35 = vpop.eup %2670 }
 0xca4   :  { %v1429_v37 = vmul.f32 %v2671_v35, %v1427_v33  ;;  %vm1434_vm15 = vweird.f32 %v2671_v35  ;;  %v2381_v33 = vld [vmem:[%s3498_s6 + $0x10] sm:$0xf] }
 0xca5   :  { %2672 = vrcp.f32 %v1500_v34  ;;  %v1512_v50 = vand.u32 2147483648, %v1500_v34  ;;  %vm1506_vm5 = vweird.f32 %v1500_v34  ;;  %v1510_v53 = vand.u32 2147483647, %v1500_v34  ;;  %vm1435_vm6 = vmor %vm1433_vm4, %vm1434_vm15 }
 0xca6   :  { %v1430_v41 = vsub.f32 1.0, %v1429_v37  ;;  %v2383_v37 = vld [vmem:[%s3498_s6 + $0x18] sm:$0xf0] }
 0xca7   :  { %v1513_v61 = vor.u32 1.1754944e-38, %v1512_v50  ;;  %vm1511_vm9 = vcmp.eq.f32.partialorder %v1510_v53, 8.507059e+37 }
 0xca8   :  { %v1431_v45 = vmul.f32 %v2671_v35, %v1430_v41  ;;  %v2373_v41 = vld [vmem:[%s3498_s6] sm:$0xf] }
 0xcaa   :  { %v1432_v59 = vadd.f32 %v2671_v35, %v1431_v45  ;;  %v2527_v45 = vld [vmem:[%s3498_s6 + $0x4] sm:$0xf] }
 0xcab   :  { %v2673_v36 = vpop.eup %2672 }
 0xcac   :  { %v1502_v39 = vmul.f32 %v2673_v36, %v1500_v34  ;;  %vm1507_vm3 = vweird.f32 %v2673_v36  ;;  %v1436_v55 = vsel %vm1435_vm6, %v2671_v35, %v1432_v59  ;;  %v2530_v34 = vld [vmem:[%s3498_s6 + $0x14] sm:$0xf0]  ;;  %v2529_v35 = vld [vmem:[%s3498_s6 + $0x14] sm:$0xf]  ;;  %v2375_v59 = vld [vmem:[%s3498_s6 + $0x8] sm:$0xf0] }
 0xcad   :  { %vm1508_vm7 = vmor %vm1506_vm5, %vm1507_vm3  ;;  %v1441_v62 = vsel %vm1438_vm8, %v1440_v58, %v1436_v55 }
 0xcae   :  { %v1503_v44 = vsub.f32 1.0, %v1502_v39  ;;  %v1449_v14 = vmul.f32 %v1447_v4, %v1441_v62  ;;  %v2386_v39 = vor.u32 %v2529_v35, %v2383_v37 }
 0xcb0   :  { %v1504_v46 = vmul.f32 %v2673_v36, %v1503_v44  ;;  %v2528_v44 = vld [vmem:[%s3498_s6 + $0x4] sm:$0xf0]  ;;  %1628 = vmatpush.bf16.msra.mxu1 %v2386_v39 }
 0xcb2   :  { %v1505_v47 = vadd.f32 %v2673_v36, %v1504_v46  ;;  %v2374_v46 = vor.u32 %v2528_v44, %v2373_v41 }
 0xcb4   :  { %v1509_v56 = vsel %vm1508_vm7, %v2673_v36, %v1505_v47  ;;  %v2382_v36 = vor.u32 %v2530_v34, %v2381_v33  ;;  %v2378_v47 = vor.u32 %v2527_v45, %v2375_v59 }
 0xcb5   :  { %v1514_v0 = vsel %vm1511_vm9, %v1513_v61, %v1509_v56 }
 0xcb6   :  { %1615 = vmatpush.bf16.msra.mxu0 %v2382_v36  ;;  %1629 = vmatpush.bf16.msra.mxu1 %v2378_v47 }
 0xcba   :  { %1616 = vmatpush.bf16.msra.mxu0 %v2374_v46 }
 0xcf7   :  { %v1452_v60 = vpop.permute.xlu0 %1451 }
 0xcf8   :  { %v1525_v63 = vpop.permute.xlu1 %1524  ;;  %v1454_v1 = vmul.f32 %v1452_v60, %v1441_v62  ;;  %v156_v60 = vadd.f32 %v3203_v13, %v3196_v11 }
 0xcf9   :  { %v1527_v2 = vmul.f32 %v1525_v63, %v1514_v0 }
 0xcfa   :  { %1456 = vrot.lane.b32.xlu1 %v1454_v1, %s2721_s22 }
 0xcfb   :  { %1529 = vrot.lane.b32.xlu2 %v1527_v2, %s2721_s22 }
 0xcff   :  { %v1520_v5 = vpop.permute.xlu0 %1519 }
 0xd00   :  { %v1522_v6 = vmul.f32 %v1520_v5, %v1514_v0 }
 0xd55   :  { %v1530_v7 = vpop.permute.xlu2 %1529 }
 0xd56   :  { %v1532_v8 = vadd.f32 %v1530_v7, %v1522_v6 }
 0xd58   :  { %2674 = vtanh.f32 %v1532_v8 }
 0xd5e   :  { %v2675_v9 = vpop.eup %2674 }
 0xd5f   :  { %1535 = vrot.lane.b32.xlu1 %v2675_v9, %s2721_s22 }
 0xd6c   :  { %v1457_v15 = vpop.permute.xlu1 %1456 }
 0xd6d   :  { %v1459_v16 = vadd.f32 %v1457_v15, %v1449_v14 }
 0xd6f   :  { %2676 = vtanh.f32 %v1459_v16  ;;  %1467 = vrot.lane.b32.xlu1 %v1459_v16, %s2722_s1 }
 0xd75   :  { %v2677_v17 = vpop.eup %2676 }
 0xd76   :  { %1462 = vrot.lane.b32.xlu0 %v2677_v17, %s2721_s22 }
 0xdd1   :  { %v1536_v18 = vpop.permute.xlu1 %1535 }
 0xdd2   :  { %v3288_v19 = vmul.f32 %v1536_v18, %v1514_v0 }
 0xdd4   :  { %1551 = vrot.lane.b32.xlu0 %v3288_v19, %s2722_s1 }
 0xde1   :  { %v1468_v42 = vpop.permute.xlu1 %1467 }
 0xde2   :  { %1470 = vst.msk [vmem:[#allocation5] sm:$0xff] %vm65_vm1, %v1468_v42 }
 0xde8   :  { %v1463_v31 = vpop.permute.xlu0 %1462 }
 0xde9   :  { %v1465_v32 = vmul.f32 %v1463_v31, %v1441_v62  ;;  %v1659_v57 = vld [vmem:[#allocation5] sm:$0xff] }
 0xdeb   :  { %1473 = vrot.lane.b32.xlu2 %v1465_v32, %s2723_s5 }
 0xdf3   :  { %1540 = vrot.lane.b32.xlu2 %v1532_v8, %s2722_s1 }
 0xdfb   :  { %1661 = vrot.lane.b32.xlu2 %v1659_v57, %s2721_s22 }
 0xe45   :  { %v1474_v50 = vpop.permute.xlu2 %1473 }
 0xe46   :  { %v1476_v52 = vmax.f32 %v1471_v48, %v1474_v50  ;;  %v1552_v53 = vpop.permute.xlu0 %1551 }
 0xe47   :  { %v1554_v55 = vsel %vm65_vm1, %v1474_v50, %v1552_v53 }
 0xe48   :  { %1477 = vst.msk [vmem:[#allocation7] sm:$0xff] %vm65_vm1, %v1476_v52  ;;  %v1555_v56 = vpack.c.bf16 %v1554_v55, %v1554_v55 }
 0xe4a   :  { %1556 = vst.msk [vmem:[#allocation4] sm:$0xf] %vm63_vm0, %v1555_v56 }
 0xe4d   :  { %v1541_v58 = vpop.permute.xlu2 %1540 }
 0xe4e   :  { %1543 = vst.msk [vmem:[#allocation6] sm:$0xff] %vm65_vm1, %v1541_v58 }
 0xe51   :  { %v1557_v61 = vld [vmem:[#allocation4] sm:$0xf] }
 0xe52   :  { %2403 = vmatmul.msk.bf16.vlgmr.msra.gmra.mxu0 %vm314_vm2, %v1557_v61  ;;  %2404 = vmatmul.msk.bf16.vlgmr.msra.gmra.mxu1 %vm314_vm2, %v1557_v61 }
 0xe55   :  { %v1732_v7 = vld [vmem:[#allocation6] sm:$0xff]  ;;  %v1662_v58 = vpop.permute.xlu2 %1661 }
 0xecf   :  { %v1618_v62 = vpop.f32.mrf.mxu0  ;;  %v1631_v63 = vpop.f32.mrf.mxu1 }
 0xed0   :  { %v1636_v0 = vadd.f32 %v1618_v62, %v156_v60  ;;  %v1638_v1 = vadd.f32 %v1631_v63, %v2882_v43 }
 0xed2   :  { %2678 = vtanh.f32 %v1636_v0  ;;  %v2406_v8 = vmul.f32 -1.442695, %v1638_v1  ;;  %v2405_v22 = vmul.f32 -1.442695, %v1636_v0 }
 0xed3   :  { %2680 = vtanh.f32 %v1638_v1 }
 0xed4   :  { %2682 = vpow2.f32 %v2406_v8  ;;  %v2434_v8 = vld [vmem:[%s3498_s6 + $0x30] sm:$0xf] }
 0xed7   :  { %v1620_v2 = vpop.f32.mrf.mxu0  ;;  %v1633_v4 = vpop.f32.mrf.mxu1 }
 0xed8   :  { %v2679_v5 = vpop.eup %2678 }
 0xed9   :  { %v2681_v6 = vpop.eup %2680  ;;  %1666 = vrot.lane.b32.xlu0 %v2679_v5, %s2721_s22 }
 0xeda   :  { %1739 = vrot.lane.b32.xlu1 %v2681_v6, %s2721_s22  ;;  %v2683_v11 = vpop.eup %2682  ;;  %v2541_v6 = vld [vmem:[%s3498_s6 + $0x34] sm:$0xf] }
 0xedb   :  { %v1696_v9 = vadd.f32 1.0, %v2683_v11 }
 0xedd   :  { %2684 = vrcp.f32 %v1696_v9  ;;  %v1708_v18 = vand.u32 2147483648, %v1696_v9  ;;  %vm1702_vm11 = vweird.f32 %v1696_v9  ;;  %v1706_v10 = vand.u32 2147483647, %v1696_v9 }
 0xede   :  { %2686 = vpow2.f32 %v2405_v22  ;;  %v2540_v22 = vld [vmem:[%s3498_s6 + $0x24] sm:$0xf0] }
 0xedf   :  { %v1709_v21 = vor.u32 1.1754944e-38, %v1708_v18  ;;  %vm1707_vm13 = vcmp.eq.f32.partialorder %v1706_v10, 8.507059e+37 }
 0xee1   :  { %1734 = vrot.lane.b32.xlu0 %v1732_v7, %s2721_s22  ;;  %v2436_v7 = vld [vmem:[%s3498_s6 + $0x38] sm:$0xf0] }
 0xee2   :  { %v2439_v11 = vor.u32 %v2541_v6, %v2436_v7 }
 0xee3   :  { %v2685_v14 = vpop.eup %2684 }
 0xee4   :  { %v1698_v43 = vmul.f32 %v2685_v14, %v1696_v9  ;;  %vm1703_vm10 = vweird.f32 %v2685_v14  ;;  %v2687_v24 = vpop.eup %2686  ;;  %v2542_v9 = vld [vmem:[%s3498_s6 + $0x34] sm:$0xf0]  ;;  %1841 = vmatpush.bf16.msrb.mxu3 %v2439_v11 }
 0xee5   :  { %vm1704_vm12 = vmor %vm1702_vm11, %vm1703_vm10  ;;  %v1642_v28 = vadd.f32 1.0, %v2687_v24  ;;  %v2537_v24 = vld [vmem:[%s3498_s6 + $0x14] sm:$0xf] }
 0xee6   :  { %v1699_v15 = vsub.f32 1.0, %v1698_v43  ;;  %v2428_v43 = vld [vmem:[%s3498_s6 + $0x28] sm:$0xf0] }
 0xee7   :  { %v1654_v37 = vand.u32 2147483648, %v1642_v28  ;;  %vm1648_vm3 = vweird.f32 %v1642_v28  ;;  %v1652_v41 = vand.u32 2147483647, %v1642_v28 }
 0xee8   :  { %v1700_v16 = vmul.f32 %v2685_v14, %v1699_v15  ;;  %v2435_v15 = vor.u32 %v2542_v9, %v2434_v8 }
 0xee9   :  { %v1655_v59 = vor.u32 1.1754944e-38, %v1654_v37  ;;  %vm1653_vm7 = vcmp.eq.f32.partialorder %v1652_v41, 8.507059e+37 }
 0xeea   :  { %v1701_v17 = vadd.f32 %v2685_v14, %v1700_v16  ;;  %1828 = vmatpush.bf16.msrb.mxu2 %v2435_v15 }
 0xeec   :  { %v1705_v20 = vsel %vm1704_vm12, %v2685_v14, %v1701_v17  ;;  %v2539_v14 = vld [vmem:[%s3498_s6 + $0x24] sm:$0xf] }
 0xeed   :  { %v1710_v49 = vsel %vm1707_vm13, %v1709_v21, %v1705_v20  ;;  %v2431_v16 = vor.u32 %v2539_v14, %v2428_v43 }
 0xeee   :  { %v2407_v23 = vmul.f32 -1.442695, %v1710_v49  ;;  %v2426_v49 = vld [vmem:[%s3498_s6 + $0x20] sm:$0xf] }
 0xeef   :  { %1842 = vmatpush.bf16.msrb.mxu3 %v2431_v16 }
 0xef0   :  { %2688 = vpow2.f32 %v2407_v23  ;;  %v2427_v23 = vor.u32 %v2540_v22, %v2426_v49 }
 0xef1   :  { %2690 = vrcp.f32 %v1642_v28 }
 0xef2   :  { %1829 = vmatpush.bf16.msrb.mxu2 %v2427_v23 }
 0xef6   :  { %v2689_v26 = vpop.eup %2688 }
 0xef7   :  { %v1715_v54 = vadd.f32 1.0, %v2689_v26  ;;  %v2691_v29 = vpop.eup %2690  ;;  %v2420_v26 = vld [vmem:[%s3498_s6 + $0x18] sm:$0xf0] }
 0xef8   :  { %v1644_v42 = vmul.f32 %v2691_v29, %v1642_v28  ;;  %vm1649_vm14 = vweird.f32 %v2691_v29  ;;  %v2418_v28 = vld [vmem:[%s3498_s6 + $0x10] sm:$0xf] }
 0xef9   :  { %2692 = vrcp.f32 %v1715_v54  ;;  %v1727_v39 = vand.u32 2147483648, %v1715_v54  ;;  %vm1721_vm4 = vweird.f32 %v1715_v54  ;;  %v1725_v44 = vand.u32 2147483647, %v1715_v54  ;;  %vm1650_vm5 = vmor %vm1648_vm3, %vm1649_vm14 }
 0xefa   :  { %v1645_v32 = vsub.f32 1.0, %v1644_v42  ;;  %v2535_v42 = vld [vmem:[%s3498_s6 + $0x4] sm:$0xf] }
 0xefb   :  { %v1728_v47 = vor.u32 1.1754944e-38, %v1727_v39  ;;  %vm1726_vm8 = vcmp.eq.f32.partialorder %v1725_v44, 8.507059e+37 }
 0xefc   :  { %v1646_v33 = vmul.f32 %v2691_v29, %v1645_v32 }
 0xefe   :  { %v1647_v35 = vadd.f32 %v2691_v29, %v1646_v33  ;;  %v2536_v33 = vld [vmem:[%s3498_s6 + $0x4] sm:$0xf0] }
 0xeff   :  { %v2693_v30 = vpop.eup %2692 }
 0xf00   :  { %v1717_v31 = vmul.f32 %v2693_v30, %v1715_v54  ;;  %vm1722_vm15 = vweird.f32 %v2693_v30  ;;  %v1651_v45 = vsel %vm1650_vm5, %v2691_v29, %v1647_v35  ;;  %v2423_v54 = vor.u32 %v2537_v24, %v2420_v26  ;;  %v2538_v29 = vld [vmem:[%s3498_s6 + $0x14] sm:$0xf0] }
 0xf01   :  { %vm1723_vm6 = vmor %vm1721_vm4, %vm1722_vm15  ;;  %v1656_v50 = vsel %vm1653_vm7, %v1655_v59, %v1651_v45  ;;  %v1686_v35 = vld [vmem:[#allocation7] sm:$0xff]  ;;  %v158_v59 = vadd.f32 %v3203_v13, %v3198_v12 }
 0xf02   :  { %v1718_v57 = vsub.f32 1.0, %v1717_v31  ;;  %v1664_v1 = vmul.f32 %v1662_v58, %v1656_v50  ;;  %v2412_v31 = vld [vmem:[%s3498_s6 + $0x8] sm:$0xf0]  ;;  %1843 = vmatpush.bf16.msrb.mxu3 %v2423_v54 }
 0xf03   :  { %v2415_v32 = vor.u32 %v2535_v42, %v2412_v31 }
 0xf04   :  { %v1719_v34 = vmul.f32 %v2693_v30, %v1718_v57  ;;  %v2410_v57 = vld [vmem:[%s3498_s6] sm:$0xf] }
 0xf06   :  { %v1720_v36 = vadd.f32 %v2693_v30, %v1719_v34  ;;  %v2411_v34 = vor.u32 %v2536_v33, %v2410_v57  ;;  %1844 = vmatpush.bf16.msrb.mxu3 %v2415_v32 }
 0xf08   :  { %v1724_v46 = vsel %vm1723_vm6, %v2693_v30, %v1720_v36  ;;  %v2419_v30 = vor.u32 %v2538_v29, %v2418_v28 }
 0xf09   :  { %v1729_v53 = vsel %vm1726_vm8, %v1728_v47, %v1724_v46  ;;  %vm2081_vm8 = vcmask 31744  }
 0xf0a   :  { %1830 = vmatpush.bf16.msrb.mxu2 %v2419_v30 }
 0xf0e   :  { %1831 = vmatpush.bf16.msrb.mxu2 %v2411_v34 }
 0xf4b   :  { %v1667_v48 = vpop.permute.xlu0 %1666 }
 0xf4c   :  { %v1740_v52 = vpop.permute.xlu1 %1739  ;;  %v1669_v55 = vmul.f32 %v1667_v48, %v1656_v50 }
 0xf4d   :  { %v1742_v56 = vmul.f32 %v1740_v52, %v1729_v53 }
 0xf4e   :  { %1671 = vrot.lane.b32.xlu1 %v1669_v55, %s2721_s22 }
 0xf4f   :  { %1744 = vrot.lane.b32.xlu2 %v1742_v56, %s2721_s22 }
 0xf53   :  { %v1735_v61 = vpop.permute.xlu0 %1734 }
 0xf54   :  { %v1737_v60 = vmul.f32 %v1735_v61, %v1729_v53 }
 0xfa9   :  { %v1745_v62 = vpop.permute.xlu2 %1744 }
 0xfaa   :  { %v1747_v63 = vadd.f32 %v1745_v62, %v1737_v60 }
 0xfac   :  { %2694 = vtanh.f32 %v1747_v63 }
 0xfb2   :  { %v2695_v0 = vpop.eup %2694 }
 0xfb3   :  { %1750 = vrot.lane.b32.xlu1 %v2695_v0, %s2721_s22 }
 0xfbb   :  { %1755 = vrot.lane.b32.xlu1 %v1747_v63, %s2722_s1 }
 0xfc0   :  { %v1672_v2 = vpop.permute.xlu1 %1671 }
 0xfc1   :  { %v1674_v4 = vadd.f32 %v1672_v2, %v1664_v1 }
 0xfc3   :  { %2696 = vtanh.f32 %v1674_v4 }
 0xfc9   :  { %v2697_v5 = vpop.eup %2696 }
 0xfca   :  { %1677 = vrot.lane.b32.xlu0 %v2697_v5, %s2721_s22 }
0x1025   :  { %v1751_v17 = vpop.permute.xlu1 %1750 }
0x1026   :  { %v3379_v18 = vmul.f32 %v1751_v17, %v1729_v53 }
0x1028   :  { %1766 = vrot.lane.b32.xlu0 %v3379_v18, %s2722_s1 }
0x102d   :  { %v1756_v10 = vpop.permute.xlu1 %1755 }
0x102e   :  { %1758 = vst.msk [vmem:[#allocation6] sm:$0xff] %vm65_vm1, %v1756_v10 }
0x1030   :  { %1682 = vrot.lane.b32.xlu0 %v1674_v4, %s2722_s1 }
0x1035   :  { %v1947_v62 = vld [vmem:[#allocation6] sm:$0xff] }
0x103c   :  { %v1678_v20 = vpop.permute.xlu0 %1677 }
0x103d   :  { %v1680_v21 = vmul.f32 %v1678_v20, %v1656_v50 }
0x103f   :  { %1688 = vrot.lane.b32.xlu2 %v1680_v21, %s2723_s5 }
0x1099   :  { %v1689_v36 = vpop.permute.xlu2 %1688 }
0x109a   :  { %v1691_v37 = vmax.f32 %v1686_v35, %v1689_v36  ;;  %v1767_v39 = vpop.permute.xlu0 %1766  ;;  %v468_v35 = vld [vmem:[#allocation8] sm:$0xff] }
0x109b   :  { %v1769_v41 = vsel %vm65_vm1, %v1689_v36, %v1767_v39 }
0x109c   :  { %1692 = vst.msk [vmem:[#allocation7] sm:$0xff] %vm65_vm1, %v1691_v37  ;;  %v1770_v44 = vpack.c.bf16 %v1769_v41, %v1769_v41 }
0x109e   :  { %1771 = vst.msk [vmem:[#allocation4] sm:$0xf] %vm63_vm0, %v1770_v44 }
0x10a2   :  { %v1683_v45 = vpop.permute.xlu0 %1682 }
0x10a3   :  { %1685 = vst.msk [vmem:[#allocation5] sm:$0xff] %vm65_vm1, %v1683_v45 }
0x10a5   :  { %v1772_v46 = vld [vmem:[#allocation4] sm:$0xf] }
0x10a6   :  { %2440 = vmatmul.msk.bf16.vlgmr.msrb.gmra.mxu2 %vm314_vm2, %v1772_v46  ;;  %2441 = vmatmul.msk.bf16.vlgmr.msrb.gmra.mxu3 %vm314_vm2, %v1772_v46 }
0x10aa   :  { %v1874_v28 = vld [vmem:[#allocation5] sm:$0xff] }
0x1129   :  { %v1833_v47 = vpop.f32.mrf.mxu2  ;;  %v1846_v48 = vpop.f32.mrf.mxu3 }
0x112a   :  { %v1851_v50 = vadd.f32 %v1833_v47, %v158_v59  ;;  %v1853_v52 = vadd.f32 %v1846_v48, %v2875_v40 }
0x112c   :  { %2698 = vtanh.f32 %v1851_v50  ;;  %v2443_v53 = vmul.f32 -1.442695, %v1853_v52  ;;  %v2442_v8 = vmul.f32 -1.442695, %v1851_v50 }
0x112d   :  { %2700 = vtanh.f32 %v1853_v52 }
0x112e   :  { %2702 = vpow2.f32 %v2443_v53 }
0x1131   :  { %v1835_v55 = vpop.f32.mrf.mxu2  ;;  %v1848_v56 = vpop.f32.mrf.mxu3 }
0x1132   :  { %v2699_v58 = vpop.eup %2698 }
0x1133   :  { %v2701_v61 = vpop.eup %2700  ;;  %1881 = vrot.lane.b32.xlu1 %v2699_v58, %s2721_s22 }
0x1134   :  { %1954 = vrot.lane.b32.xlu2 %v2701_v61, %s2721_s22  ;;  %v2703_v60 = vpop.eup %2702 }
0x1135   :  { %v1911_v40 = vadd.f32 1.0, %v2703_v60 }
0x1137   :  { %2704 = vrcp.f32 %v1911_v40  ;;  %v1923_v1 = vand.u32 2147483648, %v1911_v40  ;;  %vm1917_vm10 = vweird.f32 %v1911_v40  ;;  %v1921_v2 = vand.u32 2147483647, %v1911_v40 }
0x1139   :  { %v1924_v4 = vor.u32 1.1754944e-38, %v1923_v1  ;;  %vm1922_vm12 = vcmp.eq.f32.partialorder %v1921_v2, 8.507059e+37 }
0x113b   :  { %470 = vrot.lane.b32.xlu1 %v2906_v3, %s2723_s5 }
0x113c   :  { %1949 = vrot.lane.b32.xlu2 %v1947_v62, %s2721_s22 }
0x113d   :  { %v2705_v12 = vpop.eup %2704 }
0x113e   :  { %v1913_v13 = vmul.f32 %v2705_v12, %v1911_v40  ;;  %vm1918_vm9 = vweird.f32 %v2705_v12 }
0x113f   :  { %vm1919_vm11 = vmor %vm1917_vm10, %vm1918_vm9 }
0x1140   :  { %v1914_v63 = vsub.f32 1.0, %v1913_v13 }
0x1142   :  { %v1915_v0 = vmul.f32 %v2705_v12, %v1914_v63 }
0x1143   :  { %901 = vrot.lane.b32.xlu1 %v3052_v38, %s2723_s5 }
0x1144   :  { %686 = vrot.lane.b32.xlu2 %v2976_v51, %s2723_s5  ;;  %v1916_v3 = vadd.f32 %v2705_v12, %v1915_v0 }
0x1146   :  { %v1920_v38 = vsel %vm1919_vm11, %v2705_v12, %v1916_v3 }
0x1147   :  { %v1925_v51 = vsel %vm1922_vm12, %v1924_v4, %v1920_v38 }
0x1148   :  { %v2444_v5 = vmul.f32 -1.442695, %v1925_v51 }
0x114a   :  { %2706 = vpow2.f32 %v2444_v5 }
0x114b   :  { %1116 = vrot.lane.b32.xlu1 %v3124_v27, %s2723_s5 }
0x1150   :  { %v2707_v6 = vpop.eup %2706 }
0x1151   :  { %v1930_v7 = vadd.f32 1.0, %v2707_v6 }
0x1153   :  { %1761 = vrot.lane.b32.xlu1 %v3379_v18, %s2723_s5  ;;  %2708 = vrcp.f32 %v1930_v7  ;;  %v1942_v17 = vand.u32 2147483648, %v1930_v7  ;;  %vm1936_vm14 = vweird.f32 %v1930_v7  ;;  %v1940_v18 = vand.u32 2147483647, %v1930_v7 }
0x1154   :  { %2710 = vpow2.f32 %v2442_v8 }
0x1155   :  { %v1943_v20 = vor.u32 1.1754944e-38, %v1942_v17  ;;  %vm1941_vm3 = vcmp.eq.f32.partialorder %v1940_v18, 8.507059e+37 }
0x1159   :  { %v2709_v27 = vpop.eup %2708 }
0x115a   :  { %v1932_v11 = vmul.f32 %v2709_v27, %v1930_v7  ;;  %v2711_v14 = vpop.eup %2710  ;;  %vm1937_vm13 = vweird.f32 %v2709_v27  ;;  %v1901_v7 = vld [vmem:[#allocation7] sm:$0xff] }
0x115b   :  { %v1857_v15 = vadd.f32 1.0, %v2711_v14  ;;  %vm1938_vm15 = vmor %vm1936_vm14, %vm1937_vm13  ;;  %v2544_v14 = vld [vmem:[%s3505_s7 + $0x8] sm:$0xff] }
0x115c   :  { %v1933_v9 = vsub.f32 1.0, %v1932_v11  ;;  %v2546_v11 = vld [vmem:[%s3505_s7 + $0x18] sm:$0xff] }
0x115d   :  { %2712 = vrcp.f32 %v1857_v15  ;;  %v1869_v30 = vand.u32 2147483648, %v1857_v15  ;;  %vm1863_vm5 = vweird.f32 %v1857_v15  ;;  %v1867_v42 = vand.u32 2147483647, %v1857_v15  ;;  %2042 = vmatpush.bf16.msrb.mxu0 %v2546_v11 }
0x115e   :  { %v1934_v43 = vmul.f32 %v2709_v27, %v1933_v9  ;;  %v2545_v9 = vld [vmem:[%s3505_s7 + $0x10] sm:$0xff] }
0x115f   :  { %v1870_v32 = vor.u32 1.1754944e-38, %v1869_v30  ;;  %vm1868_vm7 = vcmp.eq.f32.partialorder %v1867_v42, 8.507059e+37  ;;  %v2556_v30 = vld [vmem:[%s3504_s8] ss:$0 sm:$0xff] }
0x1160   :  { %v1935_v16 = vadd.f32 %v2709_v27, %v1934_v43 }
0x1161   :  { %2043 = vmatpush.bf16.msrb.mxu0 %v2545_v9 }
0x1162   :  { %v1939_v10 = vsel %vm1938_vm15, %v2709_v27, %v1935_v16 }
0x1163   :  { %v3438_v49 = vsel %vm1941_vm3, %v1943_v20, %v1939_v10  ;;  %v2713_v22 = vpop.eup %2712 }
0x1164   :  { %v1859_v24 = vmul.f32 %v2713_v22, %v1857_v15  ;;  %vm1864_vm4 = vweird.f32 %v2713_v22 }
0x1165   :  { %vm1865_vm6 = vmor %vm1863_vm5, %vm1864_vm4  ;;  %2044 = vmatpush.bf16.msrb.mxu0 %v2544_v14 }
0x1166   :  { %v1860_v26 = vsub.f32 1.0, %v1859_v24 }
0x1168   :  { %v1861_v54 = vmul.f32 %v2713_v22, %v1860_v26 }
0x116a   :  { %v1862_v29 = vadd.f32 %v2713_v22, %v1861_v54 }
0x116c   :  { %v1866_v31 = vsel %vm1865_vm6, %v2713_v22, %v1862_v29  ;;  %v2547_v22 = vld [vmem:[%s3506_s9] sm:$0xff] }
0x116d   :  { %v1871_v33 = vsel %vm1868_vm7, %v1870_v32, %v1866_v31  ;;  %2075 = vmatpush.bf16.msrb.mxu1 %v2547_v22 }
0x118e   :  { %v1955_v21 = vpop.permute.xlu2 %1954 }
0x118f   :  { %v1957_v23 = vmul.f32 %v1955_v21, %v3438_v49 }
0x1191   :  { %1959 = vrot.lane.b32.xlu0 %v1957_v23, %s2721_s22 }
0x1196   :  { %v1950_v36 = vpop.permute.xlu2 %1949 }
0x1197   :  { %v1952_v53 = vmul.f32 %v1950_v36, %v3438_v49 }
0x1199   :  { %1876 = vrot.lane.b32.xlu0 %v1874_v28, %s2721_s22 }
0x119e   :  { %v687_v41 = vpop.permute.xlu2 %686 }
0x11a5   :  { %v1882_v57 = vpop.permute.xlu1 %1881 }
0x11a6   :  { %v1884_v34 = vmul.f32 %v1882_v57, %v1871_v33 }
0x11a8   :  { %1886 = vrot.lane.b32.xlu2 %v1884_v34, %s2721_s22 }
0x11ad   :  { %v471_v37 = vpop.permute.xlu1 %470 }
0x11ae   :  { %v473_v39 = vmax.f32 %v468_v35, %v471_v37 }
0x11b0   :  { %474 = vst.msk [vmem:[#allocation8] sm:$0xff] %vm65_vm1, %v473_v39  ;;  %1331 = vrot.lane.b32.xlu2 %v3215_v25, %s2723_s5 }
0x11b5   :  { %v902_v59 = vpop.permute.xlu1 %901 }
0x11b7   :  { %v684_v44 = vld [vmem:[#allocation8] sm:$0xff] }
0x11b8   :  { %v689_v45 = vmax.f32 %v684_v44, %v687_v41 }
0x11ba   :  { %690 = vst.msk [vmem:[#allocation8] sm:$0xff] %vm65_vm1, %v689_v45 }
0x11bd   :  { %v1117_v50 = vpop.permute.xlu1 %1116 }
0x11c1   :  { %v899_v46 = vld [vmem:[#allocation8] sm:$0xff] }
0x11c2   :  { %v904_v47 = vmax.f32 %v899_v46, %v902_v59 }
0x11c4   :  { %905 = vst.msk [vmem:[#allocation8] sm:$0xff] %vm65_vm1, %v904_v47 }
0x11cb   :  { %v1114_v48 = vld [vmem:[#allocation8] sm:$0xff] }
0x11cc   :  { %v1119_v52 = vmax.f32 %v1114_v48, %v1117_v50 }
0x11ce   :  { %1120 = vst.msk [vmem:[#allocation8] sm:$0xff] %vm65_vm1, %v1119_v52 }
0x11d5   :  { %v1329_v58 = vld [vmem:[#allocation8] sm:$0xff] }
0x1202   :  { %v1887_v55 = vpop.permute.xlu2 %1886 }
0x1203   :  { %v1960_v56 = vpop.permute.xlu0 %1959 }
0x1204   :  { %v1962_v25 = vadd.f32 %v1960_v56, %v1952_v53 }
0x1206   :  { %2714 = vtanh.f32 %v1962_v25 }
0x120a   :  { %v1332_v61 = vpop.permute.xlu2 %1331 }
0x120b   :  { %v1877_v60 = vpop.permute.xlu0 %1876  ;;  %v1334_v62 = vmax.f32 %v1329_v58, %v1332_v61 }
0x120c   :  { %v2715_v40 = vpop.eup %2714  ;;  %v1879_v12 = vmul.f32 %v1877_v60, %v1871_v33 }
0x120d   :  { %1335 = vst.msk [vmem:[#allocation8] sm:$0xff] %vm65_vm1, %v1334_v62  ;;  %1965 = vrot.lane.b32.xlu0 %v2715_v40, %s2721_s22 }
0x120e   :  { %v1889_v13 = vadd.f32 %v1887_v55, %v1879_v12 }
0x1210   :  { %2716 = vtanh.f32 %v1889_v13 }
0x1214   :  { %v1544_v4 = vld [vmem:[#allocation8] sm:$0xff] }
0x1215   :  { %1546 = vrot.lane.b32.xlu0 %v3288_v19, %s2723_s5  ;;  %v1762_v19 = vpop.permute.xlu1 %1761 }
0x1216   :  { %v2717_v63 = vpop.eup %2716 }
0x1217   :  { %1892 = vrot.lane.b32.xlu2 %v2717_v63, %s2721_s22 }
0x1271   :  { %v1893_v0 = vpop.permute.xlu2 %1892 }
0x1272   :  { %v1895_v3 = vmul.f32 %v1893_v0, %v1871_v33  ;;  %v2557_v33 = vld [vmem:[%s3507_s10] ss:$0 sm:$0xff] }
0x1274   :  { %1903 = vrot.lane.b32.xlu1 %v1895_v3, %s2723_s5 }
0x127c   :  { %1897 = vrot.lane.b32.xlu1 %v1889_v13, %s2722_s1 }
0x127f   :  { %v1966_v1 = vpop.permute.xlu0 %1965 }
0x1280   :  { %v1968_v2 = vmul.f32 %v1966_v1, %v3438_v49  ;;  %v2543_v49 = vld [vmem:[%s3505_s7] sm:$0xff] }
0x1281   :  { %2045 = vmatpush.bf16.msrb.mxu0 %v2543_v49 }
0x1282   :  { %1976 = vrot.lane.b32.xlu0 %v1968_v2, %s2723_s5 }
0x1287   :  { %v1547_v38 = vpop.permute.xlu0 %1546 }
0x1288   :  { %v1549_v51 = vmax.f32 %v1544_v4, %v1547_v38 }
0x128a   :  { %1550 = vst.msk [vmem:[#allocation8] sm:$0xff] %vm65_vm1, %v1549_v51  ;;  %1981 = vrot.lane.b32.xlu0 %v1968_v2, %s2722_s1 }
0x1291   :  { %v1759_v5 = vld [vmem:[#allocation8] sm:$0xff] }
0x1292   :  { %v1764_v6 = vmax.f32 %v1759_v5, %v1762_v19 }
0x1294   :  { %1765 = vst.msk [vmem:[#allocation8] sm:$0xff] %vm65_vm1, %v1764_v6 }
0x129b   :  { %v1974_v16 = vld [vmem:[#allocation8] sm:$0xff] }
0x12e6   :  { %v1904_v27 = vpop.permute.xlu1 %1903 }
0x12e7   :  { %v1906_v8 = vmax.f32 %v1901_v7, %v1904_v27 }
0x12e9   :  { %1907 = vst.msk [vmem:[#allocation7] sm:$0xff] %vm65_vm1, %v1906_v8 }
0x12ee   :  { %v1898_v43 = vpop.permute.xlu1 %1897 }
0x12ef   :  { %1900 = vst.msk [vmem:[#allocation5] sm:$0xff] %vm65_vm1, %v1898_v43 }
0x12f0   :  { %v1990_v23 = vld [vmem:[#allocation7] sm:$0xff] }
0x12f4   :  { %v1977_v15 = vpop.permute.xlu0 %1976 }
0x12f5   :  { %v1979_v17 = vmax.f32 %v1974_v16, %v1977_v15 }
0x12f7   :  { %1980 = vst.msk [vmem:[#allocation8] sm:$0xff] %vm65_vm1, %v1979_v17 }
0x12fc   :  { %v1982_v18 = vpop.permute.xlu0 %1981 }
0x12fd   :  { %v1984_v10 = vsel %vm65_vm1, %v1904_v27, %v1982_v18 }
0x12fe   :  { %v1985_v20 = vpack.c.bf16 %v1984_v10, %v1984_v10  ;;  %v1991_v21 = vld [vmem:[#allocation8] sm:$0xff] }
0x12ff   :  { %1993 = vrot.lane.b32.xlu2 %v1991_v21, %s2721_s22 }
0x1300   :  { %1986 = vst.msk [vmem:[#allocation4] sm:$0xf] %vm63_vm0, %v1985_v20  ;;  %vm2064_vm0 = vcmask 130048  }
0x1307   :  { %1970 = vrot.lane.b32.xlu2 %v1962_v25, %s2722_s1 }
0x1359   :  { %v1994_v24 = vpop.permute.xlu2 %1993 }
0x135a   :  { %v1996_v26 = vsel %vm65_vm1, %v1990_v23, %v1994_v24 }
0x135b   :  { %v1997_v28 = vmax.f32 %v1996_v26, 0.0 }
0x135d   :  { %v1998_v54 = vpack.c.bf16 %v1997_v28, %v1997_v28 }
0x135f   :  { %2461 = vmatmul.msk.bf16.vlgmr.msrb.gmra.mxu0 %vm314_vm2, %v1998_v54 }
0x1361   :  { %v1971_v29 = vpop.permute.xlu2 %1970 }
0x1362   :  { %1973 = vst.msk [vmem:[#allocation6] sm:$0xff] %vm65_vm1, %v1971_v29 }
0x13dc   :  { %v2047_v42 = vpop.f32.mrf.mxu0 }
0x13dd   :  { %v2048_v31 = vadd.f32 %v2556_v30, %v2047_v42 }
0x13df   :  { %v2051_v32 = vpack.c.bf16 %v2048_v31, %v2048_v31 }
0x13e1   :  { %2466 = vmatmul.msk.bf16.vlgmr.msrb.gmra.mxu1 %vm2064_vm0, %v2051_v32 }
0x13e4   :  { %v2049_v57 = vpop.f32.mrf.mxu0 }
0x145e   :  { %v2077_v34 = vpop.f32.mrf.mxu1 }
0x145f   :  { %v2078_v35 = vadd.f32 %v2557_v33, %v2077_v34 }
0x1461   :  { %2082 = vst.msk [vmem:[%s3508_s11] sm:$0xff] %vm2081_vm8, %v2078_v35 }
0x1466   :  { %v2079_v36 = vpop.f32.mrf.mxu1 }

</bundles_post_ra>
